<compile_context>
chip_gen: v5e
topology: v5e:2x2
jax: 0.10.0
libtpu: 0.0.40
codegen_flags: <defaults>
</compile_context>

<pallas_src>
import functools

import jax
import jax.numpy as jnp
from jax.experimental import pallas as pl
from jax.experimental.pallas import tpu as pltpu

LANE = 128   # lane width: every feature dim padded to this
SUB = 16     # bf16 sublane tile: pad node counts to a multiple of 16


# ---------------------------------------------------------------------------
# Small helpers
# ---------------------------------------------------------------------------
def _round_up(n, m):
    return ((n + m - 1) // m) * m


def _pad_to(x, shape):
    return jnp.pad(x, [(0, s - d) for d, s in zip(x.shape, shape)])


# ---------------------------------------------------------------------------
# Fused kernel: one grid step = one block of BP (query, data) graph pairs.
# ---------------------------------------------------------------------------
def fused_count_kernel(q_adj_ref, qx_ref, d_adj_ref, dx_ref,
                       q_pool_ref, d_pool_ref,
                       qw_ref, qb_ref, dw_ref, db_ref,
                       hw_ref, hb_ref, o_ref, *, num_layers, eps):
    def gin_tower(adj, x_bf16, w_ref, b_ref):
        # adj: (R, R) bf16 block-diagonal over BP pairs; x: (R, LANE) bf16.
        x_f32 = x_bf16.astype(jnp.float32)
        for l in range(num_layers):                       # static unroll
            agg = (1.0 + eps) * x_f32 + jnp.dot(
                adj, x_bf16, preferred_element_type=jnp.float32)
            h = jnp.dot(agg.astype(jnp.bfloat16), w_ref[2 * l],
                        preferred_element_type=jnp.float32) + b_ref[2 * l]
            h = jnp.maximum(h, 0.0)
            x_f32 = jnp.dot(h.astype(jnp.bfloat16), w_ref[2 * l + 1],
                            preferred_element_type=jnp.float32) + b_ref[2 * l + 1]
            x_f32 = jnp.maximum(x_f32, 0.0)
            x_bf16 = x_f32.astype(jnp.bfloat16)
        return x_f32                                      # (R, LANE) f32

    qh = gin_tower(q_adj_ref[0], qx_ref[0], qw_ref, qb_ref)
    dh = gin_tower(d_adj_ref[0], dx_ref[0], dw_ref, db_ref)

    # Sum-pool per pair via a precomputed 0/1 pooling matrix; padded node rows
    # have zero columns in the pool matrix, so no iota/mask is needed. f32 MXU.
    q_pool = jnp.dot(q_pool_ref[...], qh, preferred_element_type=jnp.float32)  # (BP, LANE)
    d_pool = jnp.dot(d_pool_ref[...], dh, preferred_element_type=jnp.float32)  # (BP, LANE)

    # Head: cat(q_pool, d_pool) @ W1 realised as a split matmul (no lane concat),
    # batched over the BP pairs of this grid step.
    h1 = (jnp.dot(q_pool.astype(jnp.bfloat16), hw_ref[0],
                  preferred_element_type=jnp.float32)
          + jnp.dot(d_pool.astype(jnp.bfloat16), hw_ref[1],
                    preferred_element_type=jnp.float32)
          + hb_ref[0])
    h1 = jnp.maximum(h1, 0.0)
    h2 = jnp.dot(h1.astype(jnp.bfloat16), hw_ref[2],
                 preferred_element_type=jnp.float32) + hb_ref[1]
    h2 = jnp.maximum(h2, 0.0)
    h3 = jnp.dot(h2.astype(jnp.bfloat16), hw_ref[3],
                 preferred_element_type=jnp.float32) + hb_ref[2]
    o_ref[...] = jnp.maximum(h3, 0.0)      # (BP, LANE); real logits in lanes 0..7


def basic_count_net_forward(q_adj, qx, d_adj, dx, q_pool_mat, d_pool_mat,
                            q_w, q_b, d_w, d_b, h_w, h_b,
                            *, num_layers=3, eps=0.0):
    """Batched fused forward. Returns (num_pairs, 8) predictions."""
    nb, rq, _ = q_adj.shape
    _, rd, _ = d_adj.shape
    bp = q_pool_mat.shape[0]
    n_pairs = nb * bp

    def const_spec(a):
        return pl.BlockSpec(a.shape, lambda b: (0,) * a.ndim)

    args = (q_adj, qx, d_adj, dx, q_pool_mat, d_pool_mat,
            q_w, q_b, d_w, d_b, h_w, h_b)

    def tower_flops(r):
        return num_layers * (2 * r * r * LANE + 4 * r * LANE * LANE)

    flops = nb * (tower_flops(rq) + tower_flops(rd)
                  + 2 * bp * (rq + rd) * LANE          # pooling matmuls
                  + 4 * 2 * bp * LANE * LANE)          # head matmuls
    bytes_accessed = (sum(int(a.size) * a.dtype.itemsize for a in args)
                      + n_pairs * LANE * 4)

    kernel = functools.partial(fused_count_kernel, num_layers=num_layers, eps=eps)
    pred_pad = pl.pallas_call(
        kernel,
        out_shape=jax.ShapeDtypeStruct((n_pairs, LANE), jnp.float32),
        grid=(nb,),
        in_specs=[
            pl.BlockSpec((1, rq, rq), lambda b: (b, 0, 0)),
            pl.BlockSpec((1, rq, LANE), lambda b: (b, 0, 0)),
            pl.BlockSpec((1, rd, rd), lambda b: (b, 0, 0)),
            pl.BlockSpec((1, rd, LANE), lambda b: (b, 0, 0)),
            const_spec(q_pool_mat), const_spec(d_pool_mat),
            const_spec(q_w), const_spec(q_b),
            const_spec(d_w), const_spec(d_b),
            const_spec(h_w), const_spec(h_b),
        ],
        out_specs=pl.BlockSpec((bp, LANE), lambda b: (b, 0)),
        compiler_params=pltpu.CompilerParams(
            dimension_semantics=("parallel",),
            vmem_limit_bytes=32 * 1024 * 1024),
        cost_estimate=pl.CostEstimate(flops=flops, transcendentals=0,
                                      bytes_accessed=bytes_accessed),
    )(*args)
    return pred_pad[:, :8]


# ---------------------------------------------------------------------------
# One-time preprocessing (hoisted out of the forward path)
# ---------------------------------------------------------------------------
def edges_to_adj(edge_list, n_pad):
    """Dense A[dst, src] = 1 (f32, zero-padded to (n_pad, n_pad))."""
    src, dst = edge_list[0], edge_list[1]
    return jnp.zeros((n_pad, n_pad), jnp.float32).at[dst, src].set(1.0)


def block_diag(adjs):
    """(BP, N, N) -> (BP*N, BP*N) block-diagonal adjacency."""
    bp, n, _ = adjs.shape
    eye = jnp.eye(bp, dtype=adjs.dtype)
    return (eye[:, None, :, None] * adjs[:, :, None, :]).reshape(bp * n, bp * n)


def make_pool_matrix(bp, n_pad, n_real):
    """(bp, bp*n_pad) 0/1 f32: row b sums the first n_real node rows of pair b."""
    idx = jnp.arange(bp * n_pad)
    pair = idx // n_pad
    valid = (idx % n_pad) < n_real
    return ((pair[None, :] == jnp.arange(bp)[:, None]) & valid[None, :]).astype(jnp.float32)


def pack_gin_params(params):
    """[(W1,b1,W2,b2)]*L -> ((2L,128,128) bf16 weights, (2L,1,128) f32 biases)."""
    ws, bs = [], []
    for (w1, b1, w2, b2) in params:
        ws += [_pad_to(w1, (LANE, LANE)), _pad_to(w2, (LANE, LANE))]
        bs += [_pad_to(b1, (1, LANE)), _pad_to(b2, (1, LANE))]
    return jnp.stack(ws).astype(jnp.bfloat16), jnp.stack(bs).astype(jnp.float32)


def pack_head_params(head_params, out_dim):
    w1, b1, w2, b2, w3, b3 = head_params
    hw = jnp.stack([_pad_to(w1[:out_dim], (LANE, LANE)),    # query half of W1
                    _pad_to(w1[out_dim:], (LANE, LANE)),    # data half of W1
                    _pad_to(w2, (LANE, LANE)),
                    _pad_to(w3, (LANE, LANE))]).astype(jnp.bfloat16)
    hb = jnp.stack([_pad_to(b1, (1, LANE)),
                    _pad_to(b2, (1, LANE)),
                    _pad_to(b3, (1, LANE))]).astype(jnp.float32)
    return hw, hb


# ---------------------------------------------------------------------------
# Parameter init (matches the reference architecture dims)
# ---------------------------------------------------------------------------
def init_gin_params(key, in_dim, hid_dim, out_dim, num_layers=3):
    dims = ([(in_dim, hid_dim, hid_dim)]
            + [(hid_dim, hid_dim, hid_dim)] * (num_layers - 2)
            + [(hid_dim, hid_dim, out_dim)])
    params = []
    for (fi, fh, fo) in dims:
        key, k1, k2, k3, k4 = jax.random.split(key, 5)
        params.append((
            jax.random.normal(k1, (fi, fh), jnp.float32) * 0.1,
            jax.random.normal(k2, (1, fh), jnp.float32) * 0.1,
            jax.random.normal(k3, (fh, fo), jnp.float32) * 0.1,
            jax.random.normal(k4, (1, fo), jnp.float32) * 0.1,
        ))
    return params, key


def init_head_params(key, out_dim):
    key, k1, k2, k3, k4, k5, k6 = jax.random.split(key, 7)
    return (
        jax.random.normal(k1, (2 * out_dim, out_dim), jnp.float32) * 0.1,
        jax.random.normal(k2, (1, out_dim), jnp.float32) * 0.1,
        jax.random.normal(k3, (out_dim, out_dim // 2), jnp.float32) * 0.1,
        jax.random.normal(k4, (1, out_dim // 2), jnp.float32) * 0.1,
        jax.random.normal(k5, (out_dim // 2, 8), jnp.float32) * 0.1,
        jax.random.normal(k6, (1, 8), jnp.float32) * 0.1,
    ), key


def _ring_edges(n):
    """Undirected ring graph as a (2, 2n) edge list (both directions)."""
    src = jnp.arange(n, dtype=jnp.int32)
    dst = (src + 1) % n
    return jnp.stack([jnp.concatenate([src, dst]),
                      jnp.concatenate([dst, src])], axis=0)


# ---------------------------------------------------------------------------
if __name__ == "__main__":
    IN_DIM, Q_HID, D_HID, OUT_DIM = 16, 32, 32, 32
    NQ, ND = 8, 16                              # query / data graph node counts
    NQ_PAD, ND_PAD = _round_up(NQ, SUB), _round_up(ND, SUB)
    BP, NB = 8, 2                               # pairs per grid step, grid steps
    B = BP * NB                                 # total (query, data) pairs

    key = jax.random.PRNGKey(0)
    key, kq, kd = jax.random.split(key, 3)
    query_in_feat = jax.random.normal(kq, (B, NQ, IN_DIM), jnp.float32)
    data_in_feat = jax.random.normal(kd, (B, ND, IN_DIM), jnp.float32)
    query_edge_list = _ring_edges(NQ)
    data_edge_list = _ring_edges(ND)

    query_gin_raw, key = init_gin_params(key, IN_DIM, Q_HID, OUT_DIM)
    data_gin_raw, key = init_gin_params(key, IN_DIM, D_HID, OUT_DIM)
    head_raw, key = init_head_params(key, OUT_DIM)

    # ---- one-time preprocessing (static graphs + static weights) ----------
    q_adj1 = edges_to_adj(query_edge_list, NQ_PAD)
    d_adj1 = edges_to_adj(data_edge_list, ND_PAD)
    q_adj_pairs = jnp.broadcast_to(q_adj1, (B, NQ_PAD, NQ_PAD))
    d_adj_pairs = jnp.broadcast_to(d_adj1, (B, ND_PAD, ND_PAD))
    q_adj = jnp.stack([block_diag(q_adj_pairs[i * BP:(i + 1) * BP])
                       for i in range(NB)]).astype(jnp.bfloat16)   # (NB,128,128)
    d_adj = jnp.stack([block_diag(d_adj_pairs[i * BP:(i + 1) * BP])
                       for i in range(NB)]).astype(jnp.bfloat16)   # (NB,128,128)

    qx = _pad_to(query_in_feat, (B, NQ_PAD, LANE)).reshape(
        NB, BP * NQ_PAD, LANE).astype(jnp.bfloat16)                # (NB,128,128)
    dx = _pad_to(data_in_feat, (B, ND_PAD, LANE)).reshape(
        NB, BP * ND_PAD, LANE).astype(jnp.bfloat16)                # (NB,128,128)

    q_pool_mat = make_pool_matrix(BP, NQ_PAD, NQ)                  # (8,128) f32
    d_pool_mat = make_pool_matrix(BP, ND_PAD, ND)                  # (8,128) f32

    q_w, q_b = pack_gin_params(query_gin_raw)
    d_w, d_b = pack_gin_params(data_gin_raw)
    h_w, h_b = pack_head_params(head_raw, OUT_DIM)

    fwd = jax.jit(functools.partial(basic_count_net_forward, num_layers=3, eps=0.0))
    pred = fwd(q_adj, qx, d_adj, dx, q_pool_mat, d_pool_mat,
               q_w, q_b, d_w, d_b, h_w, h_b)
    pred = jax.block_until_ready(pred)

    assert pred.shape == (B, 8)
    assert bool(jnp.all(jnp.isfinite(pred)))
    print("KERNEL_OK")
</pallas_src>

<mosaic_0001>
module attributes {stable_mosaic.version = 11 : i64} {
  func.func @fused_count_kernel(%arg0: i32, %arg1: memref<1x128x128xbf16, #tpu.memory_space<vmem>>, %arg2: memref<1x128x128xbf16, #tpu.memory_space<vmem>>, %arg3: memref<1x128x128xbf16, #tpu.memory_space<vmem>>, %arg4: memref<1x128x128xbf16, #tpu.memory_space<vmem>>, %arg5: memref<8x128xf32, #tpu.memory_space<vmem>>, %arg6: memref<8x128xf32, #tpu.memory_space<vmem>>, %arg7: memref<6x128x128xbf16, #tpu.memory_space<vmem>>, %arg8: memref<6x1x128xf32, #tpu.memory_space<vmem>>, %arg9: memref<6x128x128xbf16, #tpu.memory_space<vmem>>, %arg10: memref<6x1x128xf32, #tpu.memory_space<vmem>>, %arg11: memref<4x128x128xbf16, #tpu.memory_space<vmem>>, %arg12: memref<3x1x128xf32, #tpu.memory_space<vmem>>, %arg13: memref<8x128xf32, #tpu.memory_space<vmem>>) attributes {dimension_semantics = [#tpu.dimension_semantics<parallel>], iteration_bounds = array<i64: 2>, scalar_prefetch = 0 : i64, scratch_operands = 0 : i64, tpu.core_type = #tpu.core_type<tc>, window_params = [{transform_indices = @transform_0, window_bounds = array<i64: 1, 128, 128>}, {transform_indices = @transform_1, window_bounds = array<i64: 1, 128, 128>}, {transform_indices = @transform_2, window_bounds = array<i64: 1, 128, 128>}, {transform_indices = @transform_3, window_bounds = array<i64: 1, 128, 128>}, {pipeline_mode = #tpu.pipeline_mode<synchronous>, transform_indices = @transform_4, window_bounds = array<i64: 8, 128>}, {pipeline_mode = #tpu.pipeline_mode<synchronous>, transform_indices = @transform_5, window_bounds = array<i64: 8, 128>}, {pipeline_mode = #tpu.pipeline_mode<synchronous>, transform_indices = @transform_6, window_bounds = array<i64: 6, 128, 128>}, {pipeline_mode = #tpu.pipeline_mode<synchronous>, transform_indices = @transform_7, window_bounds = array<i64: 6, 1, 128>}, {pipeline_mode = #tpu.pipeline_mode<synchronous>, transform_indices = @transform_8, window_bounds = array<i64: 6, 128, 128>}, {pipeline_mode = #tpu.pipeline_mode<synchronous>, transform_indices = @transform_9, window_bounds = array<i64: 6, 1, 128>}, {pipeline_mode = #tpu.pipeline_mode<synchronous>, transform_indices = @transform_10, window_bounds = array<i64: 4, 128, 128>}, {pipeline_mode = #tpu.pipeline_mode<synchronous>, transform_indices = @transform_11, window_bounds = array<i64: 3, 1, 128>}, {transform_indices = @transform_12, window_bounds = array<i64: 8, 128>}]} {
    %c0 = arith.constant 0 : index
    %c0_0 = arith.constant 0 : index
    %c0_1 = arith.constant 0 : index
    %0 = vector.load %arg1[%c0, %c0_0, %c0_1] : memref<1x128x128xbf16, #tpu.memory_space<vmem>>, vector<1x128x128xbf16>
    %1 = vector.shape_cast %0 : vector<1x128x128xbf16> to vector<128x128xbf16>
    %c0_2 = arith.constant 0 : index
    %c0_3 = arith.constant 0 : index
    %c0_4 = arith.constant 0 : index
    %2 = vector.load %arg2[%c0_2, %c0_3, %c0_4] : memref<1x128x128xbf16, #tpu.memory_space<vmem>>, vector<1x128x128xbf16>
    %3 = vector.shape_cast %2 : vector<1x128x128xbf16> to vector<128x128xbf16>
    %4 = arith.extf %3 : vector<128x128xbf16> to vector<128x128xf32>
    %cst = arith.constant 1.000000e+00 : f32
    %5 = vector.broadcast %cst : f32 to vector<128x128xf32>
    %6 = arith.mulf %5, %4 : vector<128x128xf32>
    %cst_5 = arith.constant dense<0.000000e+00> : vector<128x128xf32>
    %7 = tpu.matmul %1, %3, %cst_5 {dimension_numbers = #tpu.dot_dimension_numbers<[1], [0], [0], [1], [0, 0, 1, 1], [], []>} : vector<128x128xbf16>, vector<128x128xbf16>, vector<128x128xf32> -> vector<128x128xf32>
    %8 = arith.addf %6, %7 : vector<128x128xf32>
    %9 = arith.truncf %8 : vector<128x128xf32> to vector<128x128xbf16>
    %c0_6 = arith.constant 0 : index
    %c0_7 = arith.constant 0 : index
    %c0_8 = arith.constant 0 : index
    %10 = vector.load %arg7[%c0_6, %c0_7, %c0_8] : memref<6x128x128xbf16, #tpu.memory_space<vmem>>, vector<1x128x128xbf16>
    %11 = vector.shape_cast %10 : vector<1x128x128xbf16> to vector<128x128xbf16>
    %cst_9 = arith.constant dense<0.000000e+00> : vector<128x128xf32>
    %12 = tpu.matmul %9, %11, %cst_9 {dimension_numbers = #tpu.dot_dimension_numbers<[1], [0], [0], [1], [0, 0, 1, 1], [], []>} : vector<128x128xbf16>, vector<128x128xbf16>, vector<128x128xf32> -> vector<128x128xf32>
    %c0_10 = arith.constant 0 : index
    %c0_11 = arith.constant 0 : index
    %c0_12 = arith.constant 0 : index
    %13 = vector.load %arg8[%c0_10, %c0_11, %c0_12] : memref<6x1x128xf32, #tpu.memory_space<vmem>>, vector<1x1x128xf32>
    %14 = vector.shape_cast %13 : vector<1x1x128xf32> to vector<1x128xf32>
    %15 = vector.broadcast %14 : vector<1x128xf32> to vector<128x128xf32>
    %16 = arith.addf %12, %15 : vector<128x128xf32>
    %cst_13 = arith.constant 0.000000e+00 : f32
    %17 = vector.broadcast %cst_13 : f32 to vector<128x128xf32>
    %18 = arith.maximumf %16, %17 : vector<128x128xf32>
    %19 = arith.truncf %18 : vector<128x128xf32> to vector<128x128xbf16>
    %c1 = arith.constant 1 : index
    %c0_14 = arith.constant 0 : index
    %c0_15 = arith.constant 0 : index
    %20 = vector.load %arg7[%c1, %c0_14, %c0_15] : memref<6x128x128xbf16, #tpu.memory_space<vmem>>, vector<1x128x128xbf16>
    %21 = vector.shape_cast %20 : vector<1x128x128xbf16> to vector<128x128xbf16>
    %cst_16 = arith.constant dense<0.000000e+00> : vector<128x128xf32>
    %22 = tpu.matmul %19, %21, %cst_16 {dimension_numbers = #tpu.dot_dimension_numbers<[1], [0], [0], [1], [0, 0, 1, 1], [], []>} : vector<128x128xbf16>, vector<128x128xbf16>, vector<128x128xf32> -> vector<128x128xf32>
    %c1_17 = arith.constant 1 : index
    %c0_18 = arith.constant 0 : index
    %c0_19 = arith.constant 0 : index
    %23 = vector.load %arg8[%c1_17, %c0_18, %c0_19] : memref<6x1x128xf32, #tpu.memory_space<vmem>>, vector<1x1x128xf32>
    %24 = vector.shape_cast %23 : vector<1x1x128xf32> to vector<1x128xf32>
    %25 = vector.broadcast %24 : vector<1x128xf32> to vector<128x128xf32>
    %26 = arith.addf %22, %25 : vector<128x128xf32>
    %cst_20 = arith.constant 0.000000e+00 : f32
    %27 = vector.broadcast %cst_20 : f32 to vector<128x128xf32>
    %28 = arith.maximumf %26, %27 : vector<128x128xf32>
    %29 = arith.truncf %28 : vector<128x128xf32> to vector<128x128xbf16>
    %cst_21 = arith.constant 1.000000e+00 : f32
    %30 = vector.broadcast %cst_21 : f32 to vector<128x128xf32>
    %31 = arith.mulf %30, %28 : vector<128x128xf32>
    %cst_22 = arith.constant dense<0.000000e+00> : vector<128x128xf32>
    %32 = tpu.matmul %1, %29, %cst_22 {dimension_numbers = #tpu.dot_dimension_numbers<[1], [0], [0], [1], [0, 0, 1, 1], [], []>} : vector<128x128xbf16>, vector<128x128xbf16>, vector<128x128xf32> -> vector<128x128xf32>
    %33 = arith.addf %31, %32 : vector<128x128xf32>
    %34 = arith.truncf %33 : vector<128x128xf32> to vector<128x128xbf16>
    %c2 = arith.constant 2 : index
    %c0_23 = arith.constant 0 : index
    %c0_24 = arith.constant 0 : index
    %35 = vector.load %arg7[%c2, %c0_23, %c0_24] : memref<6x128x128xbf16, #tpu.memory_space<vmem>>, vector<1x128x128xbf16>
    %36 = vector.shape_cast %35 : vector<1x128x128xbf16> to vector<128x128xbf16>
    %cst_25 = arith.constant dense<0.000000e+00> : vector<128x128xf32>
    %37 = tpu.matmul %34, %36, %cst_25 {dimension_numbers = #tpu.dot_dimension_numbers<[1], [0], [0], [1], [0, 0, 1, 1], [], []>} : vector<128x128xbf16>, vector<128x128xbf16>, vector<128x128xf32> -> vector<128x128xf32>
    %c2_26 = arith.constant 2 : index
    %c0_27 = arith.constant 0 : index
    %c0_28 = arith.constant 0 : index
    %38 = vector.load %arg8[%c2_26, %c0_27, %c0_28] : memref<6x1x128xf32, #tpu.memory_space<vmem>>, vector<1x1x128xf32>
    %39 = vector.shape_cast %38 : vector<1x1x128xf32> to vector<1x128xf32>
    %40 = vector.broadcast %39 : vector<1x128xf32> to vector<128x128xf32>
    %41 = arith.addf %37, %40 : vector<128x128xf32>
    %cst_29 = arith.constant 0.000000e+00 : f32
    %42 = vector.broadcast %cst_29 : f32 to vector<128x128xf32>
    %43 = arith.maximumf %41, %42 : vector<128x128xf32>
    %44 = arith.truncf %43 : vector<128x128xf32> to vector<128x128xbf16>
    %c3 = arith.constant 3 : index
    %c0_30 = arith.constant 0 : index
    %c0_31 = arith.constant 0 : index
    %45 = vector.load %arg7[%c3, %c0_30, %c0_31] : memref<6x128x128xbf16, #tpu.memory_space<vmem>>, vector<1x128x128xbf16>
    %46 = vector.shape_cast %45 : vector<1x128x128xbf16> to vector<128x128xbf16>
    %cst_32 = arith.constant dense<0.000000e+00> : vector<128x128xf32>
    %47 = tpu.matmul %44, %46, %cst_32 {dimension_numbers = #tpu.dot_dimension_numbers<[1], [0], [0], [1], [0, 0, 1, 1], [], []>} : vector<128x128xbf16>, vector<128x128xbf16>, vector<128x128xf32> -> vector<128x128xf32>
    %c3_33 = arith.constant 3 : index
    %c0_34 = arith.constant 0 : index
    %c0_35 = arith.constant 0 : index
    %48 = vector.load %arg8[%c3_33, %c0_34, %c0_35] : memref<6x1x128xf32, #tpu.memory_space<vmem>>, vector<1x1x128xf32>
    %49 = vector.shape_cast %48 : vector<1x1x128xf32> to vector<1x128xf32>
    %50 = vector.broadcast %49 : vector<1x128xf32> to vector<128x128xf32>
    %51 = arith.addf %47, %50 : vector<128x128xf32>
    %cst_36 = arith.constant 0.000000e+00 : f32
    %52 = vector.broadcast %cst_36 : f32 to vector<128x128xf32>
    %53 = arith.maximumf %51, %52 : vector<128x128xf32>
    %54 = arith.truncf %53 : vector<128x128xf32> to vector<128x128xbf16>
    %cst_37 = arith.constant 1.000000e+00 : f32
    %55 = vector.broadcast %cst_37 : f32 to vector<128x128xf32>
    %56 = arith.mulf %55, %53 : vector<128x128xf32>
    %cst_38 = arith.constant dense<0.000000e+00> : vector<128x128xf32>
    %57 = tpu.matmul %1, %54, %cst_38 {dimension_numbers = #tpu.dot_dimension_numbers<[1], [0], [0], [1], [0, 0, 1, 1], [], []>} : vector<128x128xbf16>, vector<128x128xbf16>, vector<128x128xf32> -> vector<128x128xf32>
    %58 = arith.addf %56, %57 : vector<128x128xf32>
    %59 = arith.truncf %58 : vector<128x128xf32> to vector<128x128xbf16>
    %c4 = arith.constant 4 : index
    %c0_39 = arith.constant 0 : index
    %c0_40 = arith.constant 0 : index
    %60 = vector.load %arg7[%c4, %c0_39, %c0_40] : memref<6x128x128xbf16, #tpu.memory_space<vmem>>, vector<1x128x128xbf16>
    %61 = vector.shape_cast %60 : vector<1x128x128xbf16> to vector<128x128xbf16>
    %cst_41 = arith.constant dense<0.000000e+00> : vector<128x128xf32>
    %62 = tpu.matmul %59, %61, %cst_41 {dimension_numbers = #tpu.dot_dimension_numbers<[1], [0], [0], [1], [0, 0, 1, 1], [], []>} : vector<128x128xbf16>, vector<128x128xbf16>, vector<128x128xf32> -> vector<128x128xf32>
    %c4_42 = arith.constant 4 : index
    %c0_43 = arith.constant 0 : index
    %c0_44 = arith.constant 0 : index
    %63 = vector.load %arg8[%c4_42, %c0_43, %c0_44] : memref<6x1x128xf32, #tpu.memory_space<vmem>>, vector<1x1x128xf32>
    %64 = vector.shape_cast %63 : vector<1x1x128xf32> to vector<1x128xf32>
    %65 = vector.broadcast %64 : vector<1x128xf32> to vector<128x128xf32>
    %66 = arith.addf %62, %65 : vector<128x128xf32>
    %cst_45 = arith.constant 0.000000e+00 : f32
    %67 = vector.broadcast %cst_45 : f32 to vector<128x128xf32>
    %68 = arith.maximumf %66, %67 : vector<128x128xf32>
    %69 = arith.truncf %68 : vector<128x128xf32> to vector<128x128xbf16>
    %c5 = arith.constant 5 : index
    %c0_46 = arith.constant 0 : index
    %c0_47 = arith.constant 0 : index
    %70 = vector.load %arg7[%c5, %c0_46, %c0_47] : memref<6x128x128xbf16, #tpu.memory_space<vmem>>, vector<1x128x128xbf16>
    %71 = vector.shape_cast %70 : vector<1x128x128xbf16> to vector<128x128xbf16>
    %cst_48 = arith.constant dense<0.000000e+00> : vector<128x128xf32>
    %72 = tpu.matmul %69, %71, %cst_48 {dimension_numbers = #tpu.dot_dimension_numbers<[1], [0], [0], [1], [0, 0, 1, 1], [], []>} : vector<128x128xbf16>, vector<128x128xbf16>, vector<128x128xf32> -> vector<128x128xf32>
    %c5_49 = arith.constant 5 : index
    %c0_50 = arith.constant 0 : index
    %c0_51 = arith.constant 0 : index
    %73 = vector.load %arg8[%c5_49, %c0_50, %c0_51] : memref<6x1x128xf32, #tpu.memory_space<vmem>>, vector<1x1x128xf32>
    %74 = vector.shape_cast %73 : vector<1x1x128xf32> to vector<1x128xf32>
    %75 = vector.broadcast %74 : vector<1x128xf32> to vector<128x128xf32>
    %76 = arith.addf %72, %75 : vector<128x128xf32>
    %cst_52 = arith.constant 0.000000e+00 : f32
    %77 = vector.broadcast %cst_52 : f32 to vector<128x128xf32>
    %78 = arith.maximumf %76, %77 : vector<128x128xf32>
    %c0_53 = arith.constant 0 : index
    %c0_54 = arith.constant 0 : index
    %c0_55 = arith.constant 0 : index
    %79 = vector.load %arg3[%c0_53, %c0_54, %c0_55] : memref<1x128x128xbf16, #tpu.memory_space<vmem>>, vector<1x128x128xbf16>
    %80 = vector.shape_cast %79 : vector<1x128x128xbf16> to vector<128x128xbf16>
    %c0_56 = arith.constant 0 : index
    %c0_57 = arith.constant 0 : index
    %c0_58 = arith.constant 0 : index
    %81 = vector.load %arg4[%c0_56, %c0_57, %c0_58] : memref<1x128x128xbf16, #tpu.memory_space<vmem>>, vector<1x128x128xbf16>
    %82 = vector.shape_cast %81 : vector<1x128x128xbf16> to vector<128x128xbf16>
    %83 = arith.extf %82 : vector<128x128xbf16> to vector<128x128xf32>
    %cst_59 = arith.constant 1.000000e+00 : f32
    %84 = vector.broadcast %cst_59 : f32 to vector<128x128xf32>
    %85 = arith.mulf %84, %83 : vector<128x128xf32>
    %cst_60 = arith.constant dense<0.000000e+00> : vector<128x128xf32>
    %86 = tpu.matmul %80, %82, %cst_60 {dimension_numbers = #tpu.dot_dimension_numbers<[1], [0], [0], [1], [0, 0, 1, 1], [], []>} : vector<128x128xbf16>, vector<128x128xbf16>, vector<128x128xf32> -> vector<128x128xf32>
    %87 = arith.addf %85, %86 : vector<128x128xf32>
    %88 = arith.truncf %87 : vector<128x128xf32> to vector<128x128xbf16>
    %c0_61 = arith.constant 0 : index
    %c0_62 = arith.constant 0 : index
    %c0_63 = arith.constant 0 : index
    %89 = vector.load %arg9[%c0_61, %c0_62, %c0_63] : memref<6x128x128xbf16, #tpu.memory_space<vmem>>, vector<1x128x128xbf16>
    %90 = vector.shape_cast %89 : vector<1x128x128xbf16> to vector<128x128xbf16>
    %cst_64 = arith.constant dense<0.000000e+00> : vector<128x128xf32>
    %91 = tpu.matmul %88, %90, %cst_64 {dimension_numbers = #tpu.dot_dimension_numbers<[1], [0], [0], [1], [0, 0, 1, 1], [], []>} : vector<128x128xbf16>, vector<128x128xbf16>, vector<128x128xf32> -> vector<128x128xf32>
    %c0_65 = arith.constant 0 : index
    %c0_66 = arith.constant 0 : index
    %c0_67 = arith.constant 0 : index
    %92 = vector.load %arg10[%c0_65, %c0_66, %c0_67] : memref<6x1x128xf32, #tpu.memory_space<vmem>>, vector<1x1x128xf32>
    %93 = vector.shape_cast %92 : vector<1x1x128xf32> to vector<1x128xf32>
    %94 = vector.broadcast %93 : vector<1x128xf32> to vector<128x128xf32>
    %95 = arith.addf %91, %94 : vector<128x128xf32>
    %cst_68 = arith.constant 0.000000e+00 : f32
    %96 = vector.broadcast %cst_68 : f32 to vector<128x128xf32>
    %97 = arith.maximumf %95, %96 : vector<128x128xf32>
    %98 = arith.truncf %97 : vector<128x128xf32> to vector<128x128xbf16>
    %c1_69 = arith.constant 1 : index
    %c0_70 = arith.constant 0 : index
    %c0_71 = arith.constant 0 : index
    %99 = vector.load %arg9[%c1_69, %c0_70, %c0_71] : memref<6x128x128xbf16, #tpu.memory_space<vmem>>, vector<1x128x128xbf16>
    %100 = vector.shape_cast %99 : vector<1x128x128xbf16> to vector<128x128xbf16>
    %cst_72 = arith.constant dense<0.000000e+00> : vector<128x128xf32>
    %101 = tpu.matmul %98, %100, %cst_72 {dimension_numbers = #tpu.dot_dimension_numbers<[1], [0], [0], [1], [0, 0, 1, 1], [], []>} : vector<128x128xbf16>, vector<128x128xbf16>, vector<128x128xf32> -> vector<128x128xf32>
    %c1_73 = arith.constant 1 : index
    %c0_74 = arith.constant 0 : index
    %c0_75 = arith.constant 0 : index
    %102 = vector.load %arg10[%c1_73, %c0_74, %c0_75] : memref<6x1x128xf32, #tpu.memory_space<vmem>>, vector<1x1x128xf32>
    %103 = vector.shape_cast %102 : vector<1x1x128xf32> to vector<1x128xf32>
    %104 = vector.broadcast %103 : vector<1x128xf32> to vector<128x128xf32>
    %105 = arith.addf %101, %104 : vector<128x128xf32>
    %cst_76 = arith.constant 0.000000e+00 : f32
    %106 = vector.broadcast %cst_76 : f32 to vector<128x128xf32>
    %107 = arith.maximumf %105, %106 : vector<128x128xf32>
    %108 = arith.truncf %107 : vector<128x128xf32> to vector<128x128xbf16>
    %cst_77 = arith.constant 1.000000e+00 : f32
    %109 = vector.broadcast %cst_77 : f32 to vector<128x128xf32>
    %110 = arith.mulf %109, %107 : vector<128x128xf32>
    %cst_78 = arith.constant dense<0.000000e+00> : vector<128x128xf32>
    %111 = tpu.matmul %80, %108, %cst_78 {dimension_numbers = #tpu.dot_dimension_numbers<[1], [0], [0], [1], [0, 0, 1, 1], [], []>} : vector<128x128xbf16>, vector<128x128xbf16>, vector<128x128xf32> -> vector<128x128xf32>
    %112 = arith.addf %110, %111 : vector<128x128xf32>
    %113 = arith.truncf %112 : vector<128x128xf32> to vector<128x128xbf16>
    %c2_79 = arith.constant 2 : index
    %c0_80 = arith.constant 0 : index
    %c0_81 = arith.constant 0 : index
    %114 = vector.load %arg9[%c2_79, %c0_80, %c0_81] : memref<6x128x128xbf16, #tpu.memory_space<vmem>>, vector<1x128x128xbf16>
    %115 = vector.shape_cast %114 : vector<1x128x128xbf16> to vector<128x128xbf16>
    %cst_82 = arith.constant dense<0.000000e+00> : vector<128x128xf32>
    %116 = tpu.matmul %113, %115, %cst_82 {dimension_numbers = #tpu.dot_dimension_numbers<[1], [0], [0], [1], [0, 0, 1, 1], [], []>} : vector<128x128xbf16>, vector<128x128xbf16>, vector<128x128xf32> -> vector<128x128xf32>
    %c2_83 = arith.constant 2 : index
    %c0_84 = arith.constant 0 : index
    %c0_85 = arith.constant 0 : index
    %117 = vector.load %arg10[%c2_83, %c0_84, %c0_85] : memref<6x1x128xf32, #tpu.memory_space<vmem>>, vector<1x1x128xf32>
    %118 = vector.shape_cast %117 : vector<1x1x128xf32> to vector<1x128xf32>
    %119 = vector.broadcast %118 : vector<1x128xf32> to vector<128x128xf32>
    %120 = arith.addf %116, %119 : vector<128x128xf32>
    %cst_86 = arith.constant 0.000000e+00 : f32
    %121 = vector.broadcast %cst_86 : f32 to vector<128x128xf32>
    %122 = arith.maximumf %120, %121 : vector<128x128xf32>
    %123 = arith.truncf %122 : vector<128x128xf32> to vector<128x128xbf16>
    %c3_87 = arith.constant 3 : index
    %c0_88 = arith.constant 0 : index
    %c0_89 = arith.constant 0 : index
    %124 = vector.load %arg9[%c3_87, %c0_88, %c0_89] : memref<6x128x128xbf16, #tpu.memory_space<vmem>>, vector<1x128x128xbf16>
    %125 = vector.shape_cast %124 : vector<1x128x128xbf16> to vector<128x128xbf16>
    %cst_90 = arith.constant dense<0.000000e+00> : vector<128x128xf32>
    %126 = tpu.matmul %123, %125, %cst_90 {dimension_numbers = #tpu.dot_dimension_numbers<[1], [0], [0], [1], [0, 0, 1, 1], [], []>} : vector<128x128xbf16>, vector<128x128xbf16>, vector<128x128xf32> -> vector<128x128xf32>
    %c3_91 = arith.constant 3 : index
    %c0_92 = arith.constant 0 : index
    %c0_93 = arith.constant 0 : index
    %127 = vector.load %arg10[%c3_91, %c0_92, %c0_93] : memref<6x1x128xf32, #tpu.memory_space<vmem>>, vector<1x1x128xf32>
    %128 = vector.shape_cast %127 : vector<1x1x128xf32> to vector<1x128xf32>
    %129 = vector.broadcast %128 : vector<1x128xf32> to vector<128x128xf32>
    %130 = arith.addf %126, %129 : vector<128x128xf32>
    %cst_94 = arith.constant 0.000000e+00 : f32
    %131 = vector.broadcast %cst_94 : f32 to vector<128x128xf32>
    %132 = arith.maximumf %130, %131 : vector<128x128xf32>
    %133 = arith.truncf %132 : vector<128x128xf32> to vector<128x128xbf16>
    %cst_95 = arith.constant 1.000000e+00 : f32
    %134 = vector.broadcast %cst_95 : f32 to vector<128x128xf32>
    %135 = arith.mulf %134, %132 : vector<128x128xf32>
    %cst_96 = arith.constant dense<0.000000e+00> : vector<128x128xf32>
    %136 = tpu.matmul %80, %133, %cst_96 {dimension_numbers = #tpu.dot_dimension_numbers<[1], [0], [0], [1], [0, 0, 1, 1], [], []>} : vector<128x128xbf16>, vector<128x128xbf16>, vector<128x128xf32> -> vector<128x128xf32>
    %137 = arith.addf %135, %136 : vector<128x128xf32>
    %138 = arith.truncf %137 : vector<128x128xf32> to vector<128x128xbf16>
    %c4_97 = arith.constant 4 : index
    %c0_98 = arith.constant 0 : index
    %c0_99 = arith.constant 0 : index
    %139 = vector.load %arg9[%c4_97, %c0_98, %c0_99] : memref<6x128x128xbf16, #tpu.memory_space<vmem>>, vector<1x128x128xbf16>
    %140 = vector.shape_cast %139 : vector<1x128x128xbf16> to vector<128x128xbf16>
    %cst_100 = arith.constant dense<0.000000e+00> : vector<128x128xf32>
    %141 = tpu.matmul %138, %140, %cst_100 {dimension_numbers = #tpu.dot_dimension_numbers<[1], [0], [0], [1], [0, 0, 1, 1], [], []>} : vector<128x128xbf16>, vector<128x128xbf16>, vector<128x128xf32> -> vector<128x128xf32>
    %c4_101 = arith.constant 4 : index
    %c0_102 = arith.constant 0 : index
    %c0_103 = arith.constant 0 : index
    %142 = vector.load %arg10[%c4_101, %c0_102, %c0_103] : memref<6x1x128xf32, #tpu.memory_space<vmem>>, vector<1x1x128xf32>
    %143 = vector.shape_cast %142 : vector<1x1x128xf32> to vector<1x128xf32>
    %144 = vector.broadcast %143 : vector<1x128xf32> to vector<128x128xf32>
    %145 = arith.addf %141, %144 : vector<128x128xf32>
    %cst_104 = arith.constant 0.000000e+00 : f32
    %146 = vector.broadcast %cst_104 : f32 to vector<128x128xf32>
    %147 = arith.maximumf %145, %146 : vector<128x128xf32>
    %148 = arith.truncf %147 : vector<128x128xf32> to vector<128x128xbf16>
    %c5_105 = arith.constant 5 : index
    %c0_106 = arith.constant 0 : index
    %c0_107 = arith.constant 0 : index
    %149 = vector.load %arg9[%c5_105, %c0_106, %c0_107] : memref<6x128x128xbf16, #tpu.memory_space<vmem>>, vector<1x128x128xbf16>
    %150 = vector.shape_cast %149 : vector<1x128x128xbf16> to vector<128x128xbf16>
    %cst_108 = arith.constant dense<0.000000e+00> : vector<128x128xf32>
    %151 = tpu.matmul %148, %150, %cst_108 {dimension_numbers = #tpu.dot_dimension_numbers<[1], [0], [0], [1], [0, 0, 1, 1], [], []>} : vector<128x128xbf16>, vector<128x128xbf16>, vector<128x128xf32> -> vector<128x128xf32>
    %c5_109 = arith.constant 5 : index
    %c0_110 = arith.constant 0 : index
    %c0_111 = arith.constant 0 : index
    %152 = vector.load %arg10[%c5_109, %c0_110, %c0_111] : memref<6x1x128xf32, #tpu.memory_space<vmem>>, vector<1x1x128xf32>
    %153 = vector.shape_cast %152 : vector<1x1x128xf32> to vector<1x128xf32>
    %154 = vector.broadcast %153 : vector<1x128xf32> to vector<128x128xf32>
    %155 = arith.addf %151, %154 : vector<128x128xf32>
    %cst_112 = arith.constant 0.000000e+00 : f32
    %156 = vector.broadcast %cst_112 : f32 to vector<128x128xf32>
    %157 = arith.maximumf %155, %156 : vector<128x128xf32>
    %c0_113 = arith.constant 0 : index
    %c0_114 = arith.constant 0 : index
    %158 = vector.load %arg5[%c0_113, %c0_114] : memref<8x128xf32, #tpu.memory_space<vmem>>, vector<8x128xf32>
    %cst_115 = arith.constant dense<0.000000e+00> : vector<8x128xf32>
    %159 = tpu.matmul %158, %78, %cst_115 {dimension_numbers = #tpu.dot_dimension_numbers<[1], [0], [0], [1], [0, 0, 1, 1], [], []>} : vector<8x128xf32>, vector<128x128xf32>, vector<8x128xf32> -> vector<8x128xf32>
    %c0_116 = arith.constant 0 : index
    %c0_117 = arith.constant 0 : index
    %160 = vector.load %arg6[%c0_116, %c0_117] : memref<8x128xf32, #tpu.memory_space<vmem>>, vector<8x128xf32>
    %cst_118 = arith.constant dense<0.000000e+00> : vector<8x128xf32>
    %161 = tpu.matmul %160, %157, %cst_118 {dimension_numbers = #tpu.dot_dimension_numbers<[1], [0], [0], [1], [0, 0, 1, 1], [], []>} : vector<8x128xf32>, vector<128x128xf32>, vector<8x128xf32> -> vector<8x128xf32>
    %162 = arith.truncf %159 : vector<8x128xf32> to vector<8x128xbf16>
    %c0_119 = arith.constant 0 : index
    %c0_120 = arith.constant 0 : index
    %c0_121 = arith.constant 0 : index
    %163 = vector.load %arg11[%c0_119, %c0_120, %c0_121] : memref<4x128x128xbf16, #tpu.memory_space<vmem>>, vector<1x128x128xbf16>
    %164 = vector.shape_cast %163 : vector<1x128x128xbf16> to vector<128x128xbf16>
    %cst_122 = arith.constant dense<0.000000e+00> : vector<8x128xf32>
    %165 = tpu.matmul %162, %164, %cst_122 {dimension_numbers = #tpu.dot_dimension_numbers<[1], [0], [0], [1], [0, 0, 1, 1], [], []>} : vector<8x128xbf16>, vector<128x128xbf16>, vector<8x128xf32> -> vector<8x128xf32>
    %166 = arith.truncf %161 : vector<8x128xf32> to vector<8x128xbf16>
    %c1_123 = arith.constant 1 : index
    %c0_124 = arith.constant 0 : index
    %c0_125 = arith.constant 0 : index
    %167 = vector.load %arg11[%c1_123, %c0_124, %c0_125] : memref<4x128x128xbf16, #tpu.memory_space<vmem>>, vector<1x128x128xbf16>
    %168 = vector.shape_cast %167 : vector<1x128x128xbf16> to vector<128x128xbf16>
    %cst_126 = arith.constant dense<0.000000e+00> : vector<8x128xf32>
    %169 = tpu.matmul %166, %168, %cst_126 {dimension_numbers = #tpu.dot_dimension_numbers<[1], [0], [0], [1], [0, 0, 1, 1], [], []>} : vector<8x128xbf16>, vector<128x128xbf16>, vector<8x128xf32> -> vector<8x128xf32>
    %170 = arith.addf %165, %169 : vector<8x128xf32>
    %c0_127 = arith.constant 0 : index
    %c0_128 = arith.constant 0 : index
    %c0_129 = arith.constant 0 : index
    %171 = vector.load %arg12[%c0_127, %c0_128, %c0_129] : memref<3x1x128xf32, #tpu.memory_space<vmem>>, vector<1x1x128xf32>
    %172 = vector.shape_cast %171 : vector<1x1x128xf32> to vector<1x128xf32>
    %173 = vector.broadcast %172 : vector<1x128xf32> to vector<8x128xf32>
    %174 = arith.addf %170, %173 : vector<8x128xf32>
    %cst_130 = arith.constant 0.000000e+00 : f32
    %175 = vector.broadcast %cst_130 : f32 to vector<8x128xf32>
    %176 = arith.maximumf %174, %175 : vector<8x128xf32>
    %177 = arith.truncf %176 : vector<8x128xf32> to vector<8x128xbf16>
    %c2_131 = arith.constant 2 : index
    %c0_132 = arith.constant 0 : index
    %c0_133 = arith.constant 0 : index
    %178 = vector.load %arg11[%c2_131, %c0_132, %c0_133] : memref<4x128x128xbf16, #tpu.memory_space<vmem>>, vector<1x128x128xbf16>
    %179 = vector.shape_cast %178 : vector<1x128x128xbf16> to vector<128x128xbf16>
    %cst_134 = arith.constant dense<0.000000e+00> : vector<8x128xf32>
    %180 = tpu.matmul %177, %179, %cst_134 {dimension_numbers = #tpu.dot_dimension_numbers<[1], [0], [0], [1], [0, 0, 1, 1], [], []>} : vector<8x128xbf16>, vector<128x128xbf16>, vector<8x128xf32> -> vector<8x128xf32>
    %c1_135 = arith.constant 1 : index
    %c0_136 = arith.constant 0 : index
    %c0_137 = arith.constant 0 : index
    %181 = vector.load %arg12[%c1_135, %c0_136, %c0_137] : memref<3x1x128xf32, #tpu.memory_space<vmem>>, vector<1x1x128xf32>
    %182 = vector.shape_cast %181 : vector<1x1x128xf32> to vector<1x128xf32>
    %183 = vector.broadcast %182 : vector<1x128xf32> to vector<8x128xf32>
    %184 = arith.addf %180, %183 : vector<8x128xf32>
    %cst_138 = arith.constant 0.000000e+00 : f32
    %185 = vector.broadcast %cst_138 : f32 to vector<8x128xf32>
    %186 = arith.maximumf %184, %185 : vector<8x128xf32>
    %187 = arith.truncf %186 : vector<8x128xf32> to vector<8x128xbf16>
    %c3_139 = arith.constant 3 : index
    %c0_140 = arith.constant 0 : index
    %c0_141 = arith.constant 0 : index
    %188 = vector.load %arg11[%c3_139, %c0_140, %c0_141] : memref<4x128x128xbf16, #tpu.memory_space<vmem>>, vector<1x128x128xbf16>
    %189 = vector.shape_cast %188 : vector<1x128x128xbf16> to vector<128x128xbf16>
    %cst_142 = arith.constant dense<0.000000e+00> : vector<8x128xf32>
    %190 = tpu.matmul %187, %189, %cst_142 {dimension_numbers = #tpu.dot_dimension_numbers<[1], [0], [0], [1], [0, 0, 1, 1], [], []>} : vector<8x128xbf16>, vector<128x128xbf16>, vector<8x128xf32> -> vector<8x128xf32>
    %c2_143 = arith.constant 2 : index
    %c0_144 = arith.constant 0 : index
    %c0_145 = arith.constant 0 : index
    %191 = vector.load %arg12[%c2_143, %c0_144, %c0_145] : memref<3x1x128xf32, #tpu.memory_space<vmem>>, vector<1x1x128xf32>
    %192 = vector.shape_cast %191 : vector<1x1x128xf32> to vector<1x128xf32>
    %193 = vector.broadcast %192 : vector<1x128xf32> to vector<8x128xf32>
    %194 = arith.addf %190, %193 : vector<8x128xf32>
    %cst_146 = arith.constant 0.000000e+00 : f32
    %195 = vector.broadcast %cst_146 : f32 to vector<8x128xf32>
    %196 = arith.maximumf %194, %195 : vector<8x128xf32>
    %c0_147 = arith.constant 0 : index
    %c0_148 = arith.constant 0 : index
    %197 = vector.load %arg13[%c0_147, %c0_148] : memref<8x128xf32, #tpu.memory_space<vmem>>, vector<8x128xf32>
    tpu.vector_store %arg13[%c0_147, %c0_148], %196 {strides = array<i32>} : memref<8x128xf32, #tpu.memory_space<vmem>>, vector<8x128xf32>,
    return
  }
  func.func @transform_0(%arg0: i32) -> (i32, i32, i32) {
    %c0_i32 = arith.constant 0 : i32
    %c0_i32_0 = arith.constant 0 : i32
    %c0_i32_1 = arith.constant 0 : i32
    return %arg0, %c0_i32, %c0_i32_0 : i32, i32, i32
  }
  func.func @transform_1(%arg0: i32) -> (i32, i32, i32) {
    %c0_i32 = arith.constant 0 : i32
    %c0_i32_0 = arith.constant 0 : i32
    %c0_i32_1 = arith.constant 0 : i32
    return %arg0, %c0_i32, %c0_i32_0 : i32, i32, i32
  }
  func.func @transform_2(%arg0: i32) -> (i32, i32, i32) {
    %c0_i32 = arith.constant 0 : i32
    %c0_i32_0 = arith.constant 0 : i32
    %c0_i32_1 = arith.constant 0 : i32
    return %arg0, %c0_i32, %c0_i32_0 : i32, i32, i32
  }
  func.func @transform_3(%arg0: i32) -> (i32, i32, i32) {
    %c0_i32 = arith.constant 0 : i32
    %c0_i32_0 = arith.constant 0 : i32
    %c0_i32_1 = arith.constant 0 : i32
    return %arg0, %c0_i32, %c0_i32_0 : i32, i32, i32
  }
  func.func @transform_4(%arg0: i32) -> (i32, i32) {
    %c0_i32 = arith.constant 0 : i32
    %c0_i32_0 = arith.constant 0 : i32
    %c0_i32_1 = arith.constant 0 : i32
    return %c0_i32, %c0_i32_0 : i32, i32
  }
  func.func @transform_5(%arg0: i32) -> (i32, i32) {
    %c0_i32 = arith.constant 0 : i32
    %c0_i32_0 = arith.constant 0 : i32
    %c0_i32_1 = arith.constant 0 : i32
    return %c0_i32, %c0_i32_0 : i32, i32
  }
  func.func @transform_6(%arg0: i32) -> (i32, i32, i32) {
    %c0_i32 = arith.constant 0 : i32
    %c0_i32_0 = arith.constant 0 : i32
    %c0_i32_1 = arith.constant 0 : i32
    %c0_i32_2 = arith.constant 0 : i32
    return %c0_i32, %c0_i32_0, %c0_i32_1 : i32, i32, i32
  }
  func.func @transform_7(%arg0: i32) -> (i32, i32, i32) {
    %c0_i32 = arith.constant 0 : i32
    %c0_i32_0 = arith.constant 0 : i32
    %c0_i32_1 = arith.constant 0 : i32
    %c0_i32_2 = arith.constant 0 : i32
    return %c0_i32, %c0_i32_0, %c0_i32_1 : i32, i32, i32
  }
  func.func @transform_8(%arg0: i32) -> (i32, i32, i32) {
    %c0_i32 = arith.constant 0 : i32
    %c0_i32_0 = arith.constant 0 : i32
    %c0_i32_1 = arith.constant 0 : i32
    %c0_i32_2 = arith.constant 0 : i32
    return %c0_i32, %c0_i32_0, %c0_i32_1 : i32, i32, i32
  }
  func.func @transform_9(%arg0: i32) -> (i32, i32, i32) {
    %c0_i32 = arith.constant 0 : i32
    %c0_i32_0 = arith.constant 0 : i32
    %c0_i32_1 = arith.constant 0 : i32
    %c0_i32_2 = arith.constant 0 : i32
    return %c0_i32, %c0_i32_0, %c0_i32_1 : i32, i32, i32
  }
  func.func @transform_10(%arg0: i32) -> (i32, i32, i32) {
    %c0_i32 = arith.constant 0 : i32
    %c0_i32_0 = arith.constant 0 : i32
    %c0_i32_1 = arith.constant 0 : i32
    %c0_i32_2 = arith.constant 0 : i32
    return %c0_i32, %c0_i32_0, %c0_i32_1 : i32, i32, i32
  }
  func.func @transform_11(%arg0: i32) -> (i32, i32, i32) {
    %c0_i32 = arith.constant 0 : i32
    %c0_i32_0 = arith.constant 0 : i32
    %c0_i32_1 = arith.constant 0 : i32
    %c0_i32_2 = arith.constant 0 : i32
    return %c0_i32, %c0_i32_0, %c0_i32_1 : i32, i32, i32
  }
  func.func @transform_12(%arg0: i32) -> (i32, i32) {
    %c0_i32 = arith.constant 0 : i32
    %c0_i32_0 = arith.constant 0 : i32
    return %arg0, %c0_i32 : i32, i32
  }
}

</mosaic_0001>

<bundles_post_ra>
// kernel: basic_count_net_forward.1
= control target key start
LH: loop header
LB: loop body
LE: loop exit
PB: predicated region body
PF: predicated region fallthrough
CT: control target
= control target key end

     0   :  { %s5980_s0 = inlined_call_operand.hbm [shape: bf16[2,128,128], index: 0, kind: input, shape index: {}]   ;;  %s5981_s1 = inlined_call_operand.hbm [shape: bf16[2,128,128], index: 1, kind: input, shape index: {}]   ;;  %s5982_s2 = inlined_call_operand.hbm [shape: bf16[2,128,128], index: 2, kind: input, shape index: {}]   ;;  %s5983_s3 = inlined_call_operand.hbm [shape: bf16[2,128,128], index: 3, kind: input, shape index: {}]   ;;  %s5984_s4 = inlined_call_operand.hbm [shape: f32[8,128], index: 4, kind: input, shape index: {}]   ;;  %s5985_s5 = inlined_call_operand.hbm [shape: f32[8,128], index: 5, kind: input, shape index: {}]   ;;  %s5986_s6 = inlined_call_operand.hbm [shape: bf16[6,128,128], index: 6, kind: input, shape index: {}]   ;;  %s5987_s7 = inlined_call_operand.vmem [shape: f32[6,1,128], index: 7, kind: input, shape index: {}]   ;;  %s5988_s8 = inlined_call_operand.hbm [shape: bf16[6,128,128], index: 8, kind: input, shape index: {}]   ;;  %s5989_s9 = inlined_call_operand.hbm [shape: f32[6,1,128], index: 9, kind: input, shape index: {}]   ;;  %s5990_s10 = inlined_call_operand.hbm [shape: bf16[4,128,128], index: 10, kind: input, shape index: {}]   ;;  %s5991_s11 = inlined_call_operand.vmem [shape: f32[3,1,128], index: 11, kind: input, shape index: {}]   ;;  %s5992_s12 = inlined_call_operand.vmem [shape: f32[16,128], index: 12, kind: output, shape index: {}]  }
   0x1   :  { %6002 = sst [smem:[#allocation27_spill]] %s5981_s1 }
   0x2   :  { %6003 = sst [smem:[#allocation28_spill]] %s5984_s4 }
   0x3   :  { %6004 = sst [smem:[#allocation29_spill]] %s5985_s5 }
   0x4   :  { %6005 = sst [smem:[#allocation30_spill]] %s5986_s6 }
   0x5   :  { %6006 = sst [smem:[#allocation31_spill]] %s5988_s8 }
   0x6   :  { %6007 = sst [smem:[#allocation32_spill]] %s5989_s9 }
   0x7   :  { %6008 = sst [smem:[#allocation33_spill]] %s5991_s11 }
   0x8   :  { %6009 = sst [smem:[#allocation34_spill]] %s5992_s12 }
   0x9   :  { %17 = vsyncpa [#allocation3], 0 }
   0xa   :  { %19 = vsyncpa [#allocation3 + $0x1], 0 }
   0xb   :  { %20 = vsyncpa [#allocation5], 0 }
   0xc   :  { %22 = vsyncpa [#allocation5 + $0x1], 0 }
   0xd   :  { %23 = vsyncpa [#allocation8], 0 }
   0xe   :  { %25 = vsyncpa [#allocation8 + $0x1], 0 }
   0xf   :  { %26 = vsyncpa [#allocation11], 0 }
  0x10   :  { %27 = vsyncpa [#allocation14], 0 }
  0x11   :  { %28 = vsyncpa [#allocation17], 0  ;;  %s5062_s21 = smov 0   ;;  %s5064_s22 = smov 0  }
  0x12   :  { %s5066_s23 = smov 0   ;;  %s5068_s24 = smov 0  }
  0x13 LB: > { %s6010_s4 = sld [smem:[#allocation28_spill]]  ;;  %s5086_s28 = sadd.s32 4294967295, %s4985_s24   ;;  %s4985_s24 = sphi %s5068_s24, %s6028_s24   ;;  %s4981_s23 = sphi %s5066_s23, %s6032_s23   ;;  %s4977_s22 = sphi %s5064_s22, %s6031_s22   ;;  %s4973_s21 = sphi %s5062_s21, %s6030_s21  }
  0x14   : > { %p3639_p0 = scmp.ge.s32.totalorder %s4985_s24, 1  ;;  %p55_p1 = scmp.eq.s32.totalorder %s5086_s28, 0 }
  0x15   : > { %p337_p2 = scmp.lt.s32.totalorder %s4985_s24, 3  ;;  %s4987_s30 = smov [#allocation9]  }
  0x16   : > { %s351_s13 = sshll.u32 %s4987_s30, 4  ;;  %s6012_s5 = sld [smem:[#allocation29_spill]]  ;;  %s352_s13 = int_to_ptr.vmem [resolvable:$true] %s351_s13 }
  0x17   : > { %p5091_p3 = pnand %p3639_p0, %p337_p2  ;;  %s4988_s18 = smov [#allocation10]  }
  0x18   : > { %s363_s19 = sshll.u32 %s4988_s18, 4  ;;  %s6014_s8 = sld [smem:[#allocation31_spill]]  ;;  %s364_s19 = int_to_ptr.vmem [resolvable:$true] %s363_s19 }
  0x19   : > { %s349_s27 = sshll.u32 %s6010_s4, 4  ;;  %p4516_p4 = pneg %p5091_p3  ;;  %s350_s27 = int_to_ptr.hbm [resolvable:$true] %s349_s27 }
  0x1a   : > { %s4989_s30 = smov [#allocation13]   ;;  %s5993_s15 = smov 64  }
  0x1b   : > { %p5102_p5 = pnand %p4516_p4, %p55_p1  ;;  %s391_s14 = sshll.u32 %s4989_s30, 4  ;;  %s392_s14 = int_to_ptr.vmem [resolvable:$true] %s391_s14 }
  0x1c   : > { %s361_s16 = sshll.u32 %s6012_s5, 4  ;;  %s41_s18 = sadd.s32 1, %s4981_s23  ;;  %s362_s16 = int_to_ptr.hbm [resolvable:$true] %s361_s16 }
  0x1d   : > { %4519 = dma.hbm_to_vmem [thread:$0]  (!%p5102_p5), %s350_s27, 128, %s352_s13, [#allocation8]  }
  0x1e   : > { %4522 = dma.hbm_to_vmem [thread:$0]  (!%p5102_p5), %s362_s16, 128, %s364_s19, [#allocation11]  }
  0x1f   : > { %s389_s26 = sshll.u32 %s6014_s8, 4  ;;  %s5995_s27 = smov 4   ;;  %s390_s26 = int_to_ptr.hbm [resolvable:$true] %s389_s26 }
  0x20   : > { %4528 = dma.hbm_to_vmem [thread:$0]  (!%p5102_p5), %s390_s26, 6144, %s392_s14, [#allocation14], %s5993_s15, %s5993_s15, %s5995_s27  }
  0x21   : > { %s5119_s13 = sadd.s32 1, %s4985_s24   ;;  %p48_p7 = scmp.ne.s32.totalorder %s4981_s23, %s4977_s22 }
  0x22   : > { %6015 = sst [smem:[#allocation25_spill]] %s5119_s13  ;;  %s38_s16 = ssub.s32 %s4985_s24, %s5119_s13 }
  0x23   : > { %p39_p6 = scmp.eq.s32.totalorder %s38_s16, 0  ;;  %p49_p8 = scmp.eq.s32.totalorder %s4985_s24, 0 }
  0x24   : > { %p54_p9 = scmp.ne.s32.totalorder %s4977_s22, %s4973_s21  ;;  %p4554_p12 = scmp.lt.s32.totalorder %s4985_s24, 2 }
  0x25   : > { %s5130_s19 = scalar_select %p39_p6, %s4981_s23, %s41_s18  }
  0x26   : > { %p50_p10 = por %p49_p8, %p48_p7  ;;  %p5134_p11 = por %p55_p1, %p54_p9 }
  0x27   : > { %6016 = sst [smem:[#allocation26_spill]] %s5130_s19  ;;  %s5997_s25 = sand.u32 1, %s4981_s23  }
  0x28   : > { %s5142_s26 = sshll.u32 %s5997_s25, 6  ;;  %s5145_s30 = sshll.u32 %s4985_s24, 6 }
  0x29   : > { %p5147_p13 = pnand %p4554_p12, %p50_p10  ;;  %s6000_s14 = sand.u32 1, %s4985_s24  }
  0x2a   : > { %s6019_s1 = sld [smem:[#allocation27_spill]]  ;;  %s462_s4 = scalar_lea.vmem [#allocation4], %s5142_s26 }
  0x2b   : > { %s470_s5 = sshll.u32 %s462_s4, 4  ;;  %s5159_s25 = scalar_lea.sflag [#allocation5], %s6000_s14  ;;  %s471_s5 = int_to_ptr.vmem [resolvable:$true] %s470_s5 }
  0x2c   : > { %p4721_p2 = pneg %p5147_p13 }
  0x30   : > { %s467_s15 = scalar_lea.hbm %s6019_s1, %s5145_s30 }
  0x31   : > { %s468_s27 = sshll.u32 %s467_s15, 4  ;;  %s4724_s15 = scalar_lea.hbm %s6019_s1, 128  ;;  %s469_s27 = int_to_ptr.hbm [resolvable:$true] %s468_s27 }
  0x32   : > { %s4717_s8 = sshra.s32 %s469_s27, 4  ;;  %s4718_s8 = int_to_ptr.hbm [resolvable:$true] %s4717_s8 }
  0x33   : > { %s4719_s19 = scalar_lea.hbm %s4718_s8, 64  ;;  %p4725_p7 = scmp.lt.s32.totalorder %s4718_s8, %s6019_s1 }
  0x34   : > { %p4720_p0 = scmp.ne.s32.totalorder %s4718_s8, %s4719_s19  ;;  %p4726_p8 = scmp.lt.s32.totalorder %s4724_s15, %s4719_s19 }
  0x36   : > { %p4722_p4 = pnand %p4721_p2, %p4720_p0  ;;  %p4727_p9 = por %p4726_p8, %p4725_p7 }
  0x38   : > { %p4723_p6 = pneg %p4722_p4 }
  0x3a   : > { %p4728_p10 = pnand %p4727_p9, %p4723_p6 }
  0x3c   : > { %4731 = shalt.err (!%p4728_p10)
}
  0x3d   : > { %s6020_s14 = smov 4   ;;  %s6021_s12 = smov 64  }
  0x3e   : > { %4541 = dma.hbm_to_vmem [thread:$0]  (!%p5147_p13), %s469_s27, 1024, %s471_s5, %s5159_s25, %s6021_s12, %s6021_s12, %s6020_s14  }
  0x3f   : > { %s6022_s6 = sld [smem:[#allocation30_spill]]  ;;  %s4992_s13 = smov [#allocation12]  }
  0x40   : > { %s374_s8 = sshll.u32 %s4992_s13, 4  ;;  %s6023_s9 = sld [smem:[#allocation32_spill]]  ;;  %s375_s8 = int_to_ptr.vmem [resolvable:$true] %s374_s8 }
  0x41   : > { %s4993_s5 = smov [#allocation15]   ;;  %s417_s13 = sshll.u32 %s5990_s10, 4  ;;  %s418_s13 = int_to_ptr.hbm [resolvable:$true] %s417_s13 }
  0x42   : > { %s405_s11 = sshll.u32 %s4993_s5, 4  ;;  %s4994_s19 = smov 16   ;;  %s406_s11 = int_to_ptr.vmem [resolvable:$true] %s405_s11 }
  0x43   : > { %s4995_s15 = smov 1   ;;  %s4996_s1 = smov [#allocation16]  }
  0x44   : > { %s445_s5 = scalar_lea.hbm %s5980_s0, %s5145_s30  ;;  %s440_s27 = scalar_lea.vmem [#allocation2], %s5142_s26 }
  0x45   : > { %s372_s18 = sshll.u32 %s6022_s6, 4  ;;  %s419_s6 = sshll.u32 %s4996_s1, 4  ;;  %s373_s18 = int_to_ptr.hbm [resolvable:$true] %s372_s18  ;;  %s420_s6 = int_to_ptr.vmem [resolvable:$true] %s419_s6 }
  0x46   : > { %s403_s4 = sshll.u32 %s6023_s9, 4  ;;  %s448_s16 = sshll.u32 %s440_s27, 4  ;;  %s404_s4 = int_to_ptr.hbm [resolvable:$true] %s403_s4  ;;  %s449_s16 = int_to_ptr.vmem [resolvable:$true] %s448_s16 }
  0x47   : > { %4525 = dma.hbm_to_vmem [thread:$0]  (!%p5102_p5), %s373_s18, 6144, %s375_s8, [#allocation11], %s6021_s12, %s6021_s12, %s6020_s14  }
  0x48   : > { %4531 = dma.hbm_to_vmem [thread:$0]  (!%p5102_p5), %s404_s4, 96, %s406_s11, [#allocation14], %s4994_s19, %s4994_s19, %s4995_s15  }
  0x49   : > { %4534 = dma.hbm_to_vmem [thread:$0]  (!%p5102_p5), %s418_s13, 4096, %s420_s6, [#allocation17], %s6021_s12, %s6021_s12, %s6020_s14  }
  0x4a   : > { %s446_s9 = sshll.u32 %s445_s5, 4  ;;  %s6024_s4 = sand.u32 1, %s4981_s23   ;;  %s447_s9 = int_to_ptr.hbm [resolvable:$true] %s446_s9 }
  0x4b   : > { %s437_s11 = scalar_lea.sflag [#allocation3], %s6024_s4  ;;  %s4837_s19 = sshra.s32 %s447_s9, 4  ;;  %s4838_s19 = int_to_ptr.hbm [resolvable:$true] %s4837_s19 }
  0x4c   : > { %s4839_s1 = scalar_lea.hbm %s4838_s19, 64  ;;  %s4844_s13 = scalar_lea.hbm %s5980_s0, 128 }
  0x4d   : > { %p4840_p12 = scmp.ne.s32.totalorder %s4838_s19, %s4839_s1  ;;  %p4845_p5 = scmp.lt.s32.totalorder %s4838_s19, %s5980_s0 }
  0x4e   : > { %p4846_p6 = scmp.lt.s32.totalorder %s4844_s13, %s4839_s1 }
  0x4f   : > { %p4842_p0 = pnand %p4840_p12, %p4721_p2 }
  0x50   : > { %p4847_p7 = por %p4846_p6, %p4845_p5 }
  0x51   : > { %p4843_p4 = pneg %p4842_p0 }
  0x53   : > { %p4848_p8 = pnand %p4847_p7, %p4843_p4 }
  0x55   : > { %4851 = shalt.err (!%p4848_p8)
}
  0x56   : > { %4538 = dma.hbm_to_vmem [thread:$0]  (!%p5147_p13), %s447_s9, 1024, %s449_s16, %s437_s11, %s6021_s12, %s6021_s12, %s6020_s14  }
  0x57   : > { %s489_s27 = scalar_lea.hbm %s5982_s2, %s5145_s30  ;;  %s484_s4 = scalar_lea.vmem [#allocation6], %s5142_s26 }
  0x58   : > { %s492_s6 = sshll.u32 %s484_s4, 4  ;;  %s490_s19 = sshll.u32 %s489_s27, 4  ;;  %s493_s6 = int_to_ptr.vmem [resolvable:$true] %s492_s6  ;;  %s491_s19 = int_to_ptr.hbm [resolvable:$true] %s490_s19 }
  0x59   : > { %s4867_s1 = sshra.s32 %s491_s19, 4  ;;  %s4874_s9 = scalar_lea.hbm %s5982_s2, 128  ;;  %s4868_s1 = int_to_ptr.hbm [resolvable:$true] %s4867_s1 }
  0x5a   : > { %s4869_s17 = scalar_lea.hbm %s4868_s1, 64  ;;  %p4875_p0 = scmp.lt.s32.totalorder %s4868_s1, %s5982_s2 }
  0x5b   : > { %p4870_p9 = scmp.ne.s32.totalorder %s4868_s1, %s4869_s17  ;;  %p4876_p4 = scmp.lt.s32.totalorder %s4874_s9, %s4869_s17 }
  0x5d   : > { %p4872_p10 = pnand %p4870_p9, %p4721_p2  ;;  %p4877_p5 = por %p4876_p4, %p4875_p0 }
  0x5f   : > { %p4873_p12 = pneg %p4872_p10 }
  0x61   : > { %p4878_p6 = pnand %p4877_p5, %p4873_p12 }
  0x63   : > { %4881 = shalt.err (!%p4878_p6)
}
  0x64   : > { %4544 = dma.hbm_to_vmem [thread:$0]  (!%p5147_p13), %s491_s19, 1024, %s493_s6, %s5159_s25, %s6021_s12, %s6021_s12, %s6020_s14  }
  0x65   : > { %s511_s5 = scalar_lea.hbm %s5983_s3, %s5145_s30  ;;  %s506_s27 = scalar_lea.vmem [#allocation7], %s5142_s26 }
  0x66   : > { %s514_s4 = sshll.u32 %s506_s27, 4  ;;  %s512_s1 = sshll.u32 %s511_s5, 4  ;;  %s515_s4 = int_to_ptr.vmem [resolvable:$true] %s514_s4  ;;  %s513_s1 = int_to_ptr.hbm [resolvable:$true] %s512_s1 }
  0x67   : > { %s6025_s17 = sand.u32 1, %s4985_s24   ;;  %s4897_s15 = sshra.s32 %s513_s1, 4  ;;  %s4898_s15 = int_to_ptr.hbm [resolvable:$true] %s4897_s15 }
  0x68   : > { %s503_s13 = scalar_lea.sflag [#allocation8], %s6025_s17  ;;  %s4899_s9 = scalar_lea.hbm %s4898_s15, 64 }
  0x69   : > { %p4900_p7 = scmp.ne.s32.totalorder %s4898_s15, %s4899_s9  ;;  %s4904_s19 = scalar_lea.hbm %s5983_s3, 128 }
  0x6a   : > { %p4905_p10 = scmp.lt.s32.totalorder %s4898_s15, %s5983_s3  ;;  %p4906_p12 = scmp.lt.s32.totalorder %s4904_s19, %s4899_s9 }
  0x6b   : > { %p4902_p8 = pnand %p4900_p7, %p4721_p2 }
  0x6c   : > { %p4907_p0 = por %p4906_p12, %p4905_p10 }
  0x6d   : > { %p4903_p9 = pneg %p4902_p8 }
  0x6f   : > { %p4908_p4 = pnand %p4907_p0, %p4903_p9 }
  0x71   : > { %4911 = shalt.err (!%p4908_p4)
}
  0x72   : > { %4547 = dma.hbm_to_vmem [thread:$0]  (!%p5147_p13), %s513_s1, 1024, %s515_s4, %s503_s13, %s6021_s12, %s6021_s12, %s6020_s14  }
  0x73   : > { %526 = sbr.rel (%p5091_p3) target bundleno = 3548 (0xddc), region = 68  ;;  %s528_s24 = sand.u32 (!%p5091_p3), 1, %s4977_s22  }
  0x74   : > { %s3660_s16 = sshll.u32 (!%p5091_p3), %s528_s24, 6  ;;  %s529_s11 = scalar_lea.sflag (!%p5091_p3), [#allocation3], %s528_s24 }
  0x75   : > { %s5264_s18 = scalar_lea.vmem (!%p5091_p3), [#allocation2], %s3660_s16 }
  0x78   : > { %4944 = dma.done.wait (%p5134_p11), %s529_s11, 1024  }
  0x79   : > { %4946 = vsyncadd (%p5134_p11), %s529_s11, 4294966272  ;;  %s538_s21 = sand.u32 1, %s5086_s28   ;;  %s5271_s12 = scalar_lea.vmem [#allocation4], %s3660_s16 }
  0x7a   : > { %s539_s8 = scalar_lea.sflag [#allocation5], %s538_s21 }
  0x7b   : > { %4948 = dma.done.wait (%p5134_p11), %s539_s8, 2048  }
  0x7c   : > { %4950 = vsyncadd (%p5134_p11), %s539_s8, 4294965248  ;;  %s5277_s29 = scalar_lea.vmem [#allocation6], %s3660_s16  ;;  %s559_s14 = scalar_lea.sflag [#allocation8], %s538_s21 }
  0x7d   : > { %s5279_s5 = scalar_lea.vmem [#allocation7], %s3660_s16 }
  0x7e   : > { %4952 = dma.done.wait (%p5134_p11), %s559_s14, 1024  }
  0x7f   : > { %4954 = vsyncadd (%p5134_p11), %s559_s14, 4294966272 }
  0x80   : > { %4956 = dma.done.wait (%p55_p1), [#allocation8], 128  }
  0x81   : > { %4958 = vsyncadd (%p55_p1), [#allocation8], 4294967168 }
  0x82   : > { %4960 = dma.done.wait (%p55_p1), [#allocation11], 6272  }
  0x83   : > { %4962 = vsyncadd (%p55_p1), [#allocation11], 4294961024 }
  0x84   : > { %4964 = dma.done.wait (%p55_p1), [#allocation14], 6240  }
  0x85   : > { %4966 = vsyncadd (%p55_p1), [#allocation14], 4294961056 }
  0x86   : > { %4968 = dma.done.wait (%p55_p1), [#allocation17], 4096  }
  0x87   : > { %4970 = vsyncadd (%p55_p1), [#allocation17], 4294963200  ;;  %v4339_v0 = vld [vmem:[%s5271_s12 + $0x38] sm:$0xff]  ;;  %v4338_v1 = vld [vmem:[%s5271_s12 + $0x30] sm:$0xff]  ;;  %s6026_s16 = sld [smem:[#allocation33_spill]]  ;;  %p648_p1 = scmp.lt.s32.totalorder %s5086_s28, 1 }
  0x88   : > { %796 = vmatpush.bf16.msra.mxu0 %v4339_v0  ;;  %v4337_v2 = vld [vmem:[%s5271_s12 + $0x28] sm:$0xff]  ;;  %v4336_v3 = vld [vmem:[%s5271_s12 + $0x20] sm:$0xff]  ;;  %v4335_v4 = vld [vmem:[%s5271_s12 + $0x18] sm:$0xff] }
  0x89   : > { %v4334_v5 = vld [vmem:[%s5271_s12 + $0x10] sm:$0xff]  ;;  %v4333_v6 = vld [vmem:[%s5271_s12 + $0x8] sm:$0xff]  ;;  %v4332_v7 = vld [vmem:[%s5271_s12] sm:$0xff]  ;;  %s6034_s28 = smov (!%p648_p1, %s5086_s28), 1 }
  0x8a   : > { %v5310_v8 = vld [vmem:[%s5264_s18] sm:$0xff]  ;;  %v5314_v9 = vld [vmem:[%s5264_s18 + $0x8] sm:$0xff]  ;;  %v5318_v10 = vld [vmem:[%s5264_s18 + $0x10] sm:$0xff] }
  0x8b   : > { %v5322_v11 = vld [vmem:[%s5264_s18 + $0x18] sm:$0xff]  ;;  %v5326_v12 = vld [vmem:[%s5264_s18 + $0x20] sm:$0xff]  ;;  %v4347_v13 = vld [vmem:[#allocation12 + $0x38] sm:$0xff] }
  0x8c   : > { %797 = vmatpush.bf16.msra.mxu0 %v4338_v1  ;;  %937 = vmatpush.bf16.msra.mxu1 %v4347_v13  ;;  %v4346_v14 = vld [vmem:[#allocation12 + $0x30] sm:$0xff]  ;;  %v5330_v15 = vld [vmem:[%s5264_s18 + $0x28] sm:$0xff]  ;;  %v4345_v16 = vld [vmem:[#allocation12 + $0x28] sm:$0xff] }
  0x8d   : > { %v4344_v17 = vld [vmem:[#allocation12 + $0x20] sm:$0xff]  ;;  %v4343_v18 = vld [vmem:[#allocation12 + $0x18] sm:$0xff]  ;;  %v4342_v20 = vld [vmem:[#allocation12 + $0x10] sm:$0xff] }
  0x8e   : > { %v5334_v19 = vld [vmem:[%s5264_s18 + $0x30] sm:$0xff]  ;;  %v4341_v21 = vld [vmem:[#allocation12 + $0x8] sm:$0xff]  ;;  %v668_v25 = vld [vmem:[%s5271_s12] sm:$0xff]  }
  0x8f   : > { %v4340_v22 = vld [vmem:[#allocation12] sm:$0xff]  ;;  %v5338_v23 = vld [vmem:[%s5264_s18 + $0x38] sm:$0xff]  ;;  %v684_v26 = vunpack.c.l.bf16 %v668_v25  ;;  %v685_v27 = vunpack.c.h.bf16 %v668_v25  ;;  %v670_v33 = vld [vmem:[%s5271_s12 + $0x8] sm:$0xff]  }
  0x90   : > { %798 = vmatpush.bf16.msra.mxu0 %v4337_v2  ;;  %938 = vmatpush.bf16.msra.mxu1 %v4346_v14  ;;  %v686_v34 = vunpack.c.l.bf16 %v670_v33  ;;  %v687_v35 = vunpack.c.h.bf16 %v670_v33  ;;  %v672_v41 = vld [vmem:[%s5271_s12 + $0x10] sm:$0xff]   ;;  %v674_v49 = vld [vmem:[%s5271_s12 + $0x18] sm:$0xff]   ;;  %v676_v57 = vld [vmem:[%s5271_s12 + $0x20] sm:$0xff]  }
  0x91   : > { %v688_v42 = vunpack.c.l.bf16 %v672_v41  ;;  %v689_v43 = vunpack.c.h.bf16 %v672_v41  ;;  %v690_v50 = vunpack.c.l.bf16 %v674_v49  ;;  %v691_v51 = vunpack.c.h.bf16 %v674_v49  ;;  %v678_v1 = vld [vmem:[%s5271_s12 + $0x28] sm:$0xff]   ;;  %v4354_v14 = vld [vmem:[#allocation12 + $0x70] sm:$0xff]  ;;  %v4348_v33 = vld [vmem:[#allocation12 + $0x40] sm:$0xff] }
  0x92   : > { %v692_v58 = vunpack.c.l.bf16 %v676_v57  ;;  %v693_v59 = vunpack.c.h.bf16 %v676_v57  ;;  %v694_v2 = vunpack.c.l.bf16 %v678_v1  ;;  %v4351_v25 = vld [vmem:[#allocation12 + $0x58] sm:$0xff]  ;;  %v4603_v41 = vld [vmem:[%s5987_s7] ss:$0 sm:$0xff] }
  0x94   : > { %799 = vmatpush.bf16.msra.mxu0 %v4336_v3  ;;  %939 = vmatpush.bf16.msra.mxu1 %v4345_v16  ;;  %v695_v3 = vunpack.c.h.bf16 %v678_v1  ;;  %v4353_v16 = vld [vmem:[#allocation12 + $0x68] sm:$0xff] }
  0x98   : > { %800 = vmatpush.bf16.msra.mxu0 %v4335_v4  ;;  %940 = vmatpush.bf16.msra.mxu1 %v4344_v17 }
  0x9c   : > { %801 = vmatpush.bf16.msra.mxu0 %v4334_v5  ;;  %941 = vmatpush.bf16.msra.mxu1 %v4343_v18  ;;  %v4355_v5 = vld [vmem:[#allocation12 + $0x78] sm:$0xff]  ;;  %v680_v18 = vld [vmem:[%s5271_s12 + $0x30] sm:$0xff]  }
  0x9d   : > { %1080 = vmatpush.bf16.msra.mxu2 %v4355_v5 }
  0xa0   : > { %802 = vmatpush.bf16.msra.mxu0 %v4333_v6  ;;  %942 = vmatpush.bf16.msra.mxu1 %v4342_v20  ;;  %v4352_v20 = vld [vmem:[#allocation12 + $0x60] sm:$0xff] }
  0xa1   : > { %1081 = vmatpush.bf16.msra.mxu2 %v4354_v14 }
  0xa4   : > { %803 = vmatpush.bf16.msra.mxu0 %v4332_v7  ;;  %943 = vmatpush.bf16.msra.mxu1 %v4341_v21  ;;  %v696_v21 = vunpack.c.l.bf16 %v680_v18 }
  0xa5   : > { %1082 = vmatpush.bf16.msra.mxu2 %v4353_v16 }
  0xa7   : > { %804 = vmatmul.bf16.vlgmr.msra.gmra.mxu0 %v5310_v8 }
  0xa8   : > { %944 = vmatpush.bf16.msra.mxu1 %v4340_v22  ;;  %v697_v22 = vunpack.c.h.bf16 %v680_v18 }
  0xa9   : > { %1083 = vmatpush.bf16.msra.mxu2 %v4352_v20 }
  0xad   : > { %1084 = vmatpush.bf16.msra.mxu2 %v4351_v25 }
  0xb7   : > { %809 = vmatmul.bf16.gmra.mxu0 %v5314_v9 }
  0xc7   : > { %814 = vmatmul.bf16.gmra.mxu0 %v5318_v10 }
  0xd7   : > { %819 = vmatmul.bf16.gmra.mxu0 %v5322_v11 }
  0xe7   : > { %824 = vmatmul.bf16.gmra.mxu0 %v5326_v12 }
  0xf7   : > { %829 = vmatmul.bf16.gmra.mxu0 %v5330_v15 }
 0x107   : > { %834 = vmatmul.bf16.gmra.mxu0 %v5334_v19 }
 0x117   : > { %839 = vmatmul.bf16.gmra.mxu0 %v5338_v23 }
 0x124   : > { %v805_v24 = vpop.f32.mrf.mxu0 }
 0x125   : > { %v845_v29 = vadd.f32 %v805_v24, %v684_v26 }
 0x12c   : > { %v807_v28 = vpop.f32.mrf.mxu0 }
 0x12d   : > { %v846_v30 = vadd.f32 %v807_v28, %v685_v27 }
 0x12f   : > { %v861_v31 = vpack.c.bf16 %v846_v30, %v845_v29  ;;  %v4350_v29 = vld [vmem:[#allocation12 + $0x50] sm:$0xff] }
 0x130   : > { %1085 = vmatpush.bf16.msra.mxu2 %v4350_v29 }
 0x131   : > { %945 = vmatmul.bf16.vlgmr.msra.gmra.mxu1 %v861_v31  ;;  %v4349_v31 = vld [vmem:[#allocation12 + $0x48] sm:$0xff] }
 0x134   : > { %v810_v32 = vpop.f32.mrf.mxu0  ;;  %1086 = vmatpush.bf16.msra.mxu2 %v4349_v31 }
 0x135   : > { %v847_v37 = vadd.f32 %v810_v32, %v686_v34  ;;  %v682_v32 = vld [vmem:[%s5271_s12 + $0x38] sm:$0xff]   ;;  %s3670_s12 = sshll.u32 %s6034_s28, 3 }
 0x136   : > { %v698_v34 = vunpack.c.l.bf16 %v682_v32 }
 0x138   : > { %1087 = vmatpush.bf16.msra.mxu2 %v4348_v33 }
 0x13c   : > { %v812_v36 = vpop.f32.mrf.mxu0 }
 0x13d   : > { %v848_v38 = vadd.f32 %v812_v36, %v687_v35  ;;  %v699_v35 = vunpack.c.h.bf16 %v682_v32 }
 0x13f   : > { %v862_v39 = vpack.c.bf16 %v848_v38, %v847_v37 }
 0x141   : > { %950 = vmatmul.bf16.gmra.mxu1 %v862_v39 }
 0x144   : > { %v815_v40 = vpop.f32.mrf.mxu0 }
 0x145   : > { %v849_v45 = vadd.f32 %v815_v40, %v688_v42 }
 0x14c   : > { %v817_v44 = vpop.f32.mrf.mxu0 }
 0x14d   : > { %v850_v46 = vadd.f32 %v817_v44, %v689_v43 }
 0x14f   : > { %v863_v47 = vpack.c.bf16 %v850_v46, %v849_v45 }
 0x151   : > { %955 = vmatmul.bf16.gmra.mxu1 %v863_v47 }
 0x154   : > { %v820_v48 = vpop.f32.mrf.mxu0 }
 0x155   : > { %v851_v53 = vadd.f32 %v820_v48, %v690_v50 }
 0x15c   : > { %v822_v52 = vpop.f32.mrf.mxu0 }
 0x15d   : > { %v852_v54 = vadd.f32 %v822_v52, %v691_v51 }
 0x15f   : > { %v864_v55 = vpack.c.bf16 %v852_v54, %v851_v53 }
 0x161   : > { %960 = vmatmul.bf16.gmra.mxu1 %v864_v55 }
 0x164   : > { %v825_v56 = vpop.f32.mrf.mxu0 }
 0x165   : > { %v853_v61 = vadd.f32 %v825_v56, %v692_v58 }
 0x16c   : > { %v827_v60 = vpop.f32.mrf.mxu0 }
 0x16d   : > { %v854_v62 = vadd.f32 %v827_v60, %v693_v59 }
 0x16f   : > { %v865_v63 = vpack.c.bf16 %v854_v62, %v853_v61 }
 0x171   : > { %965 = vmatmul.bf16.gmra.mxu1 %v865_v63 }
 0x174   : > { %v830_v0 = vpop.f32.mrf.mxu0 }
 0x175   : > { %v855_v6 = vadd.f32 %v830_v0, %v694_v2 }
 0x17c   : > { %v832_v4 = vpop.f32.mrf.mxu0 }
 0x17d   : > { %v856_v7 = vadd.f32 %v832_v4, %v695_v3 }
 0x17f   : > { %v866_v13 = vpack.c.bf16 %v856_v7, %v855_v6 }
 0x181   : > { %970 = vmatmul.bf16.gmra.mxu1 %v866_v13 }
 0x184   : > { %v835_v17 = vpop.f32.mrf.mxu0 }
 0x185   : > { %v857_v26 = vadd.f32 %v835_v17, %v696_v21 }
 0x18c   : > { %v837_v24 = vpop.f32.mrf.mxu0 }
 0x18d   : > { %v858_v27 = vadd.f32 %v837_v24, %v697_v22 }
 0x18f   : > { %v867_v28 = vpack.c.bf16 %v858_v27, %v857_v26 }
 0x191   : > { %975 = vmatmul.bf16.gmra.mxu1 %v867_v28 }
 0x194   : > { %v840_v30 = vpop.f32.mrf.mxu0 }
 0x195   : > { %v859_v37 = vadd.f32 %v840_v30, %v698_v34 }
 0x19c   : > { %v842_v36 = vpop.f32.mrf.mxu0 }
 0x19d   : > { %v860_v38 = vadd.f32 %v842_v36, %v699_v35 }
 0x19f   : > { %v868_v39 = vpack.c.bf16 %v860_v38, %v859_v37 }
 0x1a1   : > { %980 = vmatmul.bf16.gmra.mxu1 %v868_v39 }
 0x1ae   : > { %v946_v40 = vpop.f32.mrf.mxu1 }
 0x1af   : > { %v947_v42 = vadd.f32 %v4603_v41, %v946_v40 }
 0x1b1   : > { %v986_v45 = vmax.f32 %v947_v42, 0.0 }
 0x1b6   : > { %v948_v43 = vpop.f32.mrf.mxu1 }
 0x1b7   : > { %v949_v44 = vadd.f32 %v4603_v41, %v948_v43 }
 0x1b9   : > { %v987_v46 = vmax.f32 %v949_v44, 0.0 }
 0x1bb   : > { %v1002_v47 = vpack.c.bf16 %v987_v46, %v986_v45 }
 0x1bd   : > { %1088 = vmatmul.bf16.vlgmr.msra.gmra.mxu2 %v1002_v47 }
 0x1be   : > { %v951_v48 = vpop.f32.mrf.mxu1 }
 0x1bf   : > { %v952_v49 = vadd.f32 %v4603_v41, %v951_v48 }
 0x1c1   : > { %v988_v52 = vmax.f32 %v952_v49, 0.0 }
 0x1c6   : > { %v953_v50 = vpop.f32.mrf.mxu1 }
 0x1c7   : > { %v954_v51 = vadd.f32 %v4603_v41, %v953_v50 }
 0x1c9   : > { %v989_v53 = vmax.f32 %v954_v51, 0.0 }
 0x1cb   : > { %v1003_v54 = vpack.c.bf16 %v989_v53, %v988_v52 }
 0x1cd   : > { %1093 = vmatmul.bf16.gmra.mxu2 %v1003_v54 }
 0x1ce   : > { %v956_v55 = vpop.f32.mrf.mxu1 }
 0x1cf   : > { %v957_v56 = vadd.f32 %v4603_v41, %v956_v55 }
 0x1d1   : > { %v990_v59 = vmax.f32 %v957_v56, 0.0 }
 0x1d6   : > { %v958_v57 = vpop.f32.mrf.mxu1 }
 0x1d7   : > { %v959_v58 = vadd.f32 %v4603_v41, %v958_v57 }
 0x1d9   : > { %v991_v60 = vmax.f32 %v959_v58, 0.0 }
 0x1db   : > { %v1004_v61 = vpack.c.bf16 %v991_v60, %v990_v59 }
 0x1dd   : > { %1098 = vmatmul.bf16.gmra.mxu2 %v1004_v61 }
 0x1de   : > { %v961_v62 = vpop.f32.mrf.mxu1 }
 0x1df   : > { %v962_v63 = vadd.f32 %v4603_v41, %v961_v62 }
 0x1e1   : > { %v992_v2 = vmax.f32 %v962_v63, 0.0 }
 0x1e6   : > { %v963_v0 = vpop.f32.mrf.mxu1 }
 0x1e7   : > { %v964_v1 = vadd.f32 %v4603_v41, %v963_v0 }
 0x1e9   : > { %v993_v3 = vmax.f32 %v964_v1, 0.0 }
 0x1eb   : > { %v1005_v4 = vpack.c.bf16 %v993_v3, %v992_v2 }
 0x1ed   : > { %1103 = vmatmul.bf16.gmra.mxu2 %v1005_v4 }
 0x1ee   : > { %v966_v5 = vpop.f32.mrf.mxu1 }
 0x1ef   : > { %v967_v6 = vadd.f32 %v4603_v41, %v966_v5 }
 0x1f1   : > { %v994_v14 = vmax.f32 %v967_v6, 0.0 }
 0x1f6   : > { %v968_v7 = vpop.f32.mrf.mxu1 }
 0x1f7   : > { %v969_v13 = vadd.f32 %v4603_v41, %v968_v7 }
 0x1f9   : > { %v995_v16 = vmax.f32 %v969_v13, 0.0 }
 0x1fb   : > { %v1006_v17 = vpack.c.bf16 %v995_v16, %v994_v14 }
 0x1fd   : > { %1108 = vmatmul.bf16.gmra.mxu2 %v1006_v17 }
 0x1fe   : > { %v971_v18 = vpop.f32.mrf.mxu1 }
 0x1ff   : > { %v972_v20 = vadd.f32 %v4603_v41, %v971_v18 }
 0x201   : > { %v996_v24 = vmax.f32 %v972_v20, 0.0 }
 0x206   : > { %v973_v21 = vpop.f32.mrf.mxu1 }
 0x207   : > { %v974_v22 = vadd.f32 %v4603_v41, %v973_v21 }
 0x209   : > { %v997_v25 = vmax.f32 %v974_v22, 0.0 }
 0x20b   : > { %v1007_v26 = vpack.c.bf16 %v997_v25, %v996_v24 }
 0x20d   : > { %1113 = vmatmul.bf16.gmra.mxu2 %v1007_v26 }
 0x20e   : > { %v976_v27 = vpop.f32.mrf.mxu1 }
 0x20f   : > { %v977_v28 = vadd.f32 %v4603_v41, %v976_v27 }
 0x211   : > { %v998_v31 = vmax.f32 %v977_v28, 0.0 }
 0x216   : > { %v978_v29 = vpop.f32.mrf.mxu1 }
 0x217   : > { %v979_v30 = vadd.f32 %v4603_v41, %v978_v29 }
 0x219   : > { %v999_v32 = vmax.f32 %v979_v30, 0.0 }
 0x21b   : > { %v1008_v33 = vpack.c.bf16 %v999_v32, %v998_v31 }
 0x21d   : > { %1118 = vmatmul.bf16.gmra.mxu2 %v1008_v33 }
 0x21e   : > { %v981_v34 = vpop.f32.mrf.mxu1 }
 0x21f   : > { %v982_v35 = vadd.f32 %v4603_v41, %v981_v34 }
 0x221   : > { %v1000_v38 = vmax.f32 %v982_v35, 0.0 }
 0x226   : > { %v983_v36 = vpop.f32.mrf.mxu1 }
 0x227   : > { %v984_v37 = vadd.f32 %v4603_v41, %v983_v36  ;;  %v4604_v41 = vld [vmem:[%s5987_s7 + $0x1] ss:$0 sm:$0xff] }
 0x229   : > { %v1001_v39 = vmax.f32 %v984_v37, 0.0 }
 0x22b   : > { %v1009_v40 = vpack.c.bf16 %v1001_v39, %v1000_v38 }
 0x22d   : > { %1123 = vmatmul.bf16.gmra.mxu2 %v1009_v40 }
 0x240   : > { %v1089_v42 = vpop.f32.mrf.mxu2 }
 0x241   : > { %v1090_v36 = vadd.f32 %v4604_v41, %v1089_v42  ;;  %v4362_v42 = vld [vmem:[#allocation12 + $0xb0] sm:$0xff] }
 0x243   : > { %v1129_v40 = vmax.f32 %v1090_v36, 0.0 }
 0x248   : > { %v1091_v43 = vpop.f32.mrf.mxu2 }
 0x249   : > { %v1092_v33 = vadd.f32 %v4604_v41, %v1091_v43  ;;  %v4363_v43 = vld [vmem:[#allocation12 + $0xb8] sm:$0xff] }
 0x24a   : > { %1296 = vmatpush.bf16.msrb.mxu0 %v4363_v43 }
 0x24b   : > { %v1130_v38 = vmax.f32 %v1092_v33, 0.0 }
 0x24e   : > { %1297 = vmatpush.bf16.msrb.mxu0 %v4362_v42  ;;  %v4365_v42 = vld [vmem:[#allocation12 + $0xc8] sm:$0xff] }
 0x250   : > { %v1094_v44 = vpop.f32.mrf.mxu2 }
 0x251   : > { %v1095_v31 = vadd.f32 %v4604_v41, %v1094_v44  ;;  %v4361_v44 = vld [vmem:[#allocation12 + $0xa8] sm:$0xff] }
 0x252   : > { %1298 = vmatpush.bf16.msrb.mxu0 %v4361_v44  ;;  %v4364_v44 = vld [vmem:[#allocation12 + $0xc0] sm:$0xff] }
 0x253   : > { %v1131_v37 = vmax.f32 %v1095_v31, 0.0 }
 0x258   : > { %v1096_v45 = vpop.f32.mrf.mxu2 }
 0x259   : > { %v1097_v28 = vadd.f32 %v4604_v41, %v1096_v45  ;;  %v1145_v45 = vpack.c.bf16 %v1130_v38, %v1129_v40 }
 0x25b   : > { %v1132_v34 = vmax.f32 %v1097_v28, 0.0 }
 0x25d   : > { %v1146_v39 = vpack.c.bf16 %v1132_v34, %v1131_v37 }
 0x260   : > { %v1099_v46 = vpop.f32.mrf.mxu2 }
 0x261   : > { %v1100_v26 = vadd.f32 %v4604_v41, %v1099_v46  ;;  %v4360_v46 = vld [vmem:[#allocation12 + $0xa0] sm:$0xff] }
 0x262   : > { %1299 = vmatpush.bf16.msrb.mxu0 %v4360_v46 }
 0x263   : > { %v1133_v32 = vmax.f32 %v1100_v26, 0.0 }
 0x268   : > { %v1101_v47 = vpop.f32.mrf.mxu2 }
 0x269   : > { %v5395_v22 = vadd.f32 %v4604_v41, %v1101_v47  ;;  %v4359_v47 = vld [vmem:[#allocation12 + $0x98] sm:$0xff] }
 0x26a   : > { %1300 = vmatpush.bf16.msrb.mxu0 %v4359_v47 }
 0x26b   : > { %v1134_v29 = vmax.f32 %v5395_v22, 0.0 }
 0x26d   : > { %v1147_v35 = vpack.c.bf16 %v1134_v29, %v1133_v32 }
 0x270   : > { %v1104_v48 = vpop.f32.mrf.mxu2 }
 0x271   : > { %v5392_v20 = vadd.f32 %v4604_v41, %v1104_v48  ;;  %v4358_v48 = vld [vmem:[#allocation12 + $0x90] sm:$0xff] }
 0x272   : > { %1301 = vmatpush.bf16.msrb.mxu0 %v4358_v48 }
 0x273   : > { %v1135_v27 = vmax.f32 %v5392_v20, 0.0 }
 0x278   : > { %v1106_v49 = vpop.f32.mrf.mxu2 }
 0x279   : > { %v5385_v16 = vadd.f32 %v4604_v41, %v1106_v49  ;;  %v4357_v49 = vld [vmem:[#allocation12 + $0x88] sm:$0xff] }
 0x27a   : > { %1302 = vmatpush.bf16.msrb.mxu0 %v4357_v49 }
 0x27b   : > { %v1136_v24 = vmax.f32 %v5385_v16, 0.0 }
 0x27d   : > { %v1148_v30 = vpack.c.bf16 %v1136_v24, %v1135_v27 }
 0x280   : > { %v1109_v50 = vpop.f32.mrf.mxu2 }
 0x281   : > { %v5382_v13 = vadd.f32 %v4604_v41, %v1109_v50  ;;  %v4356_v50 = vld [vmem:[#allocation12 + $0x80] sm:$0xff] }
 0x282   : > { %1303 = vmatpush.bf16.msrb.mxu0 %v4356_v50 }
 0x283   : > { %v1137_v21 = vmax.f32 %v5382_v13, 0.0  ;;  %v4369_v13 = vld [vmem:[#allocation12 + $0xe8] sm:$0xff] }
 0x288   : > { %v1111_v51 = vpop.f32.mrf.mxu2 }
 0x289   : > { %v5375_v5 = vadd.f32 %v4604_v41, %v1111_v51 }
 0x28b   : > { %v1138_v17 = vmax.f32 %v5375_v5, 0.0  ;;  %v4368_v5 = vld [vmem:[#allocation12 + $0xe0] sm:$0xff] }
 0x28d   : > { %v1149_v25 = vpack.c.bf16 %v1138_v17, %v1137_v21 }
 0x290   : > { %v1114_v52 = vpop.f32.mrf.mxu2 }
 0x291   : > { %v5372_v3 = vadd.f32 %v4604_v41, %v1114_v52 }
 0x293   : > { %v1139_v14 = vmax.f32 %v5372_v3, 0.0 }
 0x298   : > { %v1116_v53 = vpop.f32.mrf.mxu2 }
 0x299   : > { %v5365_v0 = vadd.f32 %v4604_v41, %v1116_v53 }
 0x29b   : > { %v1140_v6 = vmax.f32 %v5365_v0, 0.0 }
 0x29d   : > { %v1150_v18 = vpack.c.bf16 %v1140_v6, %v1139_v14 }
 0x2a0   : > { %v1119_v54 = vpop.f32.mrf.mxu2 }
 0x2a1   : > { %v5361_v61 = vadd.f32 %v4604_v41, %v1119_v54 }
 0x2a3   : > { %v1141_v4 = vmax.f32 %v5361_v61, 0.0 }
 0x2a8   : > { %v1121_v55 = vpop.f32.mrf.mxu2 }
 0x2a9   : > { %v5357_v59 = vadd.f32 %v4604_v41, %v1121_v55 }
 0x2ab   : > { %v1142_v1 = vmax.f32 %v5357_v59, 0.0 }
 0x2ad   : > { %v1151_v7 = vpack.c.bf16 %v1142_v1, %v1141_v4 }
 0x2b0   : > { %v1124_v56 = vpop.f32.mrf.mxu2 }
 0x2b1   : > { %v5355_v57 = vadd.f32 %v4604_v41, %v1124_v56 }
 0x2b3   : > { %v1143_v62 = vmax.f32 %v5355_v57, 0.0 }
 0x2b8   : > { %v1126_v58 = vpop.f32.mrf.mxu2 }
 0x2b9   : > { %v5359_v60 = vadd.f32 %v4604_v41, %v1126_v58 }
 0x2bb   : > { %v1144_v63 = vmax.f32 %v5359_v60, 0.0 }
 0x2bd   : > { %v1152_v2 = vpack.c.bf16 %v1144_v63, %v1143_v62 }
 0x2bf   : > { %1153 = vmatpush.bf16.msra.mxu3 %v1152_v2 }
 0x2c3   : > { %1154 = vmatpush.bf16.msra.mxu3 %v1151_v7 }
 0x2c7   : > { %1155 = vmatpush.bf16.msra.mxu3 %v1150_v18 }
 0x2cb   : > { %1156 = vmatpush.bf16.msra.mxu3 %v1149_v25 }
 0x2cf   : > { %1157 = vmatpush.bf16.msra.mxu3 %v1148_v30 }
 0x2d3   : > { %1158 = vmatpush.bf16.msra.mxu3 %v1147_v35 }
 0x2d7   : > { %1159 = vmatpush.bf16.msra.mxu3 %v1146_v39 }
 0x2db   : > { %1160 = vmatpush.bf16.msra.mxu3 %v1145_v45  ;;  %v4367_v45 = vld [vmem:[#allocation12 + $0xd8] sm:$0xff] }
 0x2de   : > { %1161 = vmatmul.bf16.vlgmr.msra.gmra.mxu3 %v5310_v8 }
 0x2ee   : > { %1166 = vmatmul.bf16.gmra.mxu3 %v5314_v9 }
 0x2fe   : > { %1171 = vmatmul.bf16.gmra.mxu3 %v5318_v10 }
 0x30e   : > { %1176 = vmatmul.bf16.gmra.mxu3 %v5322_v11 }
 0x31e   : > { %1181 = vmatmul.bf16.gmra.mxu3 %v5326_v12 }
 0x32e   : > { %1186 = vmatmul.bf16.gmra.mxu3 %v5330_v15 }
 0x33e   : > { %1191 = vmatmul.bf16.gmra.mxu3 %v5334_v19 }
 0x34e   : > { %1196 = vmatmul.bf16.gmra.mxu3 %v5338_v23 }
 0x361   : > { %v1162_v51 = vpop.f32.mrf.mxu3 }
 0x362   : > { %v1202_v53 = vadd.f32 %v1162_v51, %v1129_v40  ;;  %v4371_v40 = vld [vmem:[#allocation12 + $0xf8] sm:$0xff] }
 0x363   : > { %1439 = vmatpush.bf16.msrb.mxu1 %v4371_v40 }
 0x369   : > { %v1164_v52 = vpop.f32.mrf.mxu3 }
 0x36a   : > { %v1203_v54 = vadd.f32 %v1164_v52, %v1130_v38 }
 0x36c   : > { %v1218_v55 = vpack.c.bf16 %v1203_v54, %v1202_v53 }
 0x36e   : > { %1304 = vmatmul.bf16.vlgmr.msrb.gmra.mxu0 %v1218_v55 }
 0x371   : > { %v1167_v56 = vpop.f32.mrf.mxu3 }
 0x372   : > { %v1204_v58 = vadd.f32 %v1167_v56, %v1131_v37 }
 0x379   : > { %v1169_v41 = vpop.f32.mrf.mxu3 }
 0x37a   : > { %v1205_v2 = vadd.f32 %v1169_v41, %v1132_v34 }
 0x37c   : > { %v1219_v7 = vpack.c.bf16 %v1205_v2, %v1204_v58 }
 0x37e   : > { %1309 = vmatmul.bf16.gmra.mxu0 %v1219_v7 }
 0x381   : > { %v1172_v18 = vpop.f32.mrf.mxu3 }
 0x382   : > { %v1206_v25 = vadd.f32 %v1172_v18, %v1133_v32 }
 0x389   : > { %v1174_v22 = vpop.f32.mrf.mxu3 }
 0x38a   : > { %v1207_v26 = vadd.f32 %v1174_v22, %v1134_v29 }
 0x38c   : > { %v1220_v28 = vpack.c.bf16 %v1207_v26, %v1206_v25 }
 0x38e   : > { %1314 = vmatmul.bf16.gmra.mxu0 %v1220_v28 }
 0x391   : > { %v1177_v30 = vpop.f32.mrf.mxu3 }
 0x392   : > { %v1208_v31 = vadd.f32 %v1177_v30, %v1135_v27  ;;  %v4370_v27 = vld [vmem:[#allocation12 + $0xf0] sm:$0xff] }
 0x393   : > { %1440 = vmatpush.bf16.msrb.mxu1 %v4370_v27 }
 0x397   : > { %1441 = vmatpush.bf16.msrb.mxu1 %v4369_v13 }
 0x399   : > { %v1179_v23 = vpop.f32.mrf.mxu3 }
 0x39a   : > { %v1209_v33 = vadd.f32 %v1179_v23, %v1136_v24 }
 0x39b   : > { %1442 = vmatpush.bf16.msrb.mxu1 %v4368_v5 }
 0x39c   : > { %v1221_v35 = vpack.c.bf16 %v1209_v33, %v1208_v31 }
 0x39e   : > { %1319 = vmatmul.bf16.gmra.mxu0 %v1221_v35 }
 0x39f   : > { %1443 = vmatpush.bf16.msrb.mxu1 %v4367_v45 }
 0x3a1   : > { %v1182_v36 = vpop.f32.mrf.mxu3 }
 0x3a2   : > { %v1210_v37 = vadd.f32 %v1182_v36, %v1137_v21 }
 0x3a9   : > { %v1184_v34 = vpop.f32.mrf.mxu3 }
 0x3aa   : > { %v1211_v29 = vadd.f32 %v1184_v34, %v1138_v17 }
 0x3ac   : > { %v1222_v32 = vpack.c.bf16 %v1211_v29, %v1210_v37 }
 0x3ae   : > { %1324 = vmatmul.bf16.gmra.mxu0 %v1222_v32 }
 0x3b1   : > { %v1187_v38 = vpop.f32.mrf.mxu3 }
 0x3b2   : > { %v1212_v20 = vadd.f32 %v1187_v38, %v1139_v14 }
 0x3b9   : > { %v1189_v39 = vpop.f32.mrf.mxu3 }
 0x3ba   : > { %v1213_v16 = vadd.f32 %v1189_v39, %v1140_v6  ;;  %v4366_v6 = vld [vmem:[#allocation12 + $0xd0] sm:$0xff] }
 0x3bb   : > { %1444 = vmatpush.bf16.msrb.mxu1 %v4366_v6 }
 0x3bc   : > { %v1223_v24 = vpack.c.bf16 %v1213_v16, %v1212_v20 }
 0x3be   : > { %1329 = vmatmul.bf16.gmra.mxu0 %v1223_v24 }
 0x3bf   : > { %1445 = vmatpush.bf16.msrb.mxu1 %v4365_v42 }
 0x3c1   : > { %v1192_v21 = vpop.f32.mrf.mxu3 }
 0x3c2   : > { %v1214_v43 = vadd.f32 %v1192_v21, %v1141_v4 }
 0x3c3   : > { %1446 = vmatpush.bf16.msrb.mxu1 %v4364_v44 }
 0x3c9   : > { %v1194_v17 = vpop.f32.mrf.mxu3 }
 0x3ca   : > { %v1215_v3 = vadd.f32 %v1194_v17, %v1142_v1  ;;  %v4605_v1 = vld [vmem:[%s5987_s7 + $0x2] ss:$0 sm:$0xff] }
 0x3cc   : > { %v1224_v0 = vpack.c.bf16 %v1215_v3, %v1214_v43 }
 0x3ce   : > { %1334 = vmatmul.bf16.gmra.mxu0 %v1224_v0 }
 0x3d1   : > { %v1197_v14 = vpop.f32.mrf.mxu3 }
 0x3d2   : > { %v1216_v47 = vadd.f32 %v1197_v14, %v1143_v62 }
 0x3d9   : > { %v1199_v46 = vpop.f32.mrf.mxu3 }
 0x3da   : > { %v1217_v61 = vadd.f32 %v1199_v46, %v1144_v63 }
 0x3dc   : > { %v1225_v4 = vpack.c.bf16 %v1217_v61, %v1216_v47 }
 0x3de   : > { %1339 = vmatmul.bf16.gmra.mxu0 %v1225_v4 }
 0x3eb   : > { %v1305_v59 = vpop.f32.mrf.mxu0 }
 0x3ec   : > { %v1306_v48 = vadd.f32 %v4605_v1, %v1305_v59 }
 0x3ee   : > { %v1345_v51 = vmax.f32 %v1306_v48, 0.0 }
 0x3f3   : > { %v1307_v49 = vpop.f32.mrf.mxu0 }
 0x3f4   : > { %v1308_v50 = vadd.f32 %v4605_v1, %v1307_v49 }
 0x3f6   : > { %v1346_v52 = vmax.f32 %v1308_v50, 0.0 }
 0x3f8   : > { %v1361_v53 = vpack.c.bf16 %v1346_v52, %v1345_v51 }
 0x3fa   : > { %1447 = vmatmul.bf16.vlgmr.msrb.gmra.mxu1 %v1361_v53 }
 0x3fb   : > { %v1310_v54 = vpop.f32.mrf.mxu0 }
 0x3fc   : > { %v1311_v57 = vadd.f32 %v4605_v1, %v1310_v54 }
 0x3fe   : > { %v1347_v60 = vmax.f32 %v1311_v57, 0.0 }
 0x403   : > { %v1312_v62 = vpop.f32.mrf.mxu0 }
 0x404   : > { %v1313_v55 = vadd.f32 %v4605_v1, %v1312_v62  ;;  %v4403_v62 = vld [vmem:[%s5279_s5 + $0x38] sm:$0xff] }
 0x405   : > { %2007 = vmatpush.bf16.msra.mxu1 %v4403_v62 }
 0x406   : > { %v1348_v63 = vmax.f32 %v1313_v55, 0.0  ;;  %v4402_v55 = vld [vmem:[%s5279_s5 + $0x30] sm:$0xff] }
 0x408   : > { %v1362_v56 = vpack.c.bf16 %v1348_v63, %v1347_v60  ;;  %v4401_v63 = vld [vmem:[%s5279_s5 + $0x28] sm:$0xff] }
 0x409   : > { %2008 = vmatpush.bf16.msra.mxu1 %v4402_v55  ;;  %v5545_v55 = vld [vmem:[%s5277_s29 + $0x18] sm:$0xff] }
 0x40a   : > { %1452 = vmatmul.bf16.gmra.mxu1 %v1362_v56  ;;  %v4400_v56 = vld [vmem:[%s5279_s5 + $0x20] sm:$0xff] }
 0x40b   : > { %v1315_v41 = vpop.f32.mrf.mxu0 }
 0x40c   : > { %v1316_v58 = vadd.f32 %v4605_v1, %v1315_v41 }
 0x40d   : > { %2009 = vmatpush.bf16.msra.mxu1 %v4401_v63  ;;  %v5559_v63 = vld [vmem:[%s5277_s29 + $0x28] sm:$0xff] }
 0x40e   : > { %v1349_v18 = vmax.f32 %v1316_v58, 0.0  ;;  %v4399_v58 = vld [vmem:[%s5279_s5 + $0x18] sm:$0xff] }
 0x411   : > { %2010 = vmatpush.bf16.msra.mxu1 %v4400_v56  ;;  %v5564_v56 = vld [vmem:[%s5277_s29 + $0x30] sm:$0xff] }
 0x413   : > { %v1317_v2 = vpop.f32.mrf.mxu0 }
 0x414   : > { %v1318_v7 = vadd.f32 %v4605_v1, %v1317_v2  ;;  %v4398_v2 = vld [vmem:[%s5279_s5 + $0x10] sm:$0xff] }
 0x415   : > { %2011 = vmatpush.bf16.msra.mxu1 %v4399_v58  ;;  %v4409_v58 = vld [vmem:[#allocation13 + $0x28] sm:$0xff] }
 0x416   : > { %v1350_v22 = vmax.f32 %v1318_v7, 0.0 }
 0x418   : > { %v1363_v25 = vpack.c.bf16 %v1350_v22, %v1349_v18  ;;  %v4397_v18 = vld [vmem:[%s5279_s5 + $0x8] sm:$0xff]  ;;  %v4396_v22 = vld [vmem:[%s5279_s5] sm:$0xff] }
 0x419   : > { %2012 = vmatpush.bf16.msra.mxu1 %v4398_v2  ;;  %v4408_v2 = vld [vmem:[#allocation13 + $0x20] sm:$0xff] }
 0x41a   : > { %1457 = vmatmul.bf16.gmra.mxu1 %v1363_v25 }
 0x41b   : > { %v1320_v26 = vpop.f32.mrf.mxu0 }
 0x41c   : > { %v1321_v28 = vadd.f32 %v4605_v1, %v1320_v26  ;;  %v4388_v26 = vld [vmem:[%s5277_s29] sm:$0xff] }
 0x41d   : > { %2013 = vmatpush.bf16.msra.mxu1 %v4397_v18 }
 0x41e   : > { %v1351_v31 = vmax.f32 %v1321_v28, 0.0 }
 0x421   : > { %2014 = vmatpush.bf16.msra.mxu1 %v4396_v22  ;;  %v4406_v22 = vld [vmem:[#allocation13 + $0x10] sm:$0xff] }
 0x423   : > { %v1322_v30 = vpop.f32.mrf.mxu0 }
 0x424   : > { %v1323_v23 = vadd.f32 %v4605_v1, %v1322_v30  ;;  %v4606_v30 = vld [vmem:[%s5987_s7 + $0x3] ss:$0 sm:$0xff] }
 0x426   : > { %v1352_v33 = vmax.f32 %v1323_v23, 0.0 }
 0x428   : > { %v1364_v35 = vpack.c.bf16 %v1352_v33, %v1351_v31 }
 0x42a   : > { %1462 = vmatmul.bf16.gmra.mxu1 %v1364_v35 }
 0x42b   : > { %v1325_v36 = vpop.f32.mrf.mxu0 }
 0x42c   : > { %v1326_v34 = vadd.f32 %v4605_v1, %v1325_v36  ;;  %v4389_v36 = vld [vmem:[%s5277_s29 + $0x8] sm:$0xff] }
 0x42e   : > { %v1353_v32 = vmax.f32 %v1326_v34, 0.0 }
 0x433   : > { %v1327_v37 = vpop.f32.mrf.mxu0 }
 0x434   : > { %v1328_v29 = vadd.f32 %v4605_v1, %v1327_v37 }
 0x436   : > { %v1354_v38 = vmax.f32 %v1328_v29, 0.0 }
 0x438   : > { %v1365_v39 = vpack.c.bf16 %v1354_v38, %v1353_v32 }
 0x43a   : > { %1467 = vmatmul.bf16.gmra.mxu1 %v1365_v39 }
 0x43b   : > { %v1330_v40 = vpop.f32.mrf.mxu0 }
 0x43c   : > { %v1331_v20 = vadd.f32 %v4605_v1, %v1330_v40 }
 0x43e   : > { %v1355_v27 = vmax.f32 %v1331_v20, 0.0 }
 0x443   : > { %v1332_v16 = vpop.f32.mrf.mxu0 }
 0x444   : > { %v1333_v24 = vadd.f32 %v4605_v1, %v1332_v16 }
 0x446   : > { %v1356_v13 = vmax.f32 %v1333_v24, 0.0 }
 0x448   : > { %v1366_v21 = vpack.c.bf16 %v1356_v13, %v1355_v27 }
 0x44a   : > { %1472 = vmatmul.bf16.gmra.mxu1 %v1366_v21 }
 0x44b   : > { %v1335_v5 = vpop.f32.mrf.mxu0 }
 0x44c   : > { %v1336_v17 = vadd.f32 %v4605_v1, %v1335_v5 }
 0x44e   : > { %v1357_v3 = vmax.f32 %v1336_v17, 0.0 }
 0x453   : > { %v1337_v45 = vpop.f32.mrf.mxu0 }
 0x454   : > { %v1338_v43 = vadd.f32 %v4605_v1, %v1337_v45 }
 0x456   : > { %v1358_v0 = vmax.f32 %v1338_v43, 0.0 }
 0x458   : > { %v1367_v6 = vpack.c.bf16 %v1358_v0, %v1357_v3  ;;  %v5501_v0 = vld [vmem:[%s5277_s29 + $0x10] sm:$0xff] }
 0x45a   : > { %1477 = vmatmul.bf16.gmra.mxu1 %v1367_v6 }
 0x45b   : > { %v1340_v14 = vpop.f32.mrf.mxu0 }
 0x45c   : > { %v1341_v42 = vadd.f32 %v4605_v1, %v1340_v14 }
 0x45e   : > { %v1359_v47 = vmax.f32 %v1341_v42, 0.0 }
 0x463   : > { %v1342_v44 = vpop.f32.mrf.mxu0 }
 0x464   : > { %v1343_v46 = vadd.f32 %v4605_v1, %v1342_v44 }
 0x466   : > { %v1360_v61 = vmax.f32 %v1343_v46, 0.0 }
 0x468   : > { %v1368_v4 = vpack.c.bf16 %v1360_v61, %v1359_v47 }
 0x46a   : > { %1482 = vmatmul.bf16.gmra.mxu1 %v1368_v4 }
 0x477   : > { %v5439_v59 = vpop.f32.mrf.mxu1 }
 0x47a   : > { %2015 = vmatmul.bf16.vlgmr.msra.gmra.mxu1 %v4388_v26  ;;  %v4376_v26 = vld [vmem:[#allocation12 + $0x120] sm:$0xff] }
 0x47f   : > { %v5441_v48 = vpop.f32.mrf.mxu1 }
 0x487   : > { %v5443_v49 = vpop.f32.mrf.mxu1 }
 0x48a   : > { %2020 = vmatmul.bf16.gmra.mxu1 %v4389_v36 }
 0x48f   : > { %v5445_v50 = vpop.f32.mrf.mxu1 }
 0x490   : > { %v5515_v47 = vadd.f32 %v4606_v30, %v5445_v50 }
 0x492   : > { %v1491_v50 = vmax.f32 %v5515_v47, 0.0 }
 0x497   : > { %v1458_v51 = vpop.f32.mrf.mxu1 }
 0x498   : > { %v5510_v44 = vadd.f32 %v4606_v30, %v1458_v51 }
 0x49a   : > { %2025 = vmatmul.bf16.gmra.mxu1 %v5501_v0  ;;  %v1492_v51 = vmax.f32 %v5510_v44, 0.0 }
 0x49f   : > { %v1460_v52 = vpop.f32.mrf.mxu1 }
 0x4a0   : > { %v5503_v6 = vadd.f32 %v4606_v30, %v1460_v52  ;;  %v5523_v52 = vadd.f32 %v4606_v30, %v5443_v49 }
 0x4a2   : > { %v1493_v61 = vmax.f32 %v5503_v6, 0.0  ;;  %v1490_v49 = vmax.f32 %v5523_v52, 0.0 }
 0x4a7   : > { %v1463_v53 = vpop.f32.mrf.mxu1 }
 0x4a8   : > { %v5497_v43 = vadd.f32 %v4606_v30, %v1463_v53  ;;  %v5527_v53 = vadd.f32 %v4606_v30, %v5441_v48  ;;  %v1505_v48 = vpack.c.bf16 %v1491_v50, %v1490_v49 }
 0x4aa   : > { %v1494_v46 = vmax.f32 %v5497_v43, 0.0  ;;  %2030 = vmatmul.bf16.gmra.mxu1 %v5545_v55 }
 0x4af   : > { %v1465_v1 = vpop.f32.mrf.mxu1 }
 0x4b0   : > { %v5490_v5 = vadd.f32 %v4606_v30, %v1465_v1  ;;  %v1506_v1 = vpack.c.bf16 %v1493_v61, %v1492_v51 }
 0x4b2   : > { %v1495_v14 = vmax.f32 %v5490_v5, 0.0 }
 0x4b4   : > { %v1507_v4 = vpack.c.bf16 %v1495_v14, %v1494_v46 }
 0x4b7   : > { %v1468_v54 = vpop.f32.mrf.mxu1 }
 0x4b8   : > { %v5487_v13 = vadd.f32 %v4606_v30, %v1468_v54  ;;  %v5535_v54 = vadd.f32 %v4606_v30, %v5439_v59 }
 0x4ba   : > { %v1496_v3 = vmax.f32 %v5487_v13, 0.0  ;;  %v1488_v62 = vmax.f32 %v5535_v54, 0.0 }
 0x4bf   : > { %v1470_v57 = vpop.f32.mrf.mxu1 }
 0x4c0   : > { %v5480_v16 = vadd.f32 %v4606_v30, %v1470_v57  ;;  %v1489_v57 = vmax.f32 %v5527_v53, 0.0 }
 0x4c2   : > { %v1497_v17 = vmax.f32 %v5480_v16, 0.0  ;;  %v1504_v59 = vpack.c.bf16 %v1489_v57, %v1488_v62 }
 0x4c4   : > { %v1508_v42 = vpack.c.bf16 %v1497_v17, %v1496_v3 }
 0x4c7   : > { %v1473_v60 = vpop.f32.mrf.mxu1 }
 0x4c8   : > { %v5477_v40 = vadd.f32 %v4606_v30, %v1473_v60  ;;  %v5554_v60 = vld [vmem:[%s5277_s29 + $0x20] sm:$0xff] }
 0x4c9   : > { %2035 = vmatmul.bf16.gmra.mxu1 %v5554_v60 }
 0x4ca   : > { %v1498_v21 = vmax.f32 %v5477_v40, 0.0 }
 0x4cf   : > { %v1475_v41 = vpop.f32.mrf.mxu1 }
 0x4d0   : > { %v5470_v32 = vadd.f32 %v4606_v30, %v1475_v41  ;;  %v5569_v41 = vld [vmem:[%s5277_s29 + $0x38] sm:$0xff] }
 0x4d2   : > { %v1499_v24 = vmax.f32 %v5470_v32, 0.0  ;;  %v4385_v32 = vld [vmem:[#allocation12 + $0x168] sm:$0xff] }
 0x4d4   : > { %v1509_v45 = vpack.c.bf16 %v1499_v24, %v1498_v21 }
 0x4d7   : > { %v1478_v7 = vpop.f32.mrf.mxu1 }
 0x4d8   : > { %v5466_v34 = vadd.f32 %v4606_v30, %v1478_v7  ;;  %v4407_v7 = vld [vmem:[#allocation13 + $0x18] sm:$0xff] }
 0x4d9   : > { %2040 = vmatmul.bf16.gmra.mxu1 %v5559_v63 }
 0x4da   : > { %v1500_v20 = vmax.f32 %v5466_v34, 0.0 }
 0x4df   : > { %v1480_v25 = vpop.f32.mrf.mxu1 }
 0x4e0   : > { %v5461_v33 = vadd.f32 %v4606_v30, %v1480_v25  ;;  %v4377_v25 = vld [vmem:[#allocation12 + $0x128] sm:$0xff] }
 0x4e2   : > { %v1501_v38 = vmax.f32 %v5461_v33, 0.0 }
 0x4e4   : > { %v1510_v27 = vpack.c.bf16 %v1501_v38, %v1500_v20 }
 0x4e7   : > { %v1483_v28 = vpop.f32.mrf.mxu1 }
 0x4e8   : > { %v5459_v23 = vadd.f32 %v4606_v30, %v1483_v28  ;;  %v4404_v28 = vld [vmem:[#allocation13] sm:$0xff] }
 0x4e9   : > { %2045 = vmatmul.bf16.gmra.mxu1 %v5564_v56 }
 0x4ea   : > { %v1502_v37 = vmax.f32 %v5459_v23, 0.0 }
 0x4ef   : > { %v1485_v31 = vpop.f32.mrf.mxu1 }
 0x4f0   : > { %v5463_v35 = vadd.f32 %v4606_v30, %v1485_v31  ;;  %v4375_v31 = vld [vmem:[#allocation12 + $0x118] sm:$0xff] }
 0x4f2   : > { %v1503_v29 = vmax.f32 %v5463_v35, 0.0  ;;  %v5623_v35 = vld [vmem:[%s5987_s7 + $0x4] ss:$0 sm:$0xff] }
 0x4f4   : > { %v1511_v39 = vpack.c.bf16 %v1503_v29, %v1502_v37 }
 0x4f6   : > { %1512 = vmatpush.bf16.msrb.mxu2 %v1511_v39  ;;  %v4373_v39 = vld [vmem:[#allocation12 + $0x108] sm:$0xff] }
 0x4f7   : > { %v2016_v18 = vpop.f32.mrf.mxu1 }
 0x4f9   : > { %2050 = vmatmul.bf16.gmra.mxu1 %v5569_v41 }
 0x4fa   : > { %1513 = vmatpush.bf16.msrb.mxu2 %v1510_v27  ;;  %v4372_v27 = vld [vmem:[#allocation12 + $0x100] sm:$0xff] }
 0x4fe   : > { %1514 = vmatpush.bf16.msrb.mxu2 %v1509_v45 }
 0x4ff   : > { %v2018_v30 = vpop.f32.mrf.mxu1 }
 0x502   : > { %1515 = vmatpush.bf16.msrb.mxu2 %v1508_v42  ;;  %v4618_v42 = vld [vmem:[%s5264_s18 + $0x38] sm:$0xff] }
 0x506   : > { %1516 = vmatpush.bf16.msrb.mxu2 %v1507_v4  ;;  %v1879_v4 = vld [vmem:[%s5279_s5] sm:$0xff]  }
 0x507   : > { %v2021_v36 = vpop.f32.mrf.mxu1 }
 0x50a   : > { %1517 = vmatpush.bf16.msrb.mxu2 %v1506_v1  ;;  %v1895_v1 = vunpack.c.l.bf16 %v1879_v4 }
 0x50e   : > { %1518 = vmatpush.bf16.msrb.mxu2 %v1505_v48  ;;  %v1896_v48 = vunpack.c.h.bf16 %v1879_v4 }
 0x50f   : > { %v2023_v45 = vpop.f32.mrf.mxu1 }
 0x512   : > { %1519 = vmatpush.bf16.msrb.mxu2 %v1504_v59 }
 0x515   : > { %1520 = vmatmul.bf16.vlgmr.msrb.gmra.mxu2 %v5310_v8  ;;  %v4411_v8 = vld [vmem:[#allocation13 + $0x38] sm:$0xff] }
 0x516   : > { %2148 = vmatpush.bf16.msra.mxu2 %v4411_v8  ;;  %v2056_v8 = vadd.f32 %v2016_v18, %v1895_v1 }
 0x517   : > { %v2026_v59 = vpop.f32.mrf.mxu1 }
 0x525   : > { %1525 = vmatmul.bf16.gmra.mxu2 %v5314_v9  ;;  %v4410_v9 = vld [vmem:[#allocation13 + $0x30] sm:$0xff] }
 0x526   : > { %2149 = vmatpush.bf16.msra.mxu2 %v4410_v9  ;;  %v2057_v9 = vadd.f32 %v2018_v30, %v1896_v48 }
 0x52a   : > { %2150 = vmatpush.bf16.msra.mxu2 %v4409_v58  ;;  %v2072_v58 = vpack.c.bf16 %v2057_v9, %v2056_v8  ;;  %v1885_v8 = vld [vmem:[%s5279_s5 + $0x18] sm:$0xff]  }
 0x52e   : > { %2151 = vmatpush.bf16.msra.mxu2 %v4408_v2 }
 0x532   : > { %2152 = vmatpush.bf16.msra.mxu2 %v4407_v7 }
 0x535   : > { %1530 = vmatmul.bf16.gmra.mxu2 %v5318_v10  ;;  %v4379_v10 = vld [vmem:[#allocation12 + $0x138] sm:$0xff] }
 0x536   : > { %1655 = vmatpush.bf16.msrb.mxu3 %v4379_v10  ;;  %2153 = vmatpush.bf16.msra.mxu2 %v4406_v22  ;;  %v2028_v10 = vpop.f32.mrf.mxu1 }
 0x545   : > { %1535 = vmatmul.bf16.gmra.mxu2 %v5322_v11  ;;  %v4378_v11 = vld [vmem:[#allocation12 + $0x130] sm:$0xff] }
 0x546   : > { %1656 = vmatpush.bf16.msrb.mxu3 %v4378_v11 }
 0x54a   : > { %1657 = vmatpush.bf16.msrb.mxu3 %v4377_v25 }
 0x54e   : > { %1658 = vmatpush.bf16.msrb.mxu3 %v4376_v26 }
 0x552   : > { %1659 = vmatpush.bf16.msrb.mxu3 %v4375_v31  ;;  %v2031_v31 = vpop.f32.mrf.mxu1 }
 0x555   : > { %1540 = vmatmul.bf16.gmra.mxu2 %v5326_v12  ;;  %v4405_v12 = vld [vmem:[#allocation13 + $0x8] sm:$0xff] }
 0x556   : > { %2154 = vmatpush.bf16.msra.mxu2 %v4405_v12 }
 0x55a   : > { %2155 = vmatpush.bf16.msra.mxu2 %v4404_v28  ;;  %v2033_v4 = vpop.f32.mrf.mxu1 }
 0x562   : > { %v2036_v48 = vpop.f32.mrf.mxu1 }
 0x565   : > { %1545 = vmatmul.bf16.gmra.mxu2 %v5330_v15  ;;  %v4374_v15 = vld [vmem:[#allocation12 + $0x110] sm:$0xff] }
 0x566   : > { %1660 = vmatpush.bf16.msrb.mxu3 %v4374_v15  ;;  %v1883_v15 = vld [vmem:[%s5279_s5 + $0x10] sm:$0xff]  }
 0x56a   : > { %1661 = vmatpush.bf16.msrb.mxu3 %v4373_v39 }
 0x56e   : > { %1662 = vmatpush.bf16.msrb.mxu3 %v4372_v27  ;;  %v1899_v27 = vunpack.c.l.bf16 %v1883_v15 }
 0x575   : > { %1550 = vmatmul.bf16.gmra.mxu2 %v5334_v19  ;;  %v1881_v19 = vld [vmem:[%s5279_s5 + $0x8] sm:$0xff]  }
 0x576   : > { %v1897_v7 = vunpack.c.l.bf16 %v1881_v19  ;;  %v1898_v11 = vunpack.c.h.bf16 %v1881_v19  ;;  %v1902_v19 = vunpack.c.h.bf16 %v1885_v8 }
 0x578   : > { %v2058_v22 = vadd.f32 %v2021_v36, %v1897_v7  ;;  %v2059_v25 = vadd.f32 %v2023_v45, %v1898_v11  ;;  %v2060_v36 = vadd.f32 %v2026_v59, %v1899_v27  ;;  %v2063_v59 = vadd.f32 %v2033_v4, %v1902_v19  ;;  %v2038_v7 = vpop.f32.mrf.mxu1  ;;  %v1887_v11 = vld [vmem:[%s5279_s5 + $0x20] sm:$0xff]  }
 0x57a   : > { %v2073_v18 = vpack.c.bf16 %v2059_v25, %v2058_v22 }
 0x580   : > { %v2041_v25 = vpop.f32.mrf.mxu1 }
 0x585   : > { %1555 = vmatmul.bf16.gmra.mxu2 %v4618_v42  ;;  %v1900_v42 = vunpack.c.h.bf16 %v1883_v15  ;;  %v1889_v15 = vld [vmem:[%s5279_s5 + $0x28] sm:$0xff]  }
 0x586   : > { %v1905_v27 = vunpack.c.l.bf16 %v1889_v15 }
 0x587   : > { %v2061_v45 = vadd.f32 %v2028_v10, %v1900_v42  ;;  %v1906_v42 = vunpack.c.h.bf16 %v1889_v15 }
 0x595   : > { %2156 = vmatmul.bf16.vlgmr.msra.gmra.mxu2 %v2072_v58  ;;  %v1901_v58 = vunpack.c.l.bf16 %v1885_v8 }
 0x598   : > { %v1521_v2 = vpop.f32.mrf.mxu2 }
 0x599   : > { %v1561_v26 = vadd.f32 %v1521_v2, %v1488_v62  ;;  %v2062_v2 = vadd.f32 %v2031_v31, %v1901_v58  ;;  %v4417_v58 = vld [vmem:[#allocation13 + $0x68] sm:$0xff] }
 0x5a0   : > { %v1523_v12 = vpop.f32.mrf.mxu2 }
 0x5a1   : > { %v1562_v28 = vadd.f32 %v1523_v12, %v1489_v57  ;;  %v2074_v57 = vpack.c.bf16 %v2061_v45, %v2060_v36  ;;  %v1903_v12 = vunpack.c.l.bf16 %v1887_v11  ;;  %v2066_v36 = vadd.f32 %v2041_v25, %v1905_v27  ;;  %v4381_v27 = vld [vmem:[#allocation12 + $0x148] sm:$0xff] }
 0x5a3   : > { %v1577_v30 = vpack.c.bf16 %v1562_v28, %v1561_v26  ;;  %v1904_v26 = vunpack.c.h.bf16 %v1887_v11  ;;  %v2064_v28 = vadd.f32 %v2036_v48, %v1903_v12  ;;  %v4418_v48 = vld [vmem:[#allocation13 + $0x70] sm:$0xff] }
 0x5a4   : > { %v4386_v11 = vld [vmem:[#allocation12 + $0x170] sm:$0xff] }
 0x5a5   : > { %1663 = vmatmul.bf16.vlgmr.msrb.gmra.mxu3 %v1577_v30  ;;  %2161 = vmatmul.bf16.gmra.mxu2 %v2073_v18  ;;  %v2065_v31 = vadd.f32 %v2038_v7, %v1904_v26  ;;  %v2043_v30 = vpop.f32.mrf.mxu1 }
 0x5a6   : > { %v2067_v45 = vadd.f32 %v2043_v30, %v1906_v42  ;;  %v4383_v30 = vld [vmem:[#allocation12 + $0x158] sm:$0xff] }
 0x5a8   : > { %v1526_v39 = vpop.f32.mrf.mxu2 }
 0x5a9   : > { %v1563_v54 = vadd.f32 %v1526_v39, %v1490_v49 }
 0x5ad   : > { %v2046_v4 = vpop.f32.mrf.mxu1 }
 0x5b0   : > { %v1528_v1 = vpop.f32.mrf.mxu2 }
 0x5b1   : > { %v1564_v53 = vadd.f32 %v1528_v1, %v1491_v50  ;;  %v2075_v50 = vpack.c.bf16 %v2063_v59, %v2062_v2  ;;  %v4416_v59 = vld [vmem:[#allocation13 + $0x60] sm:$0xff] }
 0x5b3   : > { %v1578_v62 = vpack.c.bf16 %v1564_v53, %v1563_v54  ;;  %v4419_v54 = vld [vmem:[#allocation13 + $0x78] sm:$0xff]  ;;  %v1891_v53 = vld [vmem:[%s5279_s5 + $0x30] sm:$0xff]  }
 0x5b4   : > { %2291 = vmatpush.bf16.msra.mxu3 %v4419_v54  ;;  %v1907_v8 = vunpack.c.l.bf16 %v1891_v53 }
 0x5b5   : > { %1668 = vmatmul.bf16.gmra.mxu3 %v1578_v62  ;;  %2166 = vmatmul.bf16.gmra.mxu2 %v2074_v57  ;;  %v2048_v62 = vpop.f32.mrf.mxu1 }
 0x5b6   : > { %v2068_v19 = vadd.f32 %v2046_v4, %v1907_v8 }
 0x5b8   : > { %v1531_v9 = vpop.f32.mrf.mxu2  ;;  %2292 = vmatpush.bf16.msra.mxu3 %v4418_v48 }
 0x5b9   : > { %v1565_v52 = vadd.f32 %v1531_v9, %v1492_v51  ;;  %v1908_v9 = vunpack.c.h.bf16 %v1891_v53 }
 0x5bb   : > { %v2069_v13 = vadd.f32 %v2048_v62, %v1908_v9 }
 0x5bc   : > { %2293 = vmatpush.bf16.msra.mxu3 %v4417_v58 }
 0x5bd   : > { %v2051_v2 = vpop.f32.mrf.mxu1 }
 0x5c0   : > { %v1533_v10 = vpop.f32.mrf.mxu2  ;;  %2294 = vmatpush.bf16.msra.mxu3 %v4416_v59 }
 0x5c1   : > { %v1566_v47 = vadd.f32 %v1533_v10, %v1493_v61  ;;  %v2076_v61 = vpack.c.bf16 %v2065_v31, %v2064_v28  ;;  %v2078_v10 = vpack.c.bf16 %v2069_v13, %v2068_v19 }
 0x5c3   : > { %v1579_v49 = vpack.c.bf16 %v1566_v47, %v1565_v52  ;;  %v4387_v52 = vld [vmem:[#allocation12 + $0x178] sm:$0xff] }
 0x5c4   : > { %v4415_v47 = vld [vmem:[#allocation13 + $0x58] sm:$0xff]  ;;  %1798 = vmatpush.bf16.msra.mxu0 %v4387_v52 }
 0x5c5   : > { %1673 = vmatmul.bf16.gmra.mxu3 %v1579_v49  ;;  %2171 = vmatmul.bf16.gmra.mxu2 %v2075_v50  ;;  %v1893_v50 = vld [vmem:[%s5279_s5 + $0x38] sm:$0xff]   ;;  %v2053_v25 = vpop.f32.mrf.mxu1  ;;  %s6027_s5 = sld [smem:[#allocation34_spill]] }
 0x5c6   : > { %2295 = vmatpush.bf16.msra.mxu3 %v4415_v47  ;;  %v1909_v40 = vunpack.c.l.bf16 %v1893_v50 }
 0x5c8   : > { %v1536_v22 = vpop.f32.mrf.mxu2  ;;  %1799 = vmatpush.bf16.msra.mxu0 %v4386_v11  ;;  %v2070_v12 = vadd.f32 %v2051_v2, %v1909_v40 }
 0x5c9   : > { %v1567_v44 = vadd.f32 %v1536_v22, %v1494_v46  ;;  %v4414_v22 = vld [vmem:[#allocation13 + $0x50] sm:$0xff] }
 0x5ca   : > { %2296 = vmatpush.bf16.msra.mxu3 %v4414_v22 }
 0x5cb   : > { %s651_s20 = scalar_lea.vmem %s6027_s5, %s3670_s12 }
 0x5cc   : > { %1800 = vmatpush.bf16.msra.mxu0 %v4385_v32 }
 0x5d0   : > { %v1538_v18 = vpop.f32.mrf.mxu2 }
 0x5d1   : > { %v1568_v6 = vadd.f32 %v1538_v18, %v1495_v14  ;;  %v2077_v14 = vpack.c.bf16 %v2067_v45, %v2066_v36  ;;  %v5616_v36 = vld [vmem:[#allocation15] ss:$0 sm:$0xff] }
 0x5d3   : > { %v1580_v51 = vpack.c.bf16 %v1568_v6, %v1567_v44  ;;  %v4384_v44 = vld [vmem:[#allocation12 + $0x160] sm:$0xff] }
 0x5d4   : > { %v4412_v6 = vld [vmem:[#allocation13 + $0x40] sm:$0xff]  ;;  %1801 = vmatpush.bf16.msra.mxu0 %v4384_v44 }
 0x5d5   : > { %1678 = vmatmul.bf16.gmra.mxu3 %v1580_v51  ;;  %2176 = vmatmul.bf16.gmra.mxu2 %v2076_v61 }
 0x5d8   : > { %v1541_v39 = vpop.f32.mrf.mxu2  ;;  %1802 = vmatpush.bf16.msra.mxu0 %v4383_v30 }
 0x5d9   : > { %v1569_v43 = vadd.f32 %v1541_v39, %v1496_v3  ;;  %v4382_v39 = vld [vmem:[#allocation12 + $0x150] sm:$0xff] }
 0x5dc   : > { %1803 = vmatpush.bf16.msra.mxu0 %v4382_v39 }
 0x5e0   : > { %v1543_v1 = vpop.f32.mrf.mxu2  ;;  %1804 = vmatpush.bf16.msra.mxu0 %v4381_v27 }
 0x5e1   : > { %v1570_v5 = vadd.f32 %v1543_v1, %v1497_v17 }
 0x5e3   : > { %v1581_v46 = vpack.c.bf16 %v1570_v5, %v1569_v43 }
 0x5e5   : > { %1683 = vmatmul.bf16.gmra.mxu3 %v1581_v46  ;;  %2181 = vmatmul.bf16.gmra.mxu2 %v2077_v14 }
 0x5e8   : > { %v1546_v57 = vpop.f32.mrf.mxu2 }
 0x5e9   : > { %v1571_v16 = vadd.f32 %v1546_v57, %v1498_v21  ;;  %v1910_v21 = vunpack.c.h.bf16 %v1893_v50 }
 0x5eb   : > { %v2071_v26 = vadd.f32 %v2053_v25, %v1910_v21 }
 0x5ed   : > { %v2079_v61 = vpack.c.bf16 %v2071_v26, %v2070_v12 }
 0x5f0   : > { %v1548_v3 = vpop.f32.mrf.mxu2 }
 0x5f1   : > { %v1572_v17 = vadd.f32 %v1548_v3, %v1499_v24  ;;  %v4413_v24 = vld [vmem:[#allocation13 + $0x48] sm:$0xff] }
 0x5f2   : > { %2297 = vmatpush.bf16.msra.mxu3 %v4413_v24 }
 0x5f3   : > { %v1582_v7 = vpack.c.bf16 %v1572_v17, %v1571_v16 }
 0x5f5   : > { %1688 = vmatmul.bf16.gmra.mxu3 %v1582_v7  ;;  %2186 = vmatmul.bf16.gmra.mxu2 %v2078_v10 }
 0x5f6   : > { %2298 = vmatpush.bf16.msra.mxu3 %v4412_v6 }
 0x5f8   : > { %v1551_v49 = vpop.f32.mrf.mxu2 }
 0x5f9   : > { %v1573_v31 = vadd.f32 %v1551_v49, %v1500_v20 }
 0x600   : > { %v1553_v28 = vpop.f32.mrf.mxu2 }
 0x601   : > { %v1574_v18 = vadd.f32 %v1553_v28, %v1501_v38  ;;  %v4380_v38 = vld [vmem:[#allocation12 + $0x140] sm:$0xff] }
 0x602   : > { %1805 = vmatpush.bf16.msra.mxu0 %v4380_v38 }
 0x603   : > { %v1583_v51 = vpack.c.bf16 %v1574_v18, %v1573_v31 }
 0x605   : > { %1693 = vmatmul.bf16.gmra.mxu3 %v1583_v51  ;;  %2191 = vmatmul.bf16.gmra.mxu2 %v2079_v61 }
 0x608   : > { %v1556_v15 = vpop.f32.mrf.mxu2 }
 0x609   : > { %v1575_v33 = vadd.f32 %v1556_v15, %v1502_v37 }
 0x610   : > { %v1558_v42 = vpop.f32.mrf.mxu2 }
 0x611   : > { %v1576_v34 = vadd.f32 %v1558_v42, %v1503_v29 }
 0x613   : > { %v1584_v20 = vpack.c.bf16 %v1576_v34, %v1575_v33 }
 0x615   : > { %1698 = vmatmul.bf16.gmra.mxu3 %v1584_v20 }
 0x618   : > { %v2157_v4 = vpop.f32.mrf.mxu2 }
 0x619   : > { %v2158_v45 = vadd.f32 %v5616_v36, %v2157_v4 }
 0x61b   : > { %v2197_v5 = vmax.f32 %v2158_v45, 0.0 }
 0x620   : > { %v2159_v1 = vpop.f32.mrf.mxu2 }
 0x621   : > { %v2160_v43 = vadd.f32 %v5616_v36, %v2159_v1 }
 0x623   : > { %v2198_v14 = vmax.f32 %v2160_v43, 0.0 }
 0x625   : > { %v2213_v46 = vpack.c.bf16 %v2198_v14, %v2197_v5 }
 0x627   : > { %2299 = vmatmul.bf16.vlgmr.msra.gmra.mxu3 %v2213_v46 }
 0x628   : > { %v1664_v23 = vpop.f32.mrf.mxu3  ;;  %v2162_v37 = vpop.f32.mrf.mxu2 }
 0x629   : > { %v1665_v29 = vadd.f32 %v5623_v35, %v1664_v23  ;;  %v2163_v54 = vadd.f32 %v5616_v36, %v2162_v37 }
 0x62b   : > { %v1704_v8 = vmax.f32 %v1665_v29, 0.0  ;;  %v2199_v9 = vmax.f32 %v2163_v54, 0.0 }
 0x630   : > { %v1666_v53 = vpop.f32.mrf.mxu3  ;;  %v2164_v57 = vpop.f32.mrf.mxu2 }
 0x631   : > { %v1667_v62 = vadd.f32 %v5623_v35, %v1666_v53  ;;  %v2165_v48 = vadd.f32 %v5616_v36, %v2164_v57 }
 0x633   : > { %v1705_v58 = vmax.f32 %v1667_v62, 0.0  ;;  %v2200_v19 = vmax.f32 %v2165_v48, 0.0 }
 0x635   : > { %v1720_v13 = vpack.c.bf16 %v1705_v58, %v1704_v8  ;;  %v2214_v3 = vpack.c.bf16 %v2200_v19, %v2199_v9 }
 0x637   : > { %1806 = vmatmul.bf16.vlgmr.msra.gmra.mxu0 %v1720_v13  ;;  %2304 = vmatmul.bf16.gmra.mxu3 %v2214_v3 }
 0x638   : > { %v1669_v16 = vpop.f32.mrf.mxu3  ;;  %v2167_v17 = vpop.f32.mrf.mxu2 }
 0x639   : > { %v1670_v2 = vadd.f32 %v5623_v35, %v1669_v16  ;;  %v2168_v59 = vadd.f32 %v5616_v36, %v2167_v17 }
 0x63b   : > { %v1706_v50 = vmax.f32 %v1670_v2, 0.0  ;;  %v2201_v49 = vmax.f32 %v2168_v59, 0.0 }
 0x640   : > { %v1671_v10 = vpop.f32.mrf.mxu3  ;;  %v2169_v7 = vpop.f32.mrf.mxu2 }
 0x641   : > { %v1672_v52 = vadd.f32 %v5623_v35, %v1671_v10  ;;  %v2170_v47 = vadd.f32 %v5616_v36, %v2169_v7 }
 0x643   : > { %v1707_v11 = vmax.f32 %v1672_v52, 0.0  ;;  %v2202_v22 = vmax.f32 %v2170_v47, 0.0 }
 0x645   : > { %v1721_v40 = vpack.c.bf16 %v1707_v11, %v1706_v50  ;;  %v2215_v21 = vpack.c.bf16 %v2202_v22, %v2201_v49 }
 0x647   : > { %1811 = vmatmul.bf16.gmra.mxu0 %v1721_v40  ;;  %2309 = vmatmul.bf16.gmra.mxu3 %v2215_v21 }
 0x648   : > { %v1674_v25 = vpop.f32.mrf.mxu3  ;;  %v2172_v32 = vpop.f32.mrf.mxu2 }
 0x649   : > { %v1675_v24 = vadd.f32 %v5623_v35, %v1674_v25  ;;  %v2173_v12 = vadd.f32 %v5616_v36, %v2172_v32 }
 0x64b   : > { %v1708_v44 = vmax.f32 %v1675_v24, 0.0  ;;  %v2203_v6 = vmax.f32 %v2173_v12, 0.0 }
 0x650   : > { %v1676_v26 = vpop.f32.mrf.mxu3  ;;  %v2174_v28 = vpop.f32.mrf.mxu2 }
 0x651   : > { %v1677_v31 = vadd.f32 %v5623_v35, %v1676_v26  ;;  %v2175_v18 = vadd.f32 %v5616_v36, %v2174_v28 }
 0x653   : > { %v1709_v61 = vmax.f32 %v1677_v31, 0.0  ;;  %v2204_v51 = vmax.f32 %v2175_v18, 0.0 }
 0x655   : > { %v1722_v30 = vpack.c.bf16 %v1709_v61, %v1708_v44  ;;  %v2216_v15 = vpack.c.bf16 %v2204_v51, %v2203_v6 }
 0x657   : > { %1816 = vmatmul.bf16.gmra.mxu0 %v1722_v30  ;;  %2314 = vmatmul.bf16.gmra.mxu3 %v2216_v15 }
 0x658   : > { %v1679_v39 = vpop.f32.mrf.mxu3  ;;  %v2177_v27 = vpop.f32.mrf.mxu2 }
 0x659   : > { %v1680_v42 = vadd.f32 %v5623_v35, %v1679_v39  ;;  %v2178_v33 = vadd.f32 %v5616_v36, %v2177_v27 }
 0x65b   : > { %v1710_v45 = vmax.f32 %v1680_v42, 0.0  ;;  %v2205_v1 = vmax.f32 %v2178_v33, 0.0 }
 0x660   : > { %v1681_v34 = vpop.f32.mrf.mxu3  ;;  %v2179_v38 = vpop.f32.mrf.mxu2 }
 0x661   : > { %v1682_v20 = vadd.f32 %v5623_v35, %v1681_v34  ;;  %v2180_v4 = vadd.f32 %v5616_v36, %v2179_v38 }
 0x663   : > { %v1711_v43 = vmax.f32 %v1682_v20, 0.0  ;;  %v2206_v5 = vmax.f32 %v2180_v4, 0.0 }
 0x665   : > { %v2217_v14 = vpack.c.bf16 %v2206_v5, %v2205_v1  ;;  %v1723_v46 = vpack.c.bf16 %v1711_v43, %v1710_v45 }
 0x667   : > { %1821 = vmatmul.bf16.gmra.mxu0 %v1723_v46  ;;  %2319 = vmatmul.bf16.gmra.mxu3 %v2217_v14 }
 0x668   : > { %v1684_v23 = vpop.f32.mrf.mxu3  ;;  %v2182_v37 = vpop.f32.mrf.mxu2 }
 0x669   : > { %v1685_v29 = vadd.f32 %v5623_v35, %v1684_v23  ;;  %v2183_v54 = vadd.f32 %v5616_v36, %v2182_v37 }
 0x66b   : > { %v1712_v8 = vmax.f32 %v1685_v29, 0.0  ;;  %v2207_v9 = vmax.f32 %v2183_v54, 0.0 }
 0x670   : > { %v1686_v53 = vpop.f32.mrf.mxu3  ;;  %v2184_v57 = vpop.f32.mrf.mxu2 }
 0x671   : > { %v1687_v62 = vadd.f32 %v5623_v35, %v1686_v53  ;;  %v2185_v48 = vadd.f32 %v5616_v36, %v2184_v57 }
 0x673   : > { %v1713_v58 = vmax.f32 %v1687_v62, 0.0  ;;  %v2208_v19 = vmax.f32 %v2185_v48, 0.0 }
 0x675   : > { %v2218_v13 = vpack.c.bf16 %v2208_v19, %v2207_v9  ;;  %v1724_v3 = vpack.c.bf16 %v1713_v58, %v1712_v8  ;;  %v4435_v9 = vld [vmem:[#allocation13 + $0xf8] sm:$0xff]  ;;  %v4434_v19 = vld [vmem:[#allocation13 + $0xf0] sm:$0xff] }
 0x676   : > { %2650 = vmatpush.bf16.msrb.mxu2 %v4435_v9 }
 0x677   : > { %1826 = vmatmul.bf16.gmra.mxu0 %v1724_v3  ;;  %2324 = vmatmul.bf16.gmra.mxu3 %v2218_v13  ;;  %v4433_v3 = vld [vmem:[#allocation13 + $0xe8] sm:$0xff] }
 0x678   : > { %v1689_v16 = vpop.f32.mrf.mxu3  ;;  %v2187_v17 = vpop.f32.mrf.mxu2 }
 0x679   : > { %v1690_v2 = vadd.f32 %v5623_v35, %v1689_v16  ;;  %v2188_v59 = vadd.f32 %v5616_v36, %v2187_v17  ;;  %v4432_v17 = vld [vmem:[#allocation13 + $0xe0] sm:$0xff] }
 0x67a   : > { %2651 = vmatpush.bf16.msrb.mxu2 %v4434_v19 }
 0x67b   : > { %v1714_v50 = vmax.f32 %v1690_v2, 0.0  ;;  %v2209_v49 = vmax.f32 %v2188_v59, 0.0  ;;  %v4431_v59 = vld [vmem:[#allocation13 + $0xd8] sm:$0xff] }
 0x67e   : > { %2652 = vmatpush.bf16.msrb.mxu2 %v4433_v3 }
 0x680   : > { %v1691_v10 = vpop.f32.mrf.mxu3  ;;  %v2189_v7 = vpop.f32.mrf.mxu2 }
 0x681   : > { %v1692_v52 = vadd.f32 %v5623_v35, %v1691_v10  ;;  %v2190_v47 = vadd.f32 %v5616_v36, %v2189_v7  ;;  %v4430_v7 = vld [vmem:[#allocation13 + $0xd0] sm:$0xff] }
 0x682   : > { %2653 = vmatpush.bf16.msrb.mxu2 %v4432_v17 }
 0x683   : > { %v1715_v11 = vmax.f32 %v1692_v52, 0.0  ;;  %v2210_v22 = vmax.f32 %v2190_v47, 0.0  ;;  %v4429_v47 = vld [vmem:[#allocation13 + $0xc8] sm:$0xff] }
 0x685   : > { %v2219_v40 = vpack.c.bf16 %v2210_v22, %v2209_v49  ;;  %v1725_v21 = vpack.c.bf16 %v1715_v11, %v1714_v50  ;;  %v4428_v49 = vld [vmem:[#allocation13 + $0xc0] sm:$0xff] }
 0x686   : > { %2654 = vmatpush.bf16.msrb.mxu2 %v4431_v59 }
 0x687   : > { %1831 = vmatmul.bf16.gmra.mxu0 %v1725_v21  ;;  %2329 = vmatmul.bf16.gmra.mxu3 %v2219_v40 }
 0x688   : > { %v1694_v25 = vpop.f32.mrf.mxu3  ;;  %v2192_v32 = vpop.f32.mrf.mxu2 }
 0x689   : > { %v1695_v24 = vadd.f32 %v5623_v35, %v1694_v25  ;;  %v2193_v12 = vadd.f32 %v5616_v36, %v2192_v32  ;;  %v5689_v25 = vld [vmem:[#allocation15 + $0x1] ss:$0 sm:$0xff] }
 0x68a   : > { %2655 = vmatpush.bf16.msrb.mxu2 %v4430_v7 }
 0x68b   : > { %v1716_v44 = vmax.f32 %v1695_v24, 0.0  ;;  %v2211_v6 = vmax.f32 %v2193_v12, 0.0 }
 0x68e   : > { %2656 = vmatpush.bf16.msrb.mxu2 %v4429_v47 }
 0x690   : > { %v1696_v26 = vpop.f32.mrf.mxu3  ;;  %v2194_v28 = vpop.f32.mrf.mxu2 }
 0x691   : > { %v1697_v31 = vadd.f32 %v5623_v35, %v1696_v26  ;;  %v2195_v18 = vadd.f32 %v5616_v36, %v2194_v28 }
 0x692   : > { %2657 = vmatpush.bf16.msrb.mxu2 %v4428_v49 }
 0x693   : > { %v1717_v61 = vmax.f32 %v1697_v31, 0.0  ;;  %v2212_v51 = vmax.f32 %v2195_v18, 0.0 }
 0x695   : > { %v2220_v30 = vpack.c.bf16 %v2212_v51, %v2211_v6  ;;  %v1726_v15 = vpack.c.bf16 %v1717_v61, %v1716_v44 }
 0x697   : > { %1836 = vmatmul.bf16.gmra.mxu0 %v1726_v15  ;;  %2334 = vmatmul.bf16.gmra.mxu3 %v2220_v30 }
 0x698   : > { %v1699_v39 = vpop.f32.mrf.mxu3 }
 0x699   : > { %v1700_v27 = vadd.f32 %v5623_v35, %v1699_v39  ;;  %v5720_v39 = vld [vmem:[%s5987_s7 + $0x5] ss:$0 sm:$0xff] }
 0x69b   : > { %v1718_v34 = vmax.f32 %v1700_v27, 0.0 }
 0x6a0   : > { %v1701_v42 = vpop.f32.mrf.mxu3 }
 0x6a1   : > { %v1702_v33 = vadd.f32 %v5623_v35, %v1701_v42 }
 0x6a3   : > { %v1719_v38 = vmax.f32 %v1702_v33, 0.0 }
 0x6a5   : > { %v1727_v20 = vpack.c.bf16 %v1719_v38, %v1718_v34 }
 0x6a7   : > { %1841 = vmatmul.bf16.gmra.mxu0 %v1727_v20 }
 0x6aa   : > { %v5655_v4 = vpop.f32.mrf.mxu3 }
 0x6b2   : > { %v5657_v36 = vpop.f32.mrf.mxu3 }
 0x6b4   : > { %v5659_v45 = vpop.f32.mrf.mxu0 }
 0x6ba   : > { %v5661_v1 = vpop.f32.mrf.mxu3 }
 0x6bc   : > { %v5663_v43 = vpop.f32.mrf.mxu0 }
 0x6c2   : > { %v5665_v5 = vpop.f32.mrf.mxu3 }
 0x6c4   : > { %v5667_v14 = vpop.f32.mrf.mxu0 }
 0x6ca   : > { %v5669_v46 = vpop.f32.mrf.mxu3 }
 0x6cc   : > { %v5671_v35 = vpop.f32.mrf.mxu0 }
 0x6d2   : > { %v5673_v23 = vpop.f32.mrf.mxu3 }
 0x6d4   : > { %v5675_v37 = vpop.f32.mrf.mxu0 }
 0x6da   : > { %v5677_v29 = vpop.f32.mrf.mxu3 }
 0x6dc   : > { %v5679_v54 = vpop.f32.mrf.mxu0 }
 0x6e2   : > { %v2317_v53 = vpop.f32.mrf.mxu3 }
 0x6e4   : > { %v5681_v57 = vpop.f32.mrf.mxu0 }
 0x6ea   : > { %v2320_v62 = vpop.f32.mrf.mxu3 }
 0x6eb   : > { %v5731_v38 = vadd.f32 %v5689_v25, %v2320_v62 }
 0x6ec   : > { %v5683_v48 = vpop.f32.mrf.mxu0 }
 0x6ed   : > { %v2348_v59 = vmax.f32 %v5731_v38, 0.0 }
 0x6f2   : > { %v2322_v8 = vpop.f32.mrf.mxu3 }
 0x6f3   : > { %v5723_v27 = vadd.f32 %v5689_v25, %v2322_v8  ;;  %v5737_v8 = vadd.f32 %v5689_v25, %v2317_v53 }
 0x6f4   : > { %v5685_v58 = vpop.f32.mrf.mxu0 }
 0x6f5   : > { %v2347_v47 = vmax.f32 %v5737_v8, 0.0 }
 0x6fa   : > { %v2325_v13 = vpop.f32.mrf.mxu3 }
 0x6fb   : > { %v5714_v30 = vadd.f32 %v5689_v25, %v2325_v13  ;;  %v2349_v13 = vmax.f32 %v5723_v27, 0.0 }
 0x6fc   : > { %v5687_v16 = vpop.f32.mrf.mxu0 }
 0x6fd   : > { %v2350_v20 = vmax.f32 %v5714_v30, 0.0  ;;  %v2360_v49 = vpack.c.bf16 %v2349_v13, %v2348_v59 }
 0x702   : > { %v2327_v2 = vpop.f32.mrf.mxu3 }
 0x703   : > { %v5706_v6 = vadd.f32 %v5689_v25, %v2327_v2  ;;  %v5747_v2 = vadd.f32 %v5689_v25, %v5677_v29 }
 0x704   : > { %v1832_v10 = vpop.f32.mrf.mxu0 }
 0x705   : > { %v2351_v42 = vmax.f32 %v5706_v6, 0.0 }
 0x707   : > { %v2361_v3 = vpack.c.bf16 %v2351_v42, %v2350_v20 }
 0x70a   : > { %v2330_v52 = vpop.f32.mrf.mxu3 }
 0x70b   : > { %v5701_v31 = vadd.f32 %v5689_v25, %v2330_v52  ;;  %v5753_v52 = vadd.f32 %v5689_v25, %v5673_v23  ;;  %v1833_v23 = vadd.f32 %v5720_v39, %v1832_v10  ;;  %v5780_v10 = vadd.f32 %v5689_v25, %v5661_v1 }
 0x70c   : > { %v1834_v50 = vpop.f32.mrf.mxu0 }
 0x70d   : > { %v2352_v15 = vmax.f32 %v5701_v31, 0.0  ;;  %v1835_v29 = vadd.f32 %v5720_v39, %v1834_v50  ;;  %v1830_v50 = vadd.f32 %v5720_v39, %v5687_v16  ;;  %v5787_v16 = vadd.f32 %v5689_v25, %v5657_v36 }
 0x70e   : > { %v1823_v36 = vadd.f32 %v5720_v39, %v5681_v57  ;;  %v1818_v57 = vadd.f32 %v5720_v39, %v5675_v37 }
 0x712   : > { %v2332_v11 = vpop.f32.mrf.mxu3 }
 0x713   : > { %v5695_v12 = vadd.f32 %v5689_v25, %v2332_v11 }
 0x714   : > { %v1837_v22 = vpop.f32.mrf.mxu0 }
 0x715   : > { %v2353_v61 = vmax.f32 %v5695_v12, 0.0  ;;  %v1838_v7 = vadd.f32 %v5720_v39, %v1837_v22  ;;  %v5763_v22 = vadd.f32 %v5689_v25, %v5669_v46 }
 0x717   : > { %v2362_v33 = vpack.c.bf16 %v2353_v61, %v2352_v15 }
 0x71a   : > { %v2335_v40 = vpop.f32.mrf.mxu3 }
 0x71b   : > { %v5692_v32 = vadd.f32 %v5689_v25, %v2335_v40  ;;  %v2346_v40 = vmax.f32 %v5747_v2, 0.0 }
 0x71c   : > { %v1839_v21 = vpop.f32.mrf.mxu0 }
 0x71d   : > { %v2354_v18 = vmax.f32 %v5692_v32, 0.0  ;;  %v1840_v62 = vadd.f32 %v5720_v39, %v1839_v21  ;;  %v1859_v21 = vmax.f32 %v1838_v7, 0.0  ;;  %v2359_v46 = vpack.c.bf16 %v2347_v47, %v2346_v40 }
 0x71e   : > { %v1820_v7 = vadd.f32 %v5720_v39, %v5679_v54 }
 0x71f   : > { %v1860_v11 = vmax.f32 %v1840_v62, 0.0  ;;  %v2342_v62 = vmax.f32 %v5780_v10, 0.0 }
 0x720   : > { %v1852_v54 = vmax.f32 %v1820_v7, 0.0 }
 0x722   : > { %v2337_v24 = vpop.f32.mrf.mxu3 }
 0x723   : > { %v5698_v26 = vadd.f32 %v5689_v25, %v2337_v24  ;;  %v5769_v24 = vadd.f32 %v5689_v25, %v5665_v5  ;;  %v1828_v5 = vadd.f32 %v5720_v39, %v5685_v58  ;;  %v5798_v58 = vadd.f32 %v5689_v25, %v5655_v4 }
 0x724   : > { %v1842_v28 = vpop.f32.mrf.mxu0 }
 0x725   : > { %v2355_v44 = vmax.f32 %v5698_v26, 0.0  ;;  %v1843_v9 = vadd.f32 %v5720_v39, %v1842_v28  ;;  %v2345_v28 = vmax.f32 %v5753_v52, 0.0  ;;  %v2340_v25 = vmax.f32 %v5798_v58, 0.0 }
 0x727   : > { %v2363_v51 = vpack.c.bf16 %v2355_v44, %v2354_v18  ;;  %v1861_v53 = vmax.f32 %v1843_v9, 0.0  ;;  %v2343_v9 = vmax.f32 %v5769_v24, 0.0 }
 0x729   : > { %2364 = vmatpush.bf16.msrb.mxu0 %v2363_v51  ;;  %v1858_v51 = vmax.f32 %v1835_v29, 0.0  ;;  %v2357_v4 = vpack.c.bf16 %v2343_v9, %v2342_v62  ;;  %v1815_v29 = vadd.f32 %v5720_v39, %v5671_v35  ;;  %v1808_v35 = vadd.f32 %v5720_v39, %v5659_v45  ;;  %v4426_v45 = vld [vmem:[#allocation13 + $0xb0] sm:$0xff] }
 0x72b   : > { %v1850_v37 = vmax.f32 %v1815_v29, 0.0 }
 0x72c   : > { %v1844_v34 = vpop.f32.mrf.mxu0 }
 0x72d   : > { %v1845_v19 = vadd.f32 %v5720_v39, %v1844_v34  ;;  %2365 = vmatpush.bf16.msrb.mxu0 %v2362_v33  ;;  %v2344_v33 = vmax.f32 %v5763_v22, 0.0  ;;  %v1857_v34 = vmax.f32 %v1833_v23, 0.0  ;;  %v1813_v23 = vadd.f32 %v5720_v39, %v5667_v14 }
 0x72e   : > { %v1847_v14 = vmax.f32 %v1808_v35, 0.0 }
 0x72f   : > { %v1862_v17 = vmax.f32 %v1845_v19, 0.0  ;;  %v1825_v19 = vadd.f32 %v5720_v39, %v5683_v48  ;;  %v2358_v1 = vpack.c.bf16 %v2345_v28, %v2344_v33  ;;  %v2341_v48 = vmax.f32 %v5787_v16, 0.0  ;;  %v4424_v16 = vld [vmem:[#allocation13 + $0xa0] sm:$0xff] }
 0x731   : > { %2366 = vmatpush.bf16.msrb.mxu0 %v2361_v3  ;;  %3075 = vmatpush.msra.mxu2 %v1862_v17  ;;  %v1856_v3 = vmax.f32 %v1830_v50, 0.0  ;;  %v1855_v17 = vmax.f32 %v1828_v5, 0.0  ;;  %v1810_v50 = vadd.f32 %v5720_v39, %v5663_v43  ;;  %v4427_v43 = vld [vmem:[#allocation13 + $0xb8] sm:$0xff]  ;;  %v4425_v39 = vld [vmem:[#allocation13 + $0xa8] sm:$0xff] }
 0x732   : > { %2507 = vmatpush.bf16.msrb.mxu1 %v4427_v43 }
 0x733   : > { %3076 = vmatpush.msra.mxu2 %v1861_v53  ;;  %v1854_v53 = vmax.f32 %v1825_v19, 0.0  ;;  %v1848_v5 = vmax.f32 %v1810_v50, 0.0  ;;  %v4423_v19 = vld [vmem:[#allocation13 + $0x98] sm:$0xff] }
 0x735   : > { %2367 = vmatpush.bf16.msrb.mxu0 %v2360_v49  ;;  %3077 = vmatpush.msra.mxu2 %v1860_v11  ;;  %v1853_v49 = vmax.f32 %v1823_v36, 0.0  ;;  %v2356_v11 = vpack.c.bf16 %v2341_v48, %v2340_v25 }
 0x736   : > { %2508 = vmatpush.bf16.msrb.mxu1 %v4426_v45 }
 0x737   : > { %3078 = vmatpush.msra.mxu2 %v1859_v21  ;;  %v1851_v21 = vmax.f32 %v1818_v57, 0.0 }
 0x739   : > { %2368 = vmatpush.bf16.msrb.mxu0 %v2359_v46  ;;  %3079 = vmatpush.msra.mxu2 %v1858_v51  ;;  %v5820_v51 = vld [vmem:[%s5277_s29] sm:$0xff]  ;;  %v1849_v46 = vmax.f32 %v1813_v23, 0.0 }
 0x73a   : > { %2509 = vmatpush.bf16.msrb.mxu1 %v4425_v39 }
 0x73b   : > { %3080 = vmatpush.msra.mxu2 %v1857_v34  ;;  %v5826_v34 = vld [vmem:[%s5277_s29 + $0x8] sm:$0xff] }
 0x73d   : > { %2369 = vmatpush.bf16.msrb.mxu0 %v2358_v1  ;;  %3081 = vmatpush.msra.mxu2 %v1856_v3  ;;  %v4422_v3 = vld [vmem:[#allocation13 + $0x90] sm:$0xff]  ;;  %v4421_v1 = vld [vmem:[#allocation13 + $0x88] sm:$0xff] }
 0x73e   : > { %2510 = vmatpush.bf16.msrb.mxu1 %v4424_v16 }
 0x73f   : > { %3082 = vmatpush.msra.mxu2 %v1855_v17 }
 0x741   : > { %2370 = vmatpush.bf16.msrb.mxu0 %v2357_v4  ;;  %3083 = vmatpush.msra.mxu2 %v1854_v53 }
 0x742   : > { %2511 = vmatpush.bf16.msrb.mxu1 %v4423_v19 }
 0x743   : > { %3084 = vmatpush.msra.mxu2 %v1853_v49 }
 0x745   : > { %2371 = vmatpush.bf16.msrb.mxu0 %v2356_v11  ;;  %3085 = vmatpush.msra.mxu2 %v1852_v54 }
 0x746   : > { %2512 = vmatpush.bf16.msrb.mxu1 %v4422_v3 }
 0x747   : > { %3086 = vmatpush.msra.mxu2 %v1851_v21 }
 0x748   : > { %2372 = vmatmul.bf16.vlgmr.msrb.gmra.mxu0 %v5820_v51 }
 0x749   : > { %3087 = vmatpush.msra.mxu2 %v1850_v37  ;;  %v4611_v37 = vld [vmem:[#allocation15 + $0x2] ss:$0 sm:$0xff] }
 0x74a   : > { %2513 = vmatpush.bf16.msrb.mxu1 %v4421_v1 }
 0x74b   : > { %3088 = vmatpush.msra.mxu2 %v1849_v46 }
 0x74d   : > { %3089 = vmatpush.msra.mxu2 %v1848_v5 }
 0x74f   : > { %3090 = vmatpush.msra.mxu2 %v1847_v14 }
 0x758   : > { %2377 = vmatmul.bf16.gmra.mxu0 %v5826_v34 }
 0x768   : > { %2382 = vmatmul.bf16.gmra.mxu0 %v5501_v0  ;;  %v4420_v0 = vld [vmem:[#allocation13 + $0x80] sm:$0xff] }
 0x769   : > { %2514 = vmatpush.bf16.msrb.mxu1 %v4420_v0 }
 0x778   : > { %2387 = vmatmul.bf16.gmra.mxu0 %v5545_v55 }
 0x788   : > { %2392 = vmatmul.bf16.gmra.mxu0 %v5554_v60 }
 0x798   : > { %2397 = vmatmul.bf16.gmra.mxu0 %v5559_v63 }
 0x7a8   : > { %2402 = vmatmul.bf16.gmra.mxu0 %v5564_v56 }
 0x7b8   : > { %2407 = vmatmul.bf16.gmra.mxu0 %v5569_v41 }
 0x7c5   : > { %v2373_v55 = vpop.f32.mrf.mxu0 }
 0x7c6   : > { %v2413_v58 = vadd.f32 %v2373_v55, %v2340_v25 }
 0x7cd   : > { %v2375_v60 = vpop.f32.mrf.mxu0 }
 0x7ce   : > { %v2414_v63 = vadd.f32 %v2375_v60, %v2341_v48 }
 0x7d0   : > { %v2429_v36 = vpack.c.bf16 %v2414_v63, %v2413_v58 }
 0x7d2   : > { %2515 = vmatmul.bf16.vlgmr.msrb.gmra.mxu1 %v2429_v36 }
 0x7d5   : > { %v2378_v17 = vpop.f32.mrf.mxu0 }
 0x7d6   : > { %v2415_v53 = vadd.f32 %v2378_v17, %v2342_v62 }
 0x7dd   : > { %v2380_v7 = vpop.f32.mrf.mxu0 }
 0x7de   : > { %v2416_v4 = vadd.f32 %v2380_v7, %v2343_v9 }
 0x7e0   : > { %v2430_v56 = vpack.c.bf16 %v2416_v4, %v2415_v53 }
 0x7e2   : > { %2520 = vmatmul.bf16.gmra.mxu1 %v2430_v56 }
 0x7e5   : > { %v2383_v57 = vpop.f32.mrf.mxu0 }
 0x7e6   : > { %v2417_v41 = vadd.f32 %v2383_v57, %v2344_v33 }
 0x7ed   : > { %v2385_v49 = vpop.f32.mrf.mxu0 }
 0x7ee   : > { %v2418_v48 = vadd.f32 %v2385_v49, %v2345_v28 }
 0x7f0   : > { %v2431_v25 = vpack.c.bf16 %v2418_v48, %v2417_v41 }
 0x7f2   : > { %2525 = vmatmul.bf16.gmra.mxu1 %v2431_v25 }
 0x7f5   : > { %v2388_v29 = vpop.f32.mrf.mxu0 }
 0x7f6   : > { %v2419_v10 = vadd.f32 %v2388_v29, %v2346_v40 }
 0x7fd   : > { %v2390_v54 = vpop.f32.mrf.mxu0 }
 0x7fe   : > { %v2420_v24 = vadd.f32 %v2390_v54, %v2347_v47 }
 0x800   : > { %v2432_v9 = vpack.c.bf16 %v2420_v24, %v2419_v10 }
 0x802   : > { %2530 = vmatmul.bf16.gmra.mxu1 %v2432_v9 }
 0x805   : > { %v2393_v62 = vpop.f32.mrf.mxu0 }
 0x806   : > { %v2421_v22 = vadd.f32 %v2393_v62, %v2348_v59 }
 0x80d   : > { %v2395_v11 = vpop.f32.mrf.mxu0 }
 0x80e   : > { %v2422_v52 = vadd.f32 %v2395_v11, %v2349_v13 }
 0x810   : > { %v2433_v28 = vpack.c.bf16 %v2422_v52, %v2421_v22 }
 0x812   : > { %2535 = vmatmul.bf16.gmra.mxu1 %v2433_v28 }
 0x815   : > { %v2398_v33 = vpop.f32.mrf.mxu0 }
 0x816   : > { %v2423_v2 = vadd.f32 %v2398_v33, %v2350_v20 }
 0x81d   : > { %v2400_v23 = vpop.f32.mrf.mxu0 }
 0x81e   : > { %v2424_v8 = vadd.f32 %v2400_v23, %v2351_v42 }
 0x820   : > { %v2434_v47 = vpack.c.bf16 %v2424_v8, %v2423_v2 }
 0x822   : > { %2540 = vmatmul.bf16.gmra.mxu1 %v2434_v47 }
 0x825   : > { %v2403_v40 = vpop.f32.mrf.mxu0 }
 0x826   : > { %v2425_v38 = vadd.f32 %v2403_v40, %v2352_v15 }
 0x82d   : > { %v2405_v21 = vpop.f32.mrf.mxu0 }
 0x82e   : > { %v2426_v27 = vadd.f32 %v2405_v21, %v2353_v61 }
 0x830   : > { %v2435_v13 = vpack.c.bf16 %v2426_v27, %v2425_v38 }
 0x832   : > { %2545 = vmatmul.bf16.gmra.mxu1 %v2435_v13 }
 0x835   : > { %v2408_v59 = vpop.f32.mrf.mxu0 }
 0x836   : > { %v2427_v30 = vadd.f32 %v2408_v59, %v2354_v18 }
 0x83d   : > { %v2410_v50 = vpop.f32.mrf.mxu0 }
 0x83e   : > { %v2428_v6 = vadd.f32 %v2410_v50, %v2355_v44 }
 0x840   : > { %v2436_v42 = vpack.c.bf16 %v2428_v6, %v2427_v30 }
 0x842   : > { %2550 = vmatmul.bf16.gmra.mxu1 %v2436_v42 }
 0x84f   : > { %v2516_v20 = vpop.f32.mrf.mxu1 }
 0x850   : > { %v2517_v35 = vadd.f32 %v4611_v37, %v2516_v20 }
 0x852   : > { %v2556_v46 = vmax.f32 %v2517_v35, 0.0 }
 0x857   : > { %v2518_v31 = vpop.f32.mrf.mxu1 }
 0x858   : > { %v2519_v15 = vadd.f32 %v4611_v37, %v2518_v31 }
 0x85a   : > { %v2557_v12 = vmax.f32 %v2519_v15, 0.0 }
 0x85c   : > { %v2572_v61 = vpack.c.bf16 %v2557_v12, %v2556_v46 }
 0x85e   : > { %2658 = vmatmul.bf16.vlgmr.msrb.gmra.mxu2 %v2572_v61 }
 0x85f   : > { %v2521_v5 = vpop.f32.mrf.mxu1 }
 0x860   : > { %v2522_v14 = vadd.f32 %v4611_v37, %v2521_v5 }
 0x862   : > { %v2558_v32 = vmax.f32 %v2522_v14, 0.0 }
 0x867   : > { %v2523_v43 = vpop.f32.mrf.mxu1 }
 0x868   : > { %v2524_v45 = vadd.f32 %v4611_v37, %v2523_v43 }
 0x86a   : > { %v2559_v18 = vmax.f32 %v2524_v45, 0.0 }
 0x86c   : > { %v2573_v39 = vpack.c.bf16 %v2559_v18, %v2558_v32 }
 0x86e   : > { %2663 = vmatmul.bf16.gmra.mxu2 %v2573_v39 }
 0x86f   : > { %v2526_v26 = vpop.f32.mrf.mxu1 }
 0x870   : > { %v2527_v44 = vadd.f32 %v4611_v37, %v2526_v26 }
 0x872   : > { %v2560_v3 = vmax.f32 %v2527_v44, 0.0 }
 0x877   : > { %v2528_v16 = vpop.f32.mrf.mxu1 }
 0x878   : > { %v2529_v19 = vadd.f32 %v4611_v37, %v2528_v16 }
 0x87a   : > { %v2561_v1 = vmax.f32 %v2529_v19, 0.0 }
 0x87c   : > { %v2574_v0 = vpack.c.bf16 %v2561_v1, %v2560_v3 }
 0x87e   : > { %2668 = vmatmul.bf16.gmra.mxu2 %v2574_v0 }
 0x87f   : > { %v2531_v55 = vpop.f32.mrf.mxu1 }
 0x880   : > { %v2532_v60 = vadd.f32 %v4611_v37, %v2531_v55 }
 0x882   : > { %v2562_v36 = vmax.f32 %v2532_v60, 0.0 }
 0x887   : > { %v2533_v58 = vpop.f32.mrf.mxu1 }
 0x888   : > { %v2534_v63 = vadd.f32 %v4611_v37, %v2533_v58 }
 0x88a   : > { %v2563_v17 = vmax.f32 %v2534_v63, 0.0 }
 0x88c   : > { %v2575_v7 = vpack.c.bf16 %v2563_v17, %v2562_v36 }
 0x88e   : > { %2673 = vmatmul.bf16.gmra.mxu2 %v2575_v7 }
 0x88f   : > { %v2536_v53 = vpop.f32.mrf.mxu1 }
 0x890   : > { %v2537_v4 = vadd.f32 %v4611_v37, %v2536_v53 }
 0x892   : > { %v2564_v49 = vmax.f32 %v2537_v4, 0.0 }
 0x897   : > { %v2538_v56 = vpop.f32.mrf.mxu1 }
 0x898   : > { %v2539_v57 = vadd.f32 %v4611_v37, %v2538_v56 }
 0x89a   : > { %v2565_v41 = vmax.f32 %v2539_v57, 0.0 }
 0x89c   : > { %v2576_v48 = vpack.c.bf16 %v2565_v41, %v2564_v49 }
 0x89e   : > { %2678 = vmatmul.bf16.gmra.mxu2 %v2576_v48 }
 0x89f   : > { %v2541_v25 = vpop.f32.mrf.mxu1 }
 0x8a0   : > { %v2542_v29 = vadd.f32 %v4611_v37, %v2541_v25 }
 0x8a2   : > { %v2566_v24 = vmax.f32 %v2542_v29, 0.0 }
 0x8a7   : > { %v2543_v54 = vpop.f32.mrf.mxu1 }
 0x8a8   : > { %v2544_v10 = vadd.f32 %v4611_v37, %v2543_v54 }
 0x8aa   : > { %v2567_v9 = vmax.f32 %v2544_v10, 0.0 }
 0x8ac   : > { %v2577_v62 = vpack.c.bf16 %v2567_v9, %v2566_v24 }
 0x8ae   : > { %2683 = vmatmul.bf16.gmra.mxu2 %v2577_v62 }
 0x8af   : > { %v2546_v11 = vpop.f32.mrf.mxu1 }
 0x8b0   : > { %v2547_v22 = vadd.f32 %v4611_v37, %v2546_v11 }
 0x8b2   : > { %v2568_v33 = vmax.f32 %v2547_v22, 0.0 }
 0x8b7   : > { %v2548_v52 = vpop.f32.mrf.mxu1 }
 0x8b8   : > { %v2549_v28 = vadd.f32 %v4611_v37, %v2548_v52 }
 0x8ba   : > { %v2569_v23 = vmax.f32 %v2549_v28, 0.0 }
 0x8bc   : > { %v2578_v2 = vpack.c.bf16 %v2569_v23, %v2568_v33 }
 0x8be   : > { %2688 = vmatmul.bf16.gmra.mxu2 %v2578_v2 }
 0x8bf   : > { %v2551_v8 = vpop.f32.mrf.mxu1 }
 0x8c0   : > { %v2552_v47 = vadd.f32 %v4611_v37, %v2551_v8 }
 0x8c2   : > { %v2570_v38 = vmax.f32 %v2552_v47, 0.0 }
 0x8c7   : > { %v2553_v40 = vpop.f32.mrf.mxu1 }
 0x8c8   : > { %v2554_v21 = vadd.f32 %v4611_v37, %v2553_v40  ;;  %v4612_v37 = vld [vmem:[#allocation15 + $0x3] ss:$0 sm:$0xff] }
 0x8c9   : > { %v4621_v40 = vld [vmem:[%s5277_s29 + $0x10] sm:$0xff] }
 0x8ca   : > { %v2571_v27 = vmax.f32 %v2554_v21, 0.0  ;;  %v4622_v21 = vld [vmem:[%s5277_s29 + $0x18] sm:$0xff] }
 0x8cc   : > { %v2579_v13 = vpack.c.bf16 %v2571_v27, %v2570_v38  ;;  %v4623_v38 = vld [vmem:[%s5277_s29 + $0x20] sm:$0xff]  ;;  %v4443_v27 = vld [vmem:[#allocation13 + $0x138] sm:$0xff] }
 0x8cd   : > { %2866 = vmatpush.bf16.msra.mxu0 %v4443_v27 }
 0x8ce   : > { %2693 = vmatmul.bf16.gmra.mxu2 %v2579_v13  ;;  %v4624_v13 = vld [vmem:[%s5277_s29 + $0x28] sm:$0xff] }
 0x8e1   : > { %v2659_v59 = vpop.f32.mrf.mxu2 }
 0x8e2   : > { %v2660_v28 = vadd.f32 %v4612_v37, %v2659_v59  ;;  %v4442_v59 = vld [vmem:[#allocation13 + $0x130] sm:$0xff] }
 0x8e3   : > { %2867 = vmatpush.bf16.msra.mxu0 %v4442_v59 }
 0x8e4   : > { %v2699_v8 = vmax.f32 %v2660_v28, 0.0 }
 0x8e9   : > { %v2661_v50 = vpop.f32.mrf.mxu2 }
 0x8ea   : > { %v2662_v11 = vadd.f32 %v4612_v37, %v2661_v50  ;;  %v4441_v50 = vld [vmem:[#allocation13 + $0x128] sm:$0xff] }
 0x8eb   : > { %2868 = vmatpush.bf16.msra.mxu0 %v4441_v50 }
 0x8ec   : > { %v2700_v23 = vmax.f32 %v2662_v11, 0.0 }
 0x8ee   : > { %v2715_v47 = vpack.c.bf16 %v2700_v23, %v2699_v8 }
 0x8f1   : > { %v2664_v30 = vpop.f32.mrf.mxu2 }
 0x8f2   : > { %v2665_v9 = vadd.f32 %v4612_v37, %v2664_v30  ;;  %v4440_v30 = vld [vmem:[#allocation13 + $0x120] sm:$0xff] }
 0x8f3   : > { %2869 = vmatpush.bf16.msra.mxu0 %v4440_v30 }
 0x8f4   : > { %v2701_v33 = vmax.f32 %v2665_v9, 0.0 }
 0x8f9   : > { %v2666_v6 = vpop.f32.mrf.mxu2 }
 0x8fa   : > { %v2667_v54 = vadd.f32 %v4612_v37, %v2666_v6  ;;  %v4438_v6 = vld [vmem:[#allocation13 + $0x110] sm:$0xff] }
 0x8fc   : > { %v2702_v22 = vmax.f32 %v2667_v54, 0.0 }
 0x8fe   : > { %v2716_v2 = vpack.c.bf16 %v2702_v22, %v2701_v33 }
 0x901   : > { %v2669_v42 = vpop.f32.mrf.mxu2 }
 0x902   : > { %v5910_v25 = vadd.f32 %v4612_v37, %v2669_v42  ;;  %v4437_v42 = vld [vmem:[#allocation13 + $0x108] sm:$0xff] }
 0x904   : > { %v2703_v62 = vmax.f32 %v5910_v25, 0.0 }
 0x909   : > { %v2671_v20 = vpop.f32.mrf.mxu2 }
 0x90a   : > { %v5903_v49 = vadd.f32 %v4612_v37, %v2671_v20  ;;  %v4436_v20 = vld [vmem:[#allocation13 + $0x100] sm:$0xff] }
 0x90c   : > { %v2704_v10 = vmax.f32 %v5903_v49, 0.0 }
 0x90e   : > { %v2717_v52 = vpack.c.bf16 %v2704_v10, %v2703_v62 }
 0x911   : > { %v2674_v35 = vpop.f32.mrf.mxu2 }
 0x912   : > { %v5900_v56 = vadd.f32 %v4612_v37, %v2674_v35  ;;  %v4626_v35 = vld [vmem:[%s5277_s29 + $0x38] sm:$0xff] }
 0x914   : > { %v2705_v29 = vmax.f32 %v5900_v56, 0.0 }
 0x919   : > { %v2676_v31 = vpop.f32.mrf.mxu2 }
 0x91a   : > { %v5893_v7 = vadd.f32 %v4612_v37, %v2676_v31 }
 0x91c   : > { %v2706_v41 = vmax.f32 %v5893_v7, 0.0 }
 0x91e   : > { %v2718_v24 = vpack.c.bf16 %v2706_v41, %v2705_v29 }
 0x921   : > { %v2679_v15 = vpop.f32.mrf.mxu2 }
 0x922   : > { %v5890_v36 = vadd.f32 %v4612_v37, %v2679_v15 }
 0x924   : > { %v2707_v57 = vmax.f32 %v5890_v36, 0.0  ;;  %v4449_v36 = vld [vmem:[#allocation13 + $0x168] sm:$0xff] }
 0x929   : > { %v2681_v46 = vpop.f32.mrf.mxu2 }
 0x92a   : > { %v5883_v60 = vadd.f32 %v4612_v37, %v2681_v46 }
 0x92c   : > { %v2708_v53 = vmax.f32 %v5883_v60, 0.0  ;;  %v4448_v60 = vld [vmem:[#allocation13 + $0x160] sm:$0xff] }
 0x92e   : > { %v2719_v48 = vpack.c.bf16 %v2708_v53, %v2707_v57 }
 0x931   : > { %v2684_v12 = vpop.f32.mrf.mxu2 }
 0x932   : > { %v5880_v0 = vadd.f32 %v4612_v37, %v2684_v12 }
 0x934   : > { %v2709_v17 = vmax.f32 %v5880_v0, 0.0 }
 0x939   : > { %v2686_v61 = vpop.f32.mrf.mxu2 }
 0x93a   : > { %v5873_v19 = vadd.f32 %v4612_v37, %v2686_v61 }
 0x93c   : > { %v2710_v58 = vmax.f32 %v5873_v19, 0.0 }
 0x93e   : > { %v2720_v4 = vpack.c.bf16 %v2710_v58, %v2709_v17 }
 0x941   : > { %v2689_v5 = vpop.f32.mrf.mxu2 }
 0x942   : > { %v5869_v26 = vadd.f32 %v4612_v37, %v2689_v5 }
 0x944   : > { %v2711_v55 = vmax.f32 %v5869_v26, 0.0 }
 0x949   : > { %v2691_v14 = vpop.f32.mrf.mxu2 }
 0x94a   : > { %v5865_v18 = vadd.f32 %v4612_v37, %v2691_v14 }
 0x94c   : > { %v2712_v3 = vmax.f32 %v5865_v18, 0.0 }
 0x94e   : > { %v2721_v63 = vpack.c.bf16 %v2712_v3, %v2711_v55 }
 0x951   : > { %v2694_v43 = vpop.f32.mrf.mxu2 }
 0x952   : > { %v5863_v45 = vadd.f32 %v4612_v37, %v2694_v43 }
 0x954   : > { %v2713_v44 = vmax.f32 %v5863_v45, 0.0 }
 0x959   : > { %v2696_v32 = vpop.f32.mrf.mxu2 }
 0x95a   : > { %v5867_v39 = vadd.f32 %v4612_v37, %v2696_v32 }
 0x95c   : > { %v2714_v16 = vmax.f32 %v5867_v39, 0.0 }
 0x95e   : > { %v2722_v1 = vpack.c.bf16 %v2714_v16, %v2713_v44 }
 0x960   : > { %2723 = vmatpush.bf16.msrb.mxu3 %v2722_v1 }
 0x964   : > { %2724 = vmatpush.bf16.msrb.mxu3 %v2721_v63 }
 0x968   : > { %2725 = vmatpush.bf16.msrb.mxu3 %v2720_v4 }
 0x96c   : > { %2726 = vmatpush.bf16.msrb.mxu3 %v2719_v48 }
 0x970   : > { %2727 = vmatpush.bf16.msrb.mxu3 %v2718_v24 }
 0x974   : > { %2728 = vmatpush.bf16.msrb.mxu3 %v2717_v52 }
 0x978   : > { %2729 = vmatpush.bf16.msrb.mxu3 %v2716_v2  ;;  %v4451_v2 = vld [vmem:[#allocation13 + $0x178] sm:$0xff] }
 0x979   : > { %3009 = vmatpush.bf16.msra.mxu1 %v4451_v2 }
 0x97c   : > { %2730 = vmatpush.bf16.msrb.mxu3 %v2715_v47 }
 0x97f   : > { %2731 = vmatmul.bf16.vlgmr.msrb.gmra.mxu3 %v5820_v51  ;;  %v4439_v51 = vld [vmem:[#allocation13 + $0x118] sm:$0xff] }
 0x980   : > { %2870 = vmatpush.bf16.msra.mxu0 %v4439_v51 }
 0x984   : > { %2871 = vmatpush.bf16.msra.mxu0 %v4438_v6 }
 0x988   : > { %2872 = vmatpush.bf16.msra.mxu0 %v4437_v42 }
 0x98c   : > { %2873 = vmatpush.bf16.msra.mxu0 %v4436_v20 }
 0x98f   : > { %2736 = vmatmul.bf16.gmra.mxu3 %v5826_v34  ;;  %v4625_v34 = vld [vmem:[%s5277_s29 + $0x30] sm:$0xff] }
 0x99f   : > { %2741 = vmatmul.bf16.gmra.mxu3 %v4621_v40  ;;  %v4445_v40 = vld [vmem:[#allocation13 + $0x148] sm:$0xff] }
 0x9af   : > { %2746 = vmatmul.bf16.gmra.mxu3 %v4622_v21  ;;  %v4444_v21 = vld [vmem:[#allocation13 + $0x140] sm:$0xff] }
 0x9bf   : > { %2751 = vmatmul.bf16.gmra.mxu3 %v4623_v38 }
 0x9cf   : > { %2756 = vmatmul.bf16.gmra.mxu3 %v4624_v13 }
 0x9df   : > { %2761 = vmatmul.bf16.gmra.mxu3 %v4625_v34 }
 0x9ef   : > { %2766 = vmatmul.bf16.gmra.mxu3 %v4626_v35 }
 0xa02   : > { %v2732_v31 = vpop.f32.mrf.mxu3 }
 0xa03   : > { %v2772_v46 = vadd.f32 %v2732_v31, %v2699_v8  ;;  %v4447_v8 = vld [vmem:[#allocation13 + $0x158] sm:$0xff] }
 0xa0a   : > { %v2734_v15 = vpop.f32.mrf.mxu3 }
 0xa0b   : > { %v2773_v12 = vadd.f32 %v2734_v15, %v2700_v23 }
 0xa0d   : > { %v2788_v61 = vpack.c.bf16 %v2773_v12, %v2772_v46 }
 0xa0f   : > { %2874 = vmatmul.bf16.vlgmr.msra.gmra.mxu0 %v2788_v61 }
 0xa12   : > { %v2737_v5 = vpop.f32.mrf.mxu3 }
 0xa13   : > { %v2774_v43 = vadd.f32 %v2737_v5, %v2701_v33 }
 0xa1a   : > { %v2739_v14 = vpop.f32.mrf.mxu3 }
 0xa1b   : > { %v2775_v37 = vadd.f32 %v2739_v14, %v2702_v22 }
 0xa1d   : > { %v2789_v32 = vpack.c.bf16 %v2775_v37, %v2774_v43 }
 0xa1f   : > { %2879 = vmatmul.bf16.gmra.mxu0 %v2789_v32 }
 0xa22   : > { %v2742_v1 = vpop.f32.mrf.mxu3 }
 0xa23   : > { %v2776_v4 = vadd.f32 %v2742_v1, %v2703_v62 }
 0xa2a   : > { %v2744_v63 = vpop.f32.mrf.mxu3 }
 0xa2b   : > { %v2777_v49 = vadd.f32 %v2744_v63, %v2704_v10 }
 0xa2d   : > { %v2790_v48 = vpack.c.bf16 %v2777_v49, %v2776_v4 }
 0xa2f   : > { %2884 = vmatmul.bf16.gmra.mxu0 %v2790_v48 }
 0xa32   : > { %v2747_v25 = vpop.f32.mrf.mxu3 }
 0xa33   : > { %v2778_v24 = vadd.f32 %v2747_v25, %v2705_v29  ;;  %v4450_v29 = vld [vmem:[#allocation13 + $0x170] sm:$0xff] }
 0xa34   : > { %3010 = vmatpush.bf16.msra.mxu1 %v4450_v29 }
 0xa38   : > { %3011 = vmatpush.bf16.msra.mxu1 %v4449_v36 }
 0xa3a   : > { %v2749_v54 = vpop.f32.mrf.mxu3 }
 0xa3b   : > { %v2779_v9 = vadd.f32 %v2749_v54, %v2706_v41 }
 0xa3c   : > { %3012 = vmatpush.bf16.msra.mxu1 %v4448_v60 }
 0xa3d   : > { %v2791_v11 = vpack.c.bf16 %v2779_v9, %v2778_v24 }
 0xa3f   : > { %2889 = vmatmul.bf16.gmra.mxu0 %v2791_v11 }
 0xa40   : > { %3013 = vmatpush.bf16.msra.mxu1 %v4447_v8 }
 0xa42   : > { %v2752_v52 = vpop.f32.mrf.mxu3 }
 0xa43   : > { %v2780_v28 = vadd.f32 %v2752_v52, %v2707_v57 }
 0xa4a   : > { %v2754_v22 = vpop.f32.mrf.mxu3 }
 0xa4b   : > { %v2781_v10 = vadd.f32 %v2754_v22, %v2708_v53 }
 0xa4d   : > { %v2792_v62 = vpack.c.bf16 %v2781_v10, %v2780_v28 }
 0xa4f   : > { %2894 = vmatmul.bf16.gmra.mxu0 %v2792_v62 }
 0xa52   : > { %v2757_v33 = vpop.f32.mrf.mxu3 }
 0xa53   : > { %v2782_v56 = vadd.f32 %v2757_v33, %v2709_v17 }
 0xa5a   : > { %v2759_v23 = vpop.f32.mrf.mxu3 }
 0xa5b   : > { %v2783_v7 = vadd.f32 %v2759_v23, %v2710_v58  ;;  %v4446_v58 = vld [vmem:[#allocation13 + $0x150] sm:$0xff] }
 0xa5c   : > { %3014 = vmatpush.bf16.msra.mxu1 %v4446_v58 }
 0xa5d   : > { %v2793_v41 = vpack.c.bf16 %v2783_v7, %v2782_v56 }
 0xa5f   : > { %2899 = vmatmul.bf16.gmra.mxu0 %v2793_v41 }
 0xa60   : > { %3015 = vmatpush.bf16.msra.mxu1 %v4445_v40 }
 0xa62   : > { %v2762_v57 = vpop.f32.mrf.mxu3 }
 0xa63   : > { %v2784_v47 = vadd.f32 %v2762_v57, %v2711_v55 }
 0xa64   : > { %3016 = vmatpush.bf16.msra.mxu1 %v4444_v21 }
 0xa6a   : > { %v2764_v53 = vpop.f32.mrf.mxu3 }
 0xa6b   : > { %v2785_v0 = vadd.f32 %v2764_v53, %v2712_v3  ;;  %v4613_v3 = vld [vmem:[#allocation15 + $0x4] ss:$0 sm:$0xff] }
 0xa6d   : > { %v2794_v19 = vpack.c.bf16 %v2785_v0, %v2784_v47 }
 0xa6f   : > { %2904 = vmatmul.bf16.gmra.mxu0 %v2794_v19 }
 0xa72   : > { %v2767_v17 = vpop.f32.mrf.mxu3 }
 0xa73   : > { %v2786_v27 = vadd.f32 %v2767_v17, %v2713_v44 }
 0xa7a   : > { %v2769_v38 = vpop.f32.mrf.mxu3 }
 0xa7b   : > { %v2787_v26 = vadd.f32 %v2769_v38, %v2714_v16 }
 0xa7d   : > { %v2795_v55 = vpack.c.bf16 %v2787_v26, %v2786_v27 }
 0xa7f   : > { %2909 = vmatmul.bf16.gmra.mxu0 %v2795_v55 }
 0xa8c   : > { %v2875_v18 = vpop.f32.mrf.mxu0 }
 0xa8d   : > { %v2876_v13 = vadd.f32 %v4613_v3, %v2875_v18 }
 0xa8f   : > { %v2915_v30 = vmax.f32 %v2876_v13, 0.0 }
 0xa94   : > { %v2877_v59 = vpop.f32.mrf.mxu0 }
 0xa95   : > { %v2878_v50 = vadd.f32 %v4613_v3, %v2877_v59 }
 0xa97   : > { %v2916_v51 = vmax.f32 %v2878_v50, 0.0 }
 0xa99   : > { %v2931_v34 = vpack.c.bf16 %v2916_v51, %v2915_v30 }
 0xa9b   : > { %3017 = vmatmul.bf16.vlgmr.msra.gmra.mxu1 %v2931_v34 }
 0xa9c   : > { %v2880_v6 = vpop.f32.mrf.mxu0 }
 0xa9d   : > { %v2881_v42 = vadd.f32 %v4613_v3, %v2880_v6  ;;  %v3074_v6 = vld [vmem:[#allocation9] sm:$0xff] }
 0xa9e   : > { %3091 = vmatmul.f32.vlgmr.msra.gmra.mxu2 %v3074_v6 }
 0xa9f   : > { %v2917_v45 = vmax.f32 %v2881_v42, 0.0  ;;  %v4614_v42 = vld [vmem:[#allocation15 + $0x5] ss:$0 sm:$0xff] }
 0xaa4   : > { %v2882_v20 = vpop.f32.mrf.mxu0 }
 0xaa5   : > { %v2883_v35 = vadd.f32 %v4613_v3, %v2882_v20 }
 0xaa7   : > { %v2918_v44 = vmax.f32 %v2883_v35, 0.0 }
 0xaa9   : > { %v2932_v31 = vpack.c.bf16 %v2918_v44, %v2917_v45 }
 0xaab   : > { %3022 = vmatmul.bf16.gmra.mxu1 %v2932_v31 }
 0xaac   : > { %v2885_v39 = vpop.f32.mrf.mxu0 }
 0xaad   : > { %v2886_v16 = vadd.f32 %v4613_v3, %v2885_v39  ;;  %v4467_v39 = vld [vmem:[#allocation16 + $0x78] sm:$0xff] }
 0xaae   : > { %3199 = vmatpush.bf16.msrb.mxu2 %v4467_v39  ;;  %v4478_v39 = vld [vmem:[#allocation16 + $0xd0] sm:$0xff] }
 0xaaf   : > { %v2919_v12 = vmax.f32 %v2886_v16, 0.0 }
 0xab4   : > { %v2887_v15 = vpop.f32.mrf.mxu0 }
 0xab5   : > { %v2888_v46 = vadd.f32 %v4613_v3, %v2887_v15 }
 0xab7   : > { %v2920_v61 = vmax.f32 %v2888_v46, 0.0  ;;  %v4466_v46 = vld [vmem:[#allocation16 + $0x70] sm:$0xff] }
 0xab8   : > { %3200 = vmatpush.bf16.msrb.mxu2 %v4466_v46 }
 0xab9   : > { %v2933_v5 = vpack.c.bf16 %v2920_v61, %v2919_v12 }
 0xabb   : > { %3027 = vmatmul.bf16.gmra.mxu1 %v2933_v5 }
 0xabc   : > { %v2890_v14 = vpop.f32.mrf.mxu0 }
 0xabd   : > { %v2891_v43 = vadd.f32 %v4613_v3, %v2890_v14 }
 0xabf   : > { %v2921_v1 = vmax.f32 %v2891_v43, 0.0  ;;  %v4465_v43 = vld [vmem:[#allocation16 + $0x68] sm:$0xff] }
 0xac0   : > { %3201 = vmatpush.bf16.msrb.mxu2 %v4465_v43  ;;  %v4477_v43 = vld [vmem:[#allocation16 + $0xc8] sm:$0xff] }
 0xac4   : > { %v2892_v37 = vpop.f32.mrf.mxu0 }
 0xac5   : > { %v2893_v32 = vadd.f32 %v4613_v3, %v2892_v37 }
 0xac7   : > { %v2922_v63 = vmax.f32 %v2893_v32, 0.0 }
 0xac9   : > { %v2934_v4 = vpack.c.bf16 %v2922_v63, %v2921_v1 }
 0xacb   : > { %3032 = vmatmul.bf16.gmra.mxu1 %v2934_v4  ;;  %v4464_v4 = vld [vmem:[#allocation16 + $0x60] sm:$0xff] }
 0xacc   : > { %v2895_v49 = vpop.f32.mrf.mxu0  ;;  %3202 = vmatpush.bf16.msrb.mxu2 %v4464_v4 }
 0xacd   : > { %v2896_v48 = vadd.f32 %v4613_v3, %v2895_v49 }
 0xacf   : > { %v2923_v24 = vmax.f32 %v2896_v48, 0.0 }
 0xad4   : > { %v2897_v25 = vpop.f32.mrf.mxu0 }
 0xad5   : > { %v2898_v54 = vadd.f32 %v4613_v3, %v2897_v25 }
 0xad7   : > { %v2924_v9 = vmax.f32 %v2898_v54, 0.0 }
 0xad9   : > { %v2935_v11 = vpack.c.bf16 %v2924_v9, %v2923_v24  ;;  %v4463_v24 = vld [vmem:[#allocation16 + $0x58] sm:$0xff] }
 0xada   : > { %3203 = vmatpush.bf16.msrb.mxu2 %v4463_v24 }
 0xadb   : > { %3037 = vmatmul.bf16.gmra.mxu1 %v2935_v11 }
 0xadc   : > { %v2900_v52 = vpop.f32.mrf.mxu0 }
 0xadd   : > { %v2901_v22 = vadd.f32 %v4613_v3, %v2900_v52 }
 0xadf   : > { %v2925_v62 = vmax.f32 %v2901_v22, 0.0 }
 0xae4   : > { %v2902_v28 = vpop.f32.mrf.mxu0 }
 0xae5   : > { %v2903_v10 = vadd.f32 %v4613_v3, %v2902_v28  ;;  %v4462_v28 = vld [vmem:[#allocation16 + $0x50] sm:$0xff] }
 0xae6   : > { %3204 = vmatpush.bf16.msrb.mxu2 %v4462_v28 }
 0xae7   : > { %v2926_v33 = vmax.f32 %v2903_v10, 0.0 }
 0xae9   : > { %v2936_v23 = vpack.c.bf16 %v2926_v33, %v2925_v62 }
 0xaeb   : > { %3042 = vmatmul.bf16.gmra.mxu1 %v2936_v23 }
 0xaec   : > { %v2905_v2 = vpop.f32.mrf.mxu0 }
 0xaed   : > { %v2906_v56 = vadd.f32 %v4613_v3, %v2905_v2  ;;  %v4461_v2 = vld [vmem:[#allocation16 + $0x48] sm:$0xff] }
 0xaee   : > { %3205 = vmatpush.bf16.msrb.mxu2 %v4461_v2 }
 0xaef   : > { %v2927_v29 = vmax.f32 %v2906_v56, 0.0 }
 0xaf4   : > { %v2907_v7 = vpop.f32.mrf.mxu0 }
 0xaf5   : > { %v2908_v41 = vadd.f32 %v4613_v3, %v2907_v7 }
 0xaf7   : > { %v2928_v36 = vmax.f32 %v2908_v41, 0.0 }
 0xaf9   : > { %v2937_v57 = vpack.c.bf16 %v2928_v36, %v2927_v29 }
 0xafb   : > { %3047 = vmatmul.bf16.gmra.mxu1 %v2937_v57 }
 0xafc   : > { %v2910_v60 = vpop.f32.mrf.mxu0 }
 0xafd   : > { %v2911_v53 = vadd.f32 %v4613_v3, %v2910_v60  ;;  %v3095_v60 = vld [vmem:[#allocation10] sm:$0xff] }
 0xaff   : > { %v2929_v0 = vmax.f32 %v2911_v53, 0.0  ;;  %v4459_v53 = vld [vmem:[#allocation16 + $0x38] sm:$0xff] }
 0xb04   : > { %v2912_v8 = vpop.f32.mrf.mxu0 }
 0xb05   : > { %v2913_v47 = vadd.f32 %v4613_v3, %v2912_v8  ;;  %v4458_v8 = vld [vmem:[#allocation16 + $0x30] sm:$0xff] }
 0xb07   : > { %v2930_v19 = vmax.f32 %v2913_v47, 0.0  ;;  %v4457_v47 = vld [vmem:[#allocation16 + $0x28] sm:$0xff] }
 0xb09   : > { %v2938_v58 = vpack.c.bf16 %v2930_v19, %v2929_v0  ;;  %v4456_v0 = vld [vmem:[#allocation16 + $0x20] sm:$0xff]  ;;  %v4455_v19 = vld [vmem:[#allocation16 + $0x18] sm:$0xff] }
 0xb0b   : > { %3052 = vmatmul.bf16.gmra.mxu1 %v2938_v58  ;;  %v4454_v58 = vld [vmem:[#allocation16 + $0x10] sm:$0xff] }
 0xb18   : > { %v5947_v17 = vpop.f32.mrf.mxu1 }
 0xb19   : > { %v3019_v41 = vadd.f32 %v4614_v42, %v5947_v17  ;;  %v4453_v17 = vld [vmem:[#allocation16 + $0x8] sm:$0xff] }
 0xb1b   : > { %v3058_v57 = vmax.f32 %v3019_v41, 0.0 }
 0xb20   : > { %v5949_v40 = vpop.f32.mrf.mxu1 }
 0xb21   : > { %v3021_v56 = vadd.f32 %v4614_v42, %v5949_v40  ;;  %v4452_v40 = vld [vmem:[#allocation16] sm:$0xff] }
 0xb23   : > { %v3059_v36 = vmax.f32 %v3021_v56, 0.0 }
 0xb28   : > { %v3023_v21 = vpop.f32.mrf.mxu1 }
 0xb29   : > { %v3024_v33 = vadd.f32 %v4614_v42, %v3023_v21  ;;  %v3092_v21 = vpop.f32.mrf.mxu2 }
 0xb2b   : > { %v3060_v29 = vmax.f32 %v3024_v33, 0.0 }
 0xb30   : > { %v3025_v38 = vpop.f32.mrf.mxu1 }
 0xb31   : > { %v3026_v10 = vadd.f32 %v4614_v42, %v3025_v38  ;;  %v3116_v38 = vpack.c.bf16 %v3092_v21, %v3092_v21 }
 0xb33   : > { %v3061_v7 = vmax.f32 %v3026_v10, 0.0 }
 0xb38   : > { %v3028_v27 = vpop.f32.mrf.mxu1 }
 0xb39   : > { %v3029_v52 = vadd.f32 %v4614_v42, %v3028_v27  ;;  %v4460_v27 = vld [vmem:[#allocation16 + $0x40] sm:$0xff] }
 0xb3a   : > { %3206 = vmatpush.bf16.msrb.mxu2 %v4460_v27 }
 0xb3b   : > { %v3062_v23 = vmax.f32 %v3029_v52, 0.0 }
 0xb40   : > { %v3030_v26 = vpop.f32.mrf.mxu1 }
 0xb41   : > { %v3031_v9 = vadd.f32 %v4614_v42, %v3030_v26  ;;  %v4475_v26 = vld [vmem:[#allocation16 + $0xb8] sm:$0xff] }
 0xb42   : > { %3350 = vmatpush.bf16.msra.mxu2 %v4475_v26 }
 0xb43   : > { %v3063_v62 = vmax.f32 %v3031_v9, 0.0 }
 0xb48   : > { %v3033_v55 = vpop.f32.mrf.mxu1 }
 0xb49   : > { %v3034_v25 = vadd.f32 %v4614_v42, %v3033_v55  ;;  %v4474_v55 = vld [vmem:[#allocation16 + $0xb0] sm:$0xff] }
 0xb4a   : > { %3351 = vmatpush.bf16.msra.mxu2 %v4474_v55 }
 0xb4b   : > { %v3064_v22 = vmax.f32 %v3034_v25, 0.0  ;;  %v4617_v25 = vld [vmem:[%s6026_s16 + $0x2] ss:$0 sm:$0xff] }
 0xb50   : > { %v3035_v18 = vpop.f32.mrf.mxu1 }
 0xb51   : > { %v3036_v49 = vadd.f32 %v4614_v42, %v3035_v18  ;;  %v4473_v18 = vld [vmem:[#allocation16 + $0xa8] sm:$0xff] }
 0xb52   : > { %3352 = vmatpush.bf16.msra.mxu2 %v4473_v18 }
 0xb53   : > { %v3065_v11 = vmax.f32 %v3036_v49, 0.0 }
 0xb58   : > { %v3038_v13 = vpop.f32.mrf.mxu1 }
 0xb59   : > { %v3039_v1 = vadd.f32 %v4614_v42, %v3038_v13  ;;  %v4472_v13 = vld [vmem:[#allocation16 + $0xa0] sm:$0xff] }
 0xb5a   : > { %3353 = vmatpush.bf16.msra.mxu2 %v4472_v13 }
 0xb5b   : > { %v3066_v54 = vmax.f32 %v3039_v1, 0.0 }
 0xb60   : > { %v3040_v59 = vpop.f32.mrf.mxu1 }
 0xb61   : > { %v3041_v37 = vadd.f32 %v4614_v42, %v3040_v59  ;;  %v4471_v59 = vld [vmem:[#allocation16 + $0x98] sm:$0xff] }
 0xb62   : > { %3354 = vmatpush.bf16.msra.mxu2 %v4471_v59 }
 0xb63   : > { %v3067_v48 = vmax.f32 %v3041_v37, 0.0  ;;  %v4476_v37 = vld [vmem:[#allocation16 + $0xc0] sm:$0xff] }
 0xb68   : > { %v3043_v50 = vpop.f32.mrf.mxu1 }
 0xb69   : > { %v3044_v5 = vadd.f32 %v4614_v42, %v3043_v50  ;;  %v4470_v50 = vld [vmem:[#allocation16 + $0x90] sm:$0xff] }
 0xb6a   : > { %3355 = vmatpush.bf16.msra.mxu2 %v4470_v50 }
 0xb6b   : > { %v3068_v63 = vmax.f32 %v3044_v5, 0.0 }
 0xb70   : > { %v3045_v30 = vpop.f32.mrf.mxu1 }
 0xb71   : > { %v3046_v12 = vadd.f32 %v4614_v42, %v3045_v30 }
 0xb73   : > { %v3069_v32 = vmax.f32 %v3046_v12, 0.0 }
 0xb78   : > { %v3048_v51 = vpop.f32.mrf.mxu1 }
 0xb79   : > { %v3049_v16 = vadd.f32 %v4614_v42, %v3048_v51 }
 0xb7b   : > { %v3070_v14 = vmax.f32 %v3049_v16, 0.0  ;;  %v4615_v16 = vld [vmem:[%s6026_s16] ss:$0 sm:$0xff] }
 0xb80   : > { %v3050_v3 = vpop.f32.mrf.mxu1 }
 0xb81   : > { %v3051_v44 = vadd.f32 %v4614_v42, %v3050_v3 }
 0xb83   : > { %v3071_v61 = vmax.f32 %v3051_v44, 0.0  ;;  %v4480_v44 = vld [vmem:[#allocation16 + $0xe0] sm:$0xff] }
 0xb88   : > { %v3053_v34 = vpop.f32.mrf.mxu1 }
 0xb89   : > { %v3054_v35 = vadd.f32 %v4614_v42, %v3053_v34  ;;  %v4469_v34 = vld [vmem:[#allocation16 + $0x88] sm:$0xff] }
 0xb8a   : > { %3356 = vmatpush.bf16.msra.mxu2 %v4469_v34 }
 0xb8b   : > { %v3072_v15 = vmax.f32 %v3054_v35, 0.0  ;;  %v4482_v35 = vld [vmem:[#allocation16 + $0xf0] sm:$0xff] }
 0xb90   : > { %v3055_v20 = vpop.f32.mrf.mxu1 }
 0xb91   : > { %v3056_v45 = vadd.f32 %v4614_v42, %v3055_v20  ;;  %v4468_v42 = vld [vmem:[#allocation16 + $0x80] sm:$0xff]  ;;  %v4483_v20 = vld [vmem:[#allocation16 + $0xf8] sm:$0xff] }
 0xb92   : > { %3357 = vmatpush.bf16.msra.mxu2 %v4468_v42 }
 0xb93   : > { %v3073_v31 = vmax.f32 %v3056_v45, 0.0  ;;  %v4481_v45 = vld [vmem:[#allocation16 + $0xe8] sm:$0xff] }
 0xb95   : > { %3096 = vmatpush.msra.mxu3 %v3073_v31  ;;  %v4479_v31 = vld [vmem:[#allocation16 + $0xd8] sm:$0xff] }
 0xb97   : > { %3097 = vmatpush.msra.mxu3 %v3072_v15 }
 0xb99   : > { %3098 = vmatpush.msra.mxu3 %v3071_v61 }
 0xb9b   : > { %3099 = vmatpush.msra.mxu3 %v3070_v14 }
 0xb9d   : > { %3100 = vmatpush.msra.mxu3 %v3069_v32  ;;  %v4616_v32 = vld [vmem:[%s6026_s16 + $0x1] ss:$0 sm:$0xff] }
 0xb9f   : > { %3101 = vmatpush.msra.mxu3 %v3068_v63 }
 0xba1   : > { %3102 = vmatpush.msra.mxu3 %v3067_v48 }
 0xba3   : > { %3103 = vmatpush.msra.mxu3 %v3066_v54 }
 0xba5   : > { %3104 = vmatpush.msra.mxu3 %v3065_v11 }
 0xba7   : > { %3105 = vmatpush.msra.mxu3 %v3064_v22 }
 0xba9   : > { %3106 = vmatpush.msra.mxu3 %v3063_v62 }
 0xbab   : > { %3107 = vmatpush.msra.mxu3 %v3062_v23 }
 0xbad   : > { %3108 = vmatpush.msra.mxu3 %v3061_v7 }
 0xbaf   : > { %3109 = vmatpush.msra.mxu3 %v3060_v29 }
 0xbb1   : > { %3110 = vmatpush.msra.mxu3 %v3059_v36 }
 0xbb3   : > { %3111 = vmatpush.msra.mxu3 %v3058_v57 }
 0xbb4   : > { %3112 = vmatmul.f32.vlgmr.msra.gmra.mxu3 %v3095_v60 }
 0xbb5   : > { %3260 = vmatpush.bf16.msrb.mxu3 %v4459_v53 }
 0xbb9   : > { %3261 = vmatpush.bf16.msrb.mxu3 %v4458_v8 }
 0xbbd   : > { %3262 = vmatpush.bf16.msrb.mxu3 %v4457_v47 }
 0xbc1   : > { %3263 = vmatpush.bf16.msrb.mxu3 %v4456_v0 }
 0xbc5   : > { %3264 = vmatpush.bf16.msrb.mxu3 %v4455_v19 }
 0xbc9   : > { %3265 = vmatpush.bf16.msrb.mxu3 %v4454_v58 }
 0xbcd   : > { %3266 = vmatpush.bf16.msrb.mxu3 %v4453_v17 }
 0xbd1   : > { %3267 = vmatpush.bf16.msrb.mxu3 %v4452_v40 }
 0xbd4   : > { %3268 = vmatmul.bf16.vlgmr.msrb.gmra.mxu3 %v3116_v38 }
 0xbd5   : > { %3435 = vmatpush.bf16.msra.mxu3 %v4483_v20 }
 0xbd9   : > { %3436 = vmatpush.bf16.msra.mxu3 %v4482_v35 }
 0xbdd   : > { %3437 = vmatpush.bf16.msra.mxu3 %v4481_v45 }
 0xbe1   : > { %3438 = vmatpush.bf16.msra.mxu3 %v4480_v44 }
 0xbe5   : > { %3439 = vmatpush.bf16.msra.mxu3 %v4479_v31 }
 0xbe9   : > { %3440 = vmatpush.bf16.msra.mxu3 %v4478_v39 }
 0xbed   : > { %3441 = vmatpush.bf16.msra.mxu3 %v4477_v43 }
 0xbf1   : > { %3442 = vmatpush.bf16.msra.mxu3 %v4476_v37 }
 0xc37   : > { %v3113_v30 = vpop.f32.mrf.mxu3 }
 0xc38   : > { %v3133_v51 = vpack.c.bf16 %v3113_v30, %v3113_v30 }
 0xc3a   : > { %3207 = vmatmul.bf16.vlgmr.msrb.gmra.mxu2 %v3133_v51 }
 0xc57   : > { %v3269_v3 = vpop.f32.mrf.mxu3 }
 0xc5f   : > { %v3271_v6 = vpop.f32.mrf.mxu3 }
 0xcbd   : > { %v3208_v15 = vpop.f32.mrf.mxu2 }
 0xcbe   : > { %v3270_v46 = vadd.f32 %v3269_v3, %v3208_v15 }
 0xcc0   : > { %v3277_v12 = vadd.f32 %v4615_v16, %v3270_v46 }
 0xcc2   : > { %v3278_v61 = vmax.f32 %v3277_v12, 0.0 }
 0xcc4   : > { %v3279_v5 = vpack.c.bf16 %v3278_v61, %v3278_v61 }
 0xcc5   : > { %v3210_v14 = vpop.f32.mrf.mxu2 }
 0xcc6   : > { %3358 = vmatmul.bf16.vlgmr.msra.gmra.mxu2 %v3279_v5 }
 0xd49   : > { %v3359_v1 = vpop.f32.mrf.mxu2 }
 0xd4a   : > { %v3360_v63 = vadd.f32 %v4616_v32, %v3359_v1 }
 0xd4c   : > { %v3363_v4 = vmax.f32 %v3360_v63, 0.0 }
 0xd4e   : > { %v3364_v49 = vpack.c.bf16 %v3363_v4, %v3363_v4 }
 0xd50   : > { %3443 = vmatmul.bf16.vlgmr.msra.gmra.mxu3 %v3364_v49 }
 0xd51   : > { %v3361_v48 = vpop.f32.mrf.mxu2 }
 0xdd3   : > { %v3444_v54 = vpop.f32.mrf.mxu3 }
 0xdd4   : > { %v3445_v24 = vadd.f32 %v4617_v25, %v3444_v54 }
 0xdd6   : > { %v3448_v9 = vmax.f32 %v3445_v24, 0.0 }
 0xdd8   : > { %3449 = vst [vmem:[%s651_s20] sm:$0xff] %v3448_v9 }
 0xddb   : > { %v3446_v11 = vpop.f32.mrf.mxu3 }
 0xddc PF: > { %s6028_s24 = sld [smem:[#allocation25_spill]]  ;;  %s6030_s21 = smov %s4977_s22 }
 0xddd   : > { %s6029_s27 = sld [smem:[#allocation26_spill]]  ;;  %s6031_s22 = smov %s4981_s23 }
 0xde2   : > { %p31_p3 = scmp.ge.s32.totalorder %s6028_s24, 4  }
 0xde3   : > { %s6032_s23 = smov %s6029_s27 }
 0xde4   :  { %33 = sbr.rel (!%p31_p3) target bundleno = 19 (0x13), region = 194 }
 0xde9   :  { %3469 = vsyncpa [#allocation3], 1 }
 0xdea   :  { %3471 = vsyncpa [#allocation3 + $0x1], 1 }
 0xdeb   :  { %3472 = vsyncpa [#allocation5], 1 }
 0xdec   :  { %3474 = vsyncpa [#allocation5 + $0x1], 1 }
 0xded   :  { %3475 = vsyncpa [#allocation8], 1 }
 0xdee   :  { %3477 = vsyncpa [#allocation8 + $0x1], 1 }
 0xdef   :  { %3478 = vsyncpa [#allocation11], 1 }
 0xdf0   :  { %3479 = vsyncpa [#allocation14], 1 }
 0xdf1   :  { %3480 = vsyncpa [#allocation17], 1 }

</bundles_post_ra>
